<compile_context>
chip_gen: v7x
topology: tpu7x:2x2x1
jax: 0.10.0
libtpu: 0.0.40
codegen_flags: <defaults>
</compile_context>

<pallas_src>
import math

import jax
import jax.numpy as jnp
from jax.experimental import pallas as pl
from jax.experimental.pallas import tpu as pltpu


# ----------------------------------------------------------------------------
# Activation (matches torch defaults)
# ----------------------------------------------------------------------------
def _act(h, nonlin):
    if nonlin == "leaky_relu":
        # identical to where(h>0, h, 0.01*h) for slope in (0,1): 1 VALU max
        # instead of compare+select (review item).
        return jnp.maximum(h, 0.01 * h)
    if nonlin == "relu":
        return jnp.maximum(h, 0.0)
    if nonlin == "elu":
        return jnp.where(h > 0, h, jnp.expm1(h))           # alpha = 1
    if nonlin == "softplus":
        return jnp.log1p(jnp.exp(-jnp.abs(h))) + jnp.maximum(h, 0.0)
    raise NotImplementedError(nonlin)


# ----------------------------------------------------------------------------
# Kernel factory: the WHOLE network fused (loop over blocks/layers inside body)
# ----------------------------------------------------------------------------
def make_net_kernel(dim, n_freq, n_layers, n_blocks, nonlin, chunk, fused_io):
    use_pe = n_freq is not None
    nf = n_freq if use_pe else 0
    consts = [float((2.0 ** k) * math.pi) for k in range(nf)]

    def g_block(x, w, r):
        # x: (dim, ct) f32, tokens lane-dense.
        # First (spectral-normed) Linear on the LipBoundedPosEnc features, evaluated
        # as per-frequency partial matmuls: y = Wx@x + sum_k [Wsin_k@sin(c_k x) +
        # Wcos_k@cos(c_k x)] + b.  No (2*nf*dim+dim, ct) sublane concat is ever
        # materialized (removes XLU relayouts / VMEM copies flagged in the review).
        if use_pe:
            wx = w[r + 2 * nf]
            h = jnp.dot(wx[...], x.astype(wx.dtype),
                        preferred_element_type=jnp.float32)
            for k in range(nf):
                cx = consts[k] * x                                   # f32 VALU
                ws, wc = w[r + k], w[r + nf + k]
                h = h + jnp.dot(ws[...], jnp.sin(cx).astype(ws.dtype),
                                preferred_element_type=jnp.float32)
                h = h + jnp.dot(wc[...], jnp.cos(cx).astype(wc.dtype),
                                preferred_element_type=jnp.float32)
            h = h + w[r + 2 * nf + 1][...]                           # bias (hid,1) f32
            r += 2 * nf + 2
        else:
            W0 = w[r]
            h = jnp.dot(W0[...], x.astype(W0.dtype),
                        preferred_element_type=jnp.float32) + w[r + 1][...]
            r += 2
        h = _act(h, nonlin)
        for l in range(1, n_layers):
            W = w[r]
            b = w[r + 1][...]
            r += 2
            h = jnp.dot(W[...], h.astype(W.dtype),
                        preferred_element_type=jnp.float32) + b
            if l < n_layers - 1:
                h = _act(h, nonlin)
        return x + h, r                                              # residual (f32)

    def net_on_chunk(xc, w_refs):
        r = 0
        for _ in range(n_blocks):
            xc, r = g_block(xc, w_refs, r)
        return xc

    def kernel(*refs):
        x_ref, o_ref = refs[0], refs[-1]
        w_refs = refs[1:-1]          # flat weights/biases, all VMEM-resident
        tn = x_ref.shape[0] if fused_io else x_ref.shape[1]
        # Chunk the token axis so per-chunk live vregs stay well under 64 even for
        # large tn (spill guard), while the per-grid-step DMA stays one big block.
        # (No cross-lane reductions anywhere, so garbage in padded lanes/rows of a
        # partial last block is harmless and masked on store.)
        for c0 in range(0, tn, chunk):
            c1 = c0 + chunk
            if fused_io:
                # natural (ct, dim) slab -> lane-dense (dim, ct) on the XLU
                xc = x_ref[c0:c1, :].T
                yc = net_on_chunk(xc, w_refs)
                o_ref[c0:c1, :] = yc.T
            else:
                o_ref[:, c0:c1] = net_on_chunk(x_ref[:, c0:c1], w_refs)

    return kernel


# ----------------------------------------------------------------------------
# Wrapper: one pallas_call for the full network, grid over token tiles only
# ----------------------------------------------------------------------------
_FUSED_IO_OK = True   # flips to False if Mosaic rejects the in-kernel relayout


def _pick_tile(n, tn_req):
    # Big tiles amortize the ~0.35us per-grid-step overhead; keep >= ~8 steps when
    # n allows so both v7x TensorCores get several steps each and per-core double
    # buffering stays active.
    cap = max(256, ((n + 7) // 8 + 127) // 128 * 128)
    tn = max(128, (min(int(tn_req), cap) // 128) * 128)
    if tn > 512:
        tn = (tn // 512) * 512        # 512-lane in-kernel chunks divide evenly
    return tn


def net_forward(x, flat_params, cfg, tn=1024):
    global _FUSED_IO_OK
    bs, npts, dim = x.shape
    assert dim == cfg["dim"]
    assert cfg.get("out_dim", dim) == dim, "residual blocks require out_dim == dim"
    n = bs * npts
    n_layers = cfg["n_g_blocks"] + 2

    tn = _pick_tile(n, tn)
    chunk = min(512, tn)

    x2 = x.reshape(n, dim).astype(jnp.float32)               # free if already f32
    w_specs = [pl.BlockSpec(memory_space=pltpu.MemorySpace.VMEM)] * len(flat_params)
    cparams = pltpu.CompilerParams(dimension_semantics=("parallel",))

    if _FUSED_IO_OK:
        # Preferred path: zero wrapper-side transpose/pad HBM passes; partial last
        # block handled by Pallas masking (grid = cdiv(n, tn)).
        try:
            kern = make_net_kernel(dim, cfg["pos_enc_freq"], n_layers,
                                   cfg["n_blocks"], cfg["nonlin"], chunk,
                                   fused_io=True)
            out = pl.pallas_call(
                kern,
                out_shape=jax.ShapeDtypeStruct((n, dim), jnp.float32),
                grid=(pl.cdiv(n, tn),),
                in_specs=[pl.BlockSpec((tn, dim), lambda i: (i, 0))] + w_specs,
                out_specs=pl.BlockSpec((tn, dim), lambda i: (i, 0)),
                compiler_params=cparams,
            )(x2, *flat_params)
            out = jax.block_until_ready(out)   # force compile+run inside the try
            return out.reshape(bs, npts, dim)
        except Exception:
            # TODO(synk): Mosaic rejected the in-kernel (ct,dim)<->(dim,ct) relayout
            # on this chip / jax version; fall back to wrapper-side transposes
            # (costs ~2 extra HBM passes but always lowers).
            _FUSED_IO_OK = False

    # Fallback (previously validated): lane-dense (dim, N_pad) layout with
    # wrapper-side transpose + pad, full-lane output stores.
    n_pad = pl.cdiv(n, tn) * tn
    xt = jnp.pad(x2.T, ((0, 0), (0, n_pad - n)))             # (dim, n_pad)
    kern = make_net_kernel(dim, cfg["pos_enc_freq"], n_layers,
                           cfg["n_blocks"], cfg["nonlin"], chunk,
                           fused_io=False)
    out = pl.pallas_call(
        kern,
        out_shape=jax.ShapeDtypeStruct((dim, n_pad), jnp.float32),
        grid=(n_pad // tn,),
        in_specs=[pl.BlockSpec((dim, tn), lambda i: (0, i))] + w_specs,
        out_specs=pl.BlockSpec((dim, tn), lambda i: (0, i)),
        compiler_params=cparams,
    )(xt, *flat_params)
    return out[:, :n].T.reshape(bs, npts, dim)


# ----------------------------------------------------------------------------
# Deterministic parameter init (torch nn.Linear uniform + spectral norm)
# PyTorch layout: W (fan_out, fan_in) f32, b (fan_out,) f32.
# TODO(synk): torch spectral_norm uses a running power iteration per forward;
#             here it is applied exactly once via SVD at init.
# ----------------------------------------------------------------------------
def init_params(key, cfg):
    dim, hid, nf = cfg["dim"], cfg["hidden_size"], cfg["pos_enc_freq"]
    inp_pe = dim * (2 * nf + 1) if nf is not None else dim
    layer_dims = [(inp_pe, hid)] + [(hid, hid)] * cfg["n_g_blocks"] + [(hid, dim)]
    blocks = []
    for _ in range(cfg["n_blocks"]):
        layers = []
        for (fan_in, fan_out) in layer_dims:
            key, kw, kb = jax.random.split(key, 3)
            bound = 1.0 / math.sqrt(fan_in)
            w = jax.random.uniform(kw, (fan_out, fan_in), jnp.float32, -bound, bound)
            b = jax.random.uniform(kb, (fan_out,), jnp.float32, -bound, bound)
            sigma = jnp.linalg.svd(w, compute_uv=False)[0]
            layers.append((w / sigma, b))
        blocks.append(layers)
    return blocks


def prepare_params(blocks, cfg, mm_dtype=jnp.bfloat16):
    """PyTorch-layout params -> flat kernel params.

    The first Linear of every block is split per (sin/cos, frequency) group so the
    kernel never materializes the pos-enc concat: columns are regrouped from the
    PyTorch per-feature ordering and the 1/c_k, 1/sqrt(2*n_freq+1) LipBoundedPosEnc
    scales are folded in (in f32, before the bf16 cast).  Weights -> mm_dtype for
    single-pass MXU with f32 accumulation; biases stay f32 as (out, 1) columns.
    Flat order per block: Wsin_0..Wsin_{nf-1}, Wcos_0..Wcos_{nf-1}, Wx, b0,
    then (W, b) for every remaining layer.
    """
    dim, nf = cfg["dim"], cfg["pos_enc_freq"]
    flat = []
    for layers in blocks:
        for li, (W, b) in enumerate(layers):
            W = jnp.asarray(W, jnp.float32)
            b = jnp.asarray(b, jnp.float32).reshape(-1, 1)
            if li == 0 and nf is not None:
                pe_scale = 1.0 / math.sqrt(2 * nf + 1)
                # PyTorch PE column order: j*2*nf + trig*nf + k, then raw x at the end.
                for trig in range(2):                          # 0: sin, 1: cos
                    for k in range(nf):
                        cols = jnp.array([j * 2 * nf + trig * nf + k
                                          for j in range(dim)])
                        ck = (2.0 ** k) * math.pi
                        flat.append((W[:, cols] * (pe_scale / ck)).astype(mm_dtype))
                xcols = jnp.array([2 * nf * dim + j for j in range(dim)])
                flat.append((W[:, xcols] * pe_scale).astype(mm_dtype))
                flat.append(b)
            else:
                flat.append(W.astype(mm_dtype))
                flat.append(b)
    return flat


# ----------------------------------------------------------------------------
# Pure-JAX reference (mirrors the PyTorch module) for a sanity check
# ----------------------------------------------------------------------------
def net_forward_ref(x, blocks, cfg):
    nf, dim = cfg["pos_enc_freq"], cfg["dim"]
    out = x.astype(jnp.float32)
    for layers in blocks:
        y = out
        if nf is not None:
            const = (2.0 ** jnp.arange(nf)) * jnp.pi                 # (nf,)
            xe = y[..., None]                                        # (bs,np,dim,1)
            sin_f = jnp.sin(const * xe) / const
            cos_f = jnp.cos(const * xe) / const
            pe = jnp.concatenate([sin_f, cos_f], axis=-1).reshape(
                y.shape[0], y.shape[1], dim * 2 * nf)
            pe = jnp.concatenate([pe, y], axis=-1) / math.sqrt(2 * nf + 1)
        else:
            pe = y
        h = pe
        for li, (W, b) in enumerate(layers):
            h = h @ W.T + b
            if li < len(layers) - 1:
                h = _act(h, cfg["nonlin"])
        out = out + h
    return out


if __name__ == "__main__":
    cfg = dict(
        dim=3,
        out_dim=3,
        hidden_size=32,
        n_blocks=2,
        n_g_blocks=1,
        nonlin="leaky_relu",
        pos_enc_freq=2,
    )

    key = jax.random.PRNGKey(0)
    kx, kp = jax.random.split(key)
    bs, npts = 2, 1000           # n = 2000 -> 8 grid steps, incl. a partial block
    x = jax.random.normal(kx, (bs, npts, cfg["dim"]), dtype=jnp.float32)

    raw_params = init_params(kp, cfg)
    params = prepare_params(raw_params, cfg)

    out = jax.block_until_ready(net_forward(x, params, cfg))
    assert out.shape == (bs, npts, cfg["dim"])
    assert bool(jnp.all(jnp.isfinite(out)))

    ref = net_forward_ref(x, raw_params, cfg)
    err = float(jnp.max(jnp.abs(out - ref)))
    assert err < 1e-1, f"max abs err vs reference: {err}"

    print("KERNEL_OK")
</pallas_src>

<mosaic_0001>
module attributes {stable_mosaic.version = 11 : i64} {
  func.func @kernel(%arg0: i32, %arg1: memref<256x3xf32, #tpu.memory_space<vmem>>, %arg2: memref<32x3xbf16, #tpu.memory_space<vmem>>, %arg3: memref<32x3xbf16, #tpu.memory_space<vmem>>, %arg4: memref<32x3xbf16, #tpu.memory_space<vmem>>, %arg5: memref<32x3xbf16, #tpu.memory_space<vmem>>, %arg6: memref<32x3xbf16, #tpu.memory_space<vmem>>, %arg7: memref<32x1xf32, #tpu.memory_space<vmem>>, %arg8: memref<32x32xbf16, #tpu.memory_space<vmem>>, %arg9: memref<32x1xf32, #tpu.memory_space<vmem>>, %arg10: memref<3x32xbf16, #tpu.memory_space<vmem>>, %arg11: memref<3x1xf32, #tpu.memory_space<vmem>>, %arg12: memref<32x3xbf16, #tpu.memory_space<vmem>>, %arg13: memref<32x3xbf16, #tpu.memory_space<vmem>>, %arg14: memref<32x3xbf16, #tpu.memory_space<vmem>>, %arg15: memref<32x3xbf16, #tpu.memory_space<vmem>>, %arg16: memref<32x3xbf16, #tpu.memory_space<vmem>>, %arg17: memref<32x1xf32, #tpu.memory_space<vmem>>, %arg18: memref<32x32xbf16, #tpu.memory_space<vmem>>, %arg19: memref<32x1xf32, #tpu.memory_space<vmem>>, %arg20: memref<3x32xbf16, #tpu.memory_space<vmem>>, %arg21: memref<3x1xf32, #tpu.memory_space<vmem>>, %arg22: memref<256x3xf32, #tpu.memory_space<vmem>>) attributes {dimension_semantics = [#tpu.dimension_semantics<parallel>], iteration_bounds = array<i64: 8>, scalar_prefetch = 0 : i64, scratch_operands = 0 : i64, tpu.core_type = #tpu.core_type<tc>, window_params = [{transform_indices = @transform_0, window_bounds = array<i64: 256, 3>}, {pipeline_mode = #tpu.pipeline_mode<synchronous>, transform_indices = @transform_1, window_bounds = array<i64: 32, 3>}, {pipeline_mode = #tpu.pipeline_mode<synchronous>, transform_indices = @transform_2, window_bounds = array<i64: 32, 3>}, {pipeline_mode = #tpu.pipeline_mode<synchronous>, transform_indices = @transform_3, window_bounds = array<i64: 32, 3>}, {pipeline_mode = #tpu.pipeline_mode<synchronous>, transform_indices = @transform_4, window_bounds = array<i64: 32, 3>}, {pipeline_mode = #tpu.pipeline_mode<synchronous>, transform_indices = @transform_5, window_bounds = array<i64: 32, 3>}, {pipeline_mode = #tpu.pipeline_mode<synchronous>, transform_indices = @transform_6, window_bounds = array<i64: 32, 1>}, {pipeline_mode = #tpu.pipeline_mode<synchronous>, transform_indices = @transform_7, window_bounds = array<i64: 32, 32>}, {pipeline_mode = #tpu.pipeline_mode<synchronous>, transform_indices = @transform_8, window_bounds = array<i64: 32, 1>}, {pipeline_mode = #tpu.pipeline_mode<synchronous>, transform_indices = @transform_9, window_bounds = array<i64: 3, 32>}, {pipeline_mode = #tpu.pipeline_mode<synchronous>, transform_indices = @transform_10, window_bounds = array<i64: 3, 1>}, {pipeline_mode = #tpu.pipeline_mode<synchronous>, transform_indices = @transform_11, window_bounds = array<i64: 32, 3>}, {pipeline_mode = #tpu.pipeline_mode<synchronous>, transform_indices = @transform_12, window_bounds = array<i64: 32, 3>}, {pipeline_mode = #tpu.pipeline_mode<synchronous>, transform_indices = @transform_13, window_bounds = array<i64: 32, 3>}, {pipeline_mode = #tpu.pipeline_mode<synchronous>, transform_indices = @transform_14, window_bounds = array<i64: 32, 3>}, {pipeline_mode = #tpu.pipeline_mode<synchronous>, transform_indices = @transform_15, window_bounds = array<i64: 32, 3>}, {pipeline_mode = #tpu.pipeline_mode<synchronous>, transform_indices = @transform_16, window_bounds = array<i64: 32, 1>}, {pipeline_mode = #tpu.pipeline_mode<synchronous>, transform_indices = @transform_17, window_bounds = array<i64: 32, 32>}, {pipeline_mode = #tpu.pipeline_mode<synchronous>, transform_indices = @transform_18, window_bounds = array<i64: 32, 1>}, {pipeline_mode = #tpu.pipeline_mode<synchronous>, transform_indices = @transform_19, window_bounds = array<i64: 3, 32>}, {pipeline_mode = #tpu.pipeline_mode<synchronous>, transform_indices = @transform_20, window_bounds = array<i64: 3, 1>}, {transform_indices = @transform_21, window_bounds = array<i64: 256, 3>}]} {
    %c0 = arith.constant 0 : index
    %c0_0 = arith.constant 0 : index
    %0 = vector.load %arg1[%c0, %c0_0] : memref<256x3xf32, #tpu.memory_space<vmem>>, vector<256x3xf32>
    %1 = tpu.transpose %0, [1, 0] : vector<256x3xf32> -> vector<3x256xf32>
    %c0_1 = arith.constant 0 : index
    %c0_2 = arith.constant 0 : index
    %2 = vector.load %arg6[%c0_1, %c0_2] : memref<32x3xbf16, #tpu.memory_space<vmem>>, vector<32x3xbf16>
    %3 = arith.truncf %1 : vector<3x256xf32> to vector<3x256xbf16>
    %cst = arith.constant dense<0.000000e+00> : vector<32x256xf32>
    %4 = tpu.matmul %2, %3, %cst {dimension_numbers = #tpu.dot_dimension_numbers<[1], [0], [0], [1], [0, 0, 1, 1], [], []>} : vector<32x3xbf16>, vector<3x256xbf16>, vector<32x256xf32> -> vector<32x256xf32>
    %cst_3 = arith.constant 3.14159274 : f32
    %5 = vector.broadcast %cst_3 : f32 to vector<3x256xf32>
    %6 = arith.mulf %5, %1 : vector<3x256xf32>
    %c0_4 = arith.constant 0 : index
    %c0_5 = arith.constant 0 : index
    %7 = vector.load %arg2[%c0_4, %c0_5] : memref<32x3xbf16, #tpu.memory_space<vmem>>, vector<32x3xbf16>
    %8 = math.sin %6 : vector<3x256xf32>
    %9 = arith.truncf %8 : vector<3x256xf32> to vector<3x256xbf16>
    %cst_6 = arith.constant dense<0.000000e+00> : vector<32x256xf32>
    %10 = tpu.matmul %7, %9, %cst_6 {dimension_numbers = #tpu.dot_dimension_numbers<[1], [0], [0], [1], [0, 0, 1, 1], [], []>} : vector<32x3xbf16>, vector<3x256xbf16>, vector<32x256xf32> -> vector<32x256xf32>
    %11 = arith.addf %4, %10 : vector<32x256xf32>
    %c0_7 = arith.constant 0 : index
    %c0_8 = arith.constant 0 : index
    %12 = vector.load %arg4[%c0_7, %c0_8] : memref<32x3xbf16, #tpu.memory_space<vmem>>, vector<32x3xbf16>
    %13 = math.cos %6 : vector<3x256xf32>
    %14 = arith.truncf %13 : vector<3x256xf32> to vector<3x256xbf16>
    %cst_9 = arith.constant dense<0.000000e+00> : vector<32x256xf32>
    %15 = tpu.matmul %12, %14, %cst_9 {dimension_numbers = #tpu.dot_dimension_numbers<[1], [0], [0], [1], [0, 0, 1, 1], [], []>} : vector<32x3xbf16>, vector<3x256xbf16>, vector<32x256xf32> -> vector<32x256xf32>
    %16 = arith.addf %11, %15 : vector<32x256xf32>
    %cst_10 = arith.constant 6.28318548 : f32
    %17 = vector.broadcast %cst_10 : f32 to vector<3x256xf32>
    %18 = arith.mulf %17, %1 : vector<3x256xf32>
    %c0_11 = arith.constant 0 : index
    %c0_12 = arith.constant 0 : index
    %19 = vector.load %arg3[%c0_11, %c0_12] : memref<32x3xbf16, #tpu.memory_space<vmem>>, vector<32x3xbf16>
    %20 = math.sin %18 : vector<3x256xf32>
    %21 = arith.truncf %20 : vector<3x256xf32> to vector<3x256xbf16>
    %cst_13 = arith.constant dense<0.000000e+00> : vector<32x256xf32>
    %22 = tpu.matmul %19, %21, %cst_13 {dimension_numbers = #tpu.dot_dimension_numbers<[1], [0], [0], [1], [0, 0, 1, 1], [], []>} : vector<32x3xbf16>, vector<3x256xbf16>, vector<32x256xf32> -> vector<32x256xf32>
    %23 = arith.addf %16, %22 : vector<32x256xf32>
    %c0_14 = arith.constant 0 : index
    %c0_15 = arith.constant 0 : index
    %24 = vector.load %arg5[%c0_14, %c0_15] : memref<32x3xbf16, #tpu.memory_space<vmem>>, vector<32x3xbf16>
    %25 = math.cos %18 : vector<3x256xf32>
    %26 = arith.truncf %25 : vector<3x256xf32> to vector<3x256xbf16>
    %cst_16 = arith.constant dense<0.000000e+00> : vector<32x256xf32>
    %27 = tpu.matmul %24, %26, %cst_16 {dimension_numbers = #tpu.dot_dimension_numbers<[1], [0], [0], [1], [0, 0, 1, 1], [], []>} : vector<32x3xbf16>, vector<3x256xbf16>, vector<32x256xf32> -> vector<32x256xf32>
    %28 = arith.addf %23, %27 : vector<32x256xf32>
    %c0_17 = arith.constant 0 : index
    %c0_18 = arith.constant 0 : index
    %29 = vector.load %arg7[%c0_17, %c0_18] : memref<32x1xf32, #tpu.memory_space<vmem>>, vector<32x1xf32>
    %30 = vector.broadcast %29 : vector<32x1xf32> to vector<32x256xf32>
    %31 = arith.addf %28, %30 : vector<32x256xf32>
    %cst_19 = arith.constant 0.00999999977 : f32
    %32 = vector.broadcast %cst_19 : f32 to vector<32x256xf32>
    %33 = arith.mulf %32, %31 : vector<32x256xf32>
    %34 = arith.maximumf %31, %33 : vector<32x256xf32>
    %c0_20 = arith.constant 0 : index
    %c0_21 = arith.constant 0 : index
    %35 = vector.load %arg9[%c0_20, %c0_21] : memref<32x1xf32, #tpu.memory_space<vmem>>, vector<32x1xf32>
    %c0_22 = arith.constant 0 : index
    %c0_23 = arith.constant 0 : index
    %36 = vector.load %arg8[%c0_22, %c0_23] : memref<32x32xbf16, #tpu.memory_space<vmem>>, vector<32x32xbf16>
    %37 = arith.truncf %34 : vector<32x256xf32> to vector<32x256xbf16>
    %cst_24 = arith.constant dense<0.000000e+00> : vector<32x256xf32>
    %38 = tpu.matmul %36, %37, %cst_24 {dimension_numbers = #tpu.dot_dimension_numbers<[1], [0], [0], [1], [0, 0, 1, 1], [], []>} : vector<32x32xbf16>, vector<32x256xbf16>, vector<32x256xf32> -> vector<32x256xf32>
    %39 = vector.broadcast %35 : vector<32x1xf32> to vector<32x256xf32>
    %40 = arith.addf %38, %39 : vector<32x256xf32>
    %cst_25 = arith.constant 0.00999999977 : f32
    %41 = vector.broadcast %cst_25 : f32 to vector<32x256xf32>
    %42 = arith.mulf %41, %40 : vector<32x256xf32>
    %43 = arith.maximumf %40, %42 : vector<32x256xf32>
    %c0_26 = arith.constant 0 : index
    %c0_27 = arith.constant 0 : index
    %44 = vector.load %arg11[%c0_26, %c0_27] : memref<3x1xf32, #tpu.memory_space<vmem>>, vector<3x1xf32>
    %c0_28 = arith.constant 0 : index
    %c0_29 = arith.constant 0 : index
    %45 = vector.load %arg10[%c0_28, %c0_29] : memref<3x32xbf16, #tpu.memory_space<vmem>>, vector<3x32xbf16>
    %46 = arith.truncf %43 : vector<32x256xf32> to vector<32x256xbf16>
    %cst_30 = arith.constant dense<0.000000e+00> : vector<3x256xf32>
    %47 = tpu.matmul %45, %46, %cst_30 {dimension_numbers = #tpu.dot_dimension_numbers<[1], [0], [0], [1], [0, 0, 1, 1], [], []>} : vector<3x32xbf16>, vector<32x256xbf16>, vector<3x256xf32> -> vector<3x256xf32>
    %48 = vector.broadcast %44 : vector<3x1xf32> to vector<3x256xf32>
    %49 = arith.addf %47, %48 : vector<3x256xf32>
    %50 = arith.addf %1, %49 : vector<3x256xf32>
    %c0_31 = arith.constant 0 : index
    %c0_32 = arith.constant 0 : index
    %51 = vector.load %arg16[%c0_31, %c0_32] : memref<32x3xbf16, #tpu.memory_space<vmem>>, vector<32x3xbf16>
    %52 = arith.truncf %50 : vector<3x256xf32> to vector<3x256xbf16>
    %cst_33 = arith.constant dense<0.000000e+00> : vector<32x256xf32>
    %53 = tpu.matmul %51, %52, %cst_33 {dimension_numbers = #tpu.dot_dimension_numbers<[1], [0], [0], [1], [0, 0, 1, 1], [], []>} : vector<32x3xbf16>, vector<3x256xbf16>, vector<32x256xf32> -> vector<32x256xf32>
    %cst_34 = arith.constant 3.14159274 : f32
    %54 = vector.broadcast %cst_34 : f32 to vector<3x256xf32>
    %55 = arith.mulf %54, %50 : vector<3x256xf32>
    %c0_35 = arith.constant 0 : index
    %c0_36 = arith.constant 0 : index
    %56 = vector.load %arg12[%c0_35, %c0_36] : memref<32x3xbf16, #tpu.memory_space<vmem>>, vector<32x3xbf16>
    %57 = math.sin %55 : vector<3x256xf32>
    %58 = arith.truncf %57 : vector<3x256xf32> to vector<3x256xbf16>
    %cst_37 = arith.constant dense<0.000000e+00> : vector<32x256xf32>
    %59 = tpu.matmul %56, %58, %cst_37 {dimension_numbers = #tpu.dot_dimension_numbers<[1], [0], [0], [1], [0, 0, 1, 1], [], []>} : vector<32x3xbf16>, vector<3x256xbf16>, vector<32x256xf32> -> vector<32x256xf32>
    %60 = arith.addf %53, %59 : vector<32x256xf32>
    %c0_38 = arith.constant 0 : index
    %c0_39 = arith.constant 0 : index
    %61 = vector.load %arg14[%c0_38, %c0_39] : memref<32x3xbf16, #tpu.memory_space<vmem>>, vector<32x3xbf16>
    %62 = math.cos %55 : vector<3x256xf32>
    %63 = arith.truncf %62 : vector<3x256xf32> to vector<3x256xbf16>
    %cst_40 = arith.constant dense<0.000000e+00> : vector<32x256xf32>
    %64 = tpu.matmul %61, %63, %cst_40 {dimension_numbers = #tpu.dot_dimension_numbers<[1], [0], [0], [1], [0, 0, 1, 1], [], []>} : vector<32x3xbf16>, vector<3x256xbf16>, vector<32x256xf32> -> vector<32x256xf32>
    %65 = arith.addf %60, %64 : vector<32x256xf32>
    %cst_41 = arith.constant 6.28318548 : f32
    %66 = vector.broadcast %cst_41 : f32 to vector<3x256xf32>
    %67 = arith.mulf %66, %50 : vector<3x256xf32>
    %c0_42 = arith.constant 0 : index
    %c0_43 = arith.constant 0 : index
    %68 = vector.load %arg13[%c0_42, %c0_43] : memref<32x3xbf16, #tpu.memory_space<vmem>>, vector<32x3xbf16>
    %69 = math.sin %67 : vector<3x256xf32>
    %70 = arith.truncf %69 : vector<3x256xf32> to vector<3x256xbf16>
    %cst_44 = arith.constant dense<0.000000e+00> : vector<32x256xf32>
    %71 = tpu.matmul %68, %70, %cst_44 {dimension_numbers = #tpu.dot_dimension_numbers<[1], [0], [0], [1], [0, 0, 1, 1], [], []>} : vector<32x3xbf16>, vector<3x256xbf16>, vector<32x256xf32> -> vector<32x256xf32>
    %72 = arith.addf %65, %71 : vector<32x256xf32>
    %c0_45 = arith.constant 0 : index
    %c0_46 = arith.constant 0 : index
    %73 = vector.load %arg15[%c0_45, %c0_46] : memref<32x3xbf16, #tpu.memory_space<vmem>>, vector<32x3xbf16>
    %74 = math.cos %67 : vector<3x256xf32>
    %75 = arith.truncf %74 : vector<3x256xf32> to vector<3x256xbf16>
    %cst_47 = arith.constant dense<0.000000e+00> : vector<32x256xf32>
    %76 = tpu.matmul %73, %75, %cst_47 {dimension_numbers = #tpu.dot_dimension_numbers<[1], [0], [0], [1], [0, 0, 1, 1], [], []>} : vector<32x3xbf16>, vector<3x256xbf16>, vector<32x256xf32> -> vector<32x256xf32>
    %77 = arith.addf %72, %76 : vector<32x256xf32>
    %c0_48 = arith.constant 0 : index
    %c0_49 = arith.constant 0 : index
    %78 = vector.load %arg17[%c0_48, %c0_49] : memref<32x1xf32, #tpu.memory_space<vmem>>, vector<32x1xf32>
    %79 = vector.broadcast %78 : vector<32x1xf32> to vector<32x256xf32>
    %80 = arith.addf %77, %79 : vector<32x256xf32>
    %cst_50 = arith.constant 0.00999999977 : f32
    %81 = vector.broadcast %cst_50 : f32 to vector<32x256xf32>
    %82 = arith.mulf %81, %80 : vector<32x256xf32>
    %83 = arith.maximumf %80, %82 : vector<32x256xf32>
    %c0_51 = arith.constant 0 : index
    %c0_52 = arith.constant 0 : index
    %84 = vector.load %arg19[%c0_51, %c0_52] : memref<32x1xf32, #tpu.memory_space<vmem>>, vector<32x1xf32>
    %c0_53 = arith.constant 0 : index
    %c0_54 = arith.constant 0 : index
    %85 = vector.load %arg18[%c0_53, %c0_54] : memref<32x32xbf16, #tpu.memory_space<vmem>>, vector<32x32xbf16>
    %86 = arith.truncf %83 : vector<32x256xf32> to vector<32x256xbf16>
    %cst_55 = arith.constant dense<0.000000e+00> : vector<32x256xf32>
    %87 = tpu.matmul %85, %86, %cst_55 {dimension_numbers = #tpu.dot_dimension_numbers<[1], [0], [0], [1], [0, 0, 1, 1], [], []>} : vector<32x32xbf16>, vector<32x256xbf16>, vector<32x256xf32> -> vector<32x256xf32>
    %88 = vector.broadcast %84 : vector<32x1xf32> to vector<32x256xf32>
    %89 = arith.addf %87, %88 : vector<32x256xf32>
    %cst_56 = arith.constant 0.00999999977 : f32
    %90 = vector.broadcast %cst_56 : f32 to vector<32x256xf32>
    %91 = arith.mulf %90, %89 : vector<32x256xf32>
    %92 = arith.maximumf %89, %91 : vector<32x256xf32>
    %c0_57 = arith.constant 0 : index
    %c0_58 = arith.constant 0 : index
    %93 = vector.load %arg21[%c0_57, %c0_58] : memref<3x1xf32, #tpu.memory_space<vmem>>, vector<3x1xf32>
    %c0_59 = arith.constant 0 : index
    %c0_60 = arith.constant 0 : index
    %94 = vector.load %arg20[%c0_59, %c0_60] : memref<3x32xbf16, #tpu.memory_space<vmem>>, vector<3x32xbf16>
    %95 = arith.truncf %92 : vector<32x256xf32> to vector<32x256xbf16>
    %cst_61 = arith.constant dense<0.000000e+00> : vector<3x256xf32>
    %96 = tpu.matmul %94, %95, %cst_61 {dimension_numbers = #tpu.dot_dimension_numbers<[1], [0], [0], [1], [0, 0, 1, 1], [], []>} : vector<3x32xbf16>, vector<32x256xbf16>, vector<3x256xf32> -> vector<3x256xf32>
    %97 = vector.broadcast %93 : vector<3x1xf32> to vector<3x256xf32>
    %98 = arith.addf %96, %97 : vector<3x256xf32>
    %99 = arith.addf %50, %98 : vector<3x256xf32>
    %100 = tpu.transpose %99, [1, 0] : vector<3x256xf32> -> vector<256x3xf32>
    %c0_62 = arith.constant 0 : index
    %c0_63 = arith.constant 0 : index
    %101 = vector.load %arg22[%c0_62, %c0_63] : memref<256x3xf32, #tpu.memory_space<vmem>>, vector<256x3xf32>
    tpu.vector_store %arg22[%c0_62, %c0_63], %100 {strides = array<i32>} : memref<256x3xf32, #tpu.memory_space<vmem>>, vector<256x3xf32>,
    return
  }
  func.func @transform_0(%arg0: i32) -> (i32, i32) {
    %c0_i32 = arith.constant 0 : i32
    %c0_i32_0 = arith.constant 0 : i32
    return %arg0, %c0_i32 : i32, i32
  }
  func.func @transform_1(%arg0: i32) -> (i32, i32) {
    %c0_i32 = arith.constant 0 : i32
    %c0_i32_0 = arith.constant 0 : i32
    %c0_i32_1 = arith.constant 0 : i32
    return %c0_i32, %c0_i32_0 : i32, i32
  }
  func.func @transform_2(%arg0: i32) -> (i32, i32) {
    %c0_i32 = arith.constant 0 : i32
    %c0_i32_0 = arith.constant 0 : i32
    %c0_i32_1 = arith.constant 0 : i32
    return %c0_i32, %c0_i32_0 : i32, i32
  }
  func.func @transform_3(%arg0: i32) -> (i32, i32) {
    %c0_i32 = arith.constant 0 : i32
    %c0_i32_0 = arith.constant 0 : i32
    %c0_i32_1 = arith.constant 0 : i32
    return %c0_i32, %c0_i32_0 : i32, i32
  }
  func.func @transform_4(%arg0: i32) -> (i32, i32) {
    %c0_i32 = arith.constant 0 : i32
    %c0_i32_0 = arith.constant 0 : i32
    %c0_i32_1 = arith.constant 0 : i32
    return %c0_i32, %c0_i32_0 : i32, i32
  }
  func.func @transform_5(%arg0: i32) -> (i32, i32) {
    %c0_i32 = arith.constant 0 : i32
    %c0_i32_0 = arith.constant 0 : i32
    %c0_i32_1 = arith.constant 0 : i32
    return %c0_i32, %c0_i32_0 : i32, i32
  }
  func.func @transform_6(%arg0: i32) -> (i32, i32) {
    %c0_i32 = arith.constant 0 : i32
    %c0_i32_0 = arith.constant 0 : i32
    %c0_i32_1 = arith.constant 0 : i32
    return %c0_i32, %c0_i32_0 : i32, i32
  }
  func.func @transform_7(%arg0: i32) -> (i32, i32) {
    %c0_i32 = arith.constant 0 : i32
    %c0_i32_0 = arith.constant 0 : i32
    %c0_i32_1 = arith.constant 0 : i32
    return %c0_i32, %c0_i32_0 : i32, i32
  }
  func.func @transform_8(%arg0: i32) -> (i32, i32) {
    %c0_i32 = arith.constant 0 : i32
    %c0_i32_0 = arith.constant 0 : i32
    %c0_i32_1 = arith.constant 0 : i32
    return %c0_i32, %c0_i32_0 : i32, i32
  }
  func.func @transform_9(%arg0: i32) -> (i32, i32) {
    %c0_i32 = arith.constant 0 : i32
    %c0_i32_0 = arith.constant 0 : i32
    %c0_i32_1 = arith.constant 0 : i32
    return %c0_i32, %c0_i32_0 : i32, i32
  }
  func.func @transform_10(%arg0: i32) -> (i32, i32) {
    %c0_i32 = arith.constant 0 : i32
    %c0_i32_0 = arith.constant 0 : i32
    %c0_i32_1 = arith.constant 0 : i32
    return %c0_i32, %c0_i32_0 : i32, i32
  }
  func.func @transform_11(%arg0: i32) -> (i32, i32) {
    %c0_i32 = arith.constant 0 : i32
    %c0_i32_0 = arith.constant 0 : i32
    %c0_i32_1 = arith.constant 0 : i32
    return %c0_i32, %c0_i32_0 : i32, i32
  }
  func.func @transform_12(%arg0: i32) -> (i32, i32) {
    %c0_i32 = arith.constant 0 : i32
    %c0_i32_0 = arith.constant 0 : i32
    %c0_i32_1 = arith.constant 0 : i32
    return %c0_i32, %c0_i32_0 : i32, i32
  }
  func.func @transform_13(%arg0: i32) -> (i32, i32) {
    %c0_i32 = arith.constant 0 : i32
    %c0_i32_0 = arith.constant 0 : i32
    %c0_i32_1 = arith.constant 0 : i32
    return %c0_i32, %c0_i32_0 : i32, i32
  }
  func.func @transform_14(%arg0: i32) -> (i32, i32) {
    %c0_i32 = arith.constant 0 : i32
    %c0_i32_0 = arith.constant 0 : i32
    %c0_i32_1 = arith.constant 0 : i32
    return %c0_i32, %c0_i32_0 : i32, i32
  }
  func.func @transform_15(%arg0: i32) -> (i32, i32) {
    %c0_i32 = arith.constant 0 : i32
    %c0_i32_0 = arith.constant 0 : i32
    %c0_i32_1 = arith.constant 0 : i32
    return %c0_i32, %c0_i32_0 : i32, i32
  }
  func.func @transform_16(%arg0: i32) -> (i32, i32) {
    %c0_i32 = arith.constant 0 : i32
    %c0_i32_0 = arith.constant 0 : i32
    %c0_i32_1 = arith.constant 0 : i32
    return %c0_i32, %c0_i32_0 : i32, i32
  }
  func.func @transform_17(%arg0: i32) -> (i32, i32) {
    %c0_i32 = arith.constant 0 : i32
    %c0_i32_0 = arith.constant 0 : i32
    %c0_i32_1 = arith.constant 0 : i32
    return %c0_i32, %c0_i32_0 : i32, i32
  }
  func.func @transform_18(%arg0: i32) -> (i32, i32) {
    %c0_i32 = arith.constant 0 : i32
    %c0_i32_0 = arith.constant 0 : i32
    %c0_i32_1 = arith.constant 0 : i32
    return %c0_i32, %c0_i32_0 : i32, i32
  }
  func.func @transform_19(%arg0: i32) -> (i32, i32) {
    %c0_i32 = arith.constant 0 : i32
    %c0_i32_0 = arith.constant 0 : i32
    %c0_i32_1 = arith.constant 0 : i32
    return %c0_i32, %c0_i32_0 : i32, i32
  }
  func.func @transform_20(%arg0: i32) -> (i32, i32) {
    %c0_i32 = arith.constant 0 : i32
    %c0_i32_0 = arith.constant 0 : i32
    %c0_i32_1 = arith.constant 0 : i32
    return %c0_i32, %c0_i32_0 : i32, i32
  }
  func.func @transform_21(%arg0: i32) -> (i32, i32) {
    %c0_i32 = arith.constant 0 : i32
    %c0_i32_0 = arith.constant 0 : i32
    return %arg0, %c0_i32 : i32, i32
  }
}

module attributes {stable_mosaic.version = 11 : i64} {
  func.func @kernel(%arg0: i32, %arg1: memref<3x256xf32, #tpu.memory_space<vmem>>, %arg2: memref<32x3xbf16, #tpu.memory_space<vmem>>, %arg3: memref<32x3xbf16, #tpu.memory_space<vmem>>, %arg4: memref<32x3xbf16, #tpu.memory_space<vmem>>, %arg5: memref<32x3xbf16, #tpu.memory_space<vmem>>, %arg6: memref<32x3xbf16, #tpu.memory_space<vmem>>, %arg7: memref<32x1xf32, #tpu.memory_space<vmem>>, %arg8: memref<32x32xbf16, #tpu.memory_space<vmem>>, %arg9: memref<32x1xf32, #tpu.memory_space<vmem>>, %arg10: memref<3x32xbf16, #tpu.memory_space<vmem>>, %arg11: memref<3x1xf32, #tpu.memory_space<vmem>>, %arg12: memref<32x3xbf16, #tpu.memory_space<vmem>>, %arg13: memref<32x3xbf16, #tpu.memory_space<vmem>>, %arg14: memref<32x3xbf16, #tpu.memory_space<vmem>>, %arg15: memref<32x3xbf16, #tpu.memory_space<vmem>>, %arg16: memref<32x3xbf16, #tpu.memory_space<vmem>>, %arg17: memref<32x1xf32, #tpu.memory_space<vmem>>, %arg18: memref<32x32xbf16, #tpu.memory_space<vmem>>, %arg19: memref<32x1xf32, #tpu.memory_space<vmem>>, %arg20: memref<3x32xbf16, #tpu.memory_space<vmem>>, %arg21: memref<3x1xf32, #tpu.memory_space<vmem>>, %arg22: memref<3x256xf32, #tpu.memory_space<vmem>>) attributes {dimension_semantics = [#tpu.dimension_semantics<parallel>], iteration_bounds = array<i64: 8>, scalar_prefetch = 0 : i64, scratch_operands = 0 : i64, tpu.core_type = #tpu.core_type<tc>, window_params = [{transform_indices = @transform_0, window_bounds = array<i64: 3, 256>}, {pipeline_mode = #tpu.pipeline_mode<synchronous>, transform_indices = @transform_1, window_bounds = array<i64: 32, 3>}, {pipeline_mode = #tpu.pipeline_mode<synchronous>, transform_indices = @transform_2, window_bounds = array<i64: 32, 3>}, {pipeline_mode = #tpu.pipeline_mode<synchronous>, transform_indices = @transform_3, window_bounds = array<i64: 32, 3>}, {pipeline_mode = #tpu.pipeline_mode<synchronous>, transform_indices = @transform_4, window_bounds = array<i64: 32, 3>}, {pipeline_mode = #tpu.pipeline_mode<synchronous>, transform_indices = @transform_5, window_bounds = array<i64: 32, 3>}, {pipeline_mode = #tpu.pipeline_mode<synchronous>, transform_indices = @transform_6, window_bounds = array<i64: 32, 1>}, {pipeline_mode = #tpu.pipeline_mode<synchronous>, transform_indices = @transform_7, window_bounds = array<i64: 32, 32>}, {pipeline_mode = #tpu.pipeline_mode<synchronous>, transform_indices = @transform_8, window_bounds = array<i64: 32, 1>}, {pipeline_mode = #tpu.pipeline_mode<synchronous>, transform_indices = @transform_9, window_bounds = array<i64: 3, 32>}, {pipeline_mode = #tpu.pipeline_mode<synchronous>, transform_indices = @transform_10, window_bounds = array<i64: 3, 1>}, {pipeline_mode = #tpu.pipeline_mode<synchronous>, transform_indices = @transform_11, window_bounds = array<i64: 32, 3>}, {pipeline_mode = #tpu.pipeline_mode<synchronous>, transform_indices = @transform_12, window_bounds = array<i64: 32, 3>}, {pipeline_mode = #tpu.pipeline_mode<synchronous>, transform_indices = @transform_13, window_bounds = array<i64: 32, 3>}, {pipeline_mode = #tpu.pipeline_mode<synchronous>, transform_indices = @transform_14, window_bounds = array<i64: 32, 3>}, {pipeline_mode = #tpu.pipeline_mode<synchronous>, transform_indices = @transform_15, window_bounds = array<i64: 32, 3>}, {pipeline_mode = #tpu.pipeline_mode<synchronous>, transform_indices = @transform_16, window_bounds = array<i64: 32, 1>}, {pipeline_mode = #tpu.pipeline_mode<synchronous>, transform_indices = @transform_17, window_bounds = array<i64: 32, 32>}, {pipeline_mode = #tpu.pipeline_mode<synchronous>, transform_indices = @transform_18, window_bounds = array<i64: 32, 1>}, {pipeline_mode = #tpu.pipeline_mode<synchronous>, transform_indices = @transform_19, window_bounds = array<i64: 3, 32>}, {pipeline_mode = #tpu.pipeline_mode<synchronous>, transform_indices = @transform_20, window_bounds = array<i64: 3, 1>}, {transform_indices = @transform_21, window_bounds = array<i64: 3, 256>}]} {
    %c0 = arith.constant 0 : index
    %c0_0 = arith.constant 0 : index
    %0 = vector.load %arg1[%c0, %c0_0] : memref<3x256xf32, #tpu.memory_space<vmem>>, vector<3x256xf32>
    %c0_1 = arith.constant 0 : index
    %c0_2 = arith.constant 0 : index
    %1 = vector.load %arg6[%c0_1, %c0_2] : memref<32x3xbf16, #tpu.memory_space<vmem>>, vector<32x3xbf16>
    %2 = arith.truncf %0 : vector<3x256xf32> to vector<3x256xbf16>
    %cst = arith.constant dense<0.000000e+00> : vector<32x256xf32>
    %3 = tpu.matmul %1, %2, %cst {dimension_numbers = #tpu.dot_dimension_numbers<[1], [0], [0], [1], [0, 0, 1, 1], [], []>} : vector<32x3xbf16>, vector<3x256xbf16>, vector<32x256xf32> -> vector<32x256xf32>
    %cst_3 = arith.constant 3.14159274 : f32
    %4 = vector.broadcast %cst_3 : f32 to vector<3x256xf32>
    %5 = arith.mulf %4, %0 : vector<3x256xf32>
    %c0_4 = arith.constant 0 : index
    %c0_5 = arith.constant 0 : index
    %6 = vector.load %arg2[%c0_4, %c0_5] : memref<32x3xbf16, #tpu.memory_space<vmem>>, vector<32x3xbf16>
    %7 = math.sin %5 : vector<3x256xf32>
    %8 = arith.truncf %7 : vector<3x256xf32> to vector<3x256xbf16>
    %cst_6 = arith.constant dense<0.000000e+00> : vector<32x256xf32>
    %9 = tpu.matmul %6, %8, %cst_6 {dimension_numbers = #tpu.dot_dimension_numbers<[1], [0], [0], [1], [0, 0, 1, 1], [], []>} : vector<32x3xbf16>, vector<3x256xbf16>, vector<32x256xf32> -> vector<32x256xf32>
    %10 = arith.addf %3, %9 : vector<32x256xf32>
    %c0_7 = arith.constant 0 : index
    %c0_8 = arith.constant 0 : index
    %11 = vector.load %arg4[%c0_7, %c0_8] : memref<32x3xbf16, #tpu.memory_space<vmem>>, vector<32x3xbf16>
    %12 = math.cos %5 : vector<3x256xf32>
    %13 = arith.truncf %12 : vector<3x256xf32> to vector<3x256xbf16>
    %cst_9 = arith.constant dense<0.000000e+00> : vector<32x256xf32>
    %14 = tpu.matmul %11, %13, %cst_9 {dimension_numbers = #tpu.dot_dimension_numbers<[1], [0], [0], [1], [0, 0, 1, 1], [], []>} : vector<32x3xbf16>, vector<3x256xbf16>, vector<32x256xf32> -> vector<32x256xf32>
    %15 = arith.addf %10, %14 : vector<32x256xf32>
    %cst_10 = arith.constant 6.28318548 : f32
    %16 = vector.broadcast %cst_10 : f32 to vector<3x256xf32>
    %17 = arith.mulf %16, %0 : vector<3x256xf32>
    %c0_11 = arith.constant 0 : index
    %c0_12 = arith.constant 0 : index
    %18 = vector.load %arg3[%c0_11, %c0_12] : memref<32x3xbf16, #tpu.memory_space<vmem>>, vector<32x3xbf16>
    %19 = math.sin %17 : vector<3x256xf32>
    %20 = arith.truncf %19 : vector<3x256xf32> to vector<3x256xbf16>
    %cst_13 = arith.constant dense<0.000000e+00> : vector<32x256xf32>
    %21 = tpu.matmul %18, %20, %cst_13 {dimension_numbers = #tpu.dot_dimension_numbers<[1], [0], [0], [1], [0, 0, 1, 1], [], []>} : vector<32x3xbf16>, vector<3x256xbf16>, vector<32x256xf32> -> vector<32x256xf32>
    %22 = arith.addf %15, %21 : vector<32x256xf32>
    %c0_14 = arith.constant 0 : index
    %c0_15 = arith.constant 0 : index
    %23 = vector.load %arg5[%c0_14, %c0_15] : memref<32x3xbf16, #tpu.memory_space<vmem>>, vector<32x3xbf16>
    %24 = math.cos %17 : vector<3x256xf32>
    %25 = arith.truncf %24 : vector<3x256xf32> to vector<3x256xbf16>
    %cst_16 = arith.constant dense<0.000000e+00> : vector<32x256xf32>
    %26 = tpu.matmul %23, %25, %cst_16 {dimension_numbers = #tpu.dot_dimension_numbers<[1], [0], [0], [1], [0, 0, 1, 1], [], []>} : vector<32x3xbf16>, vector<3x256xbf16>, vector<32x256xf32> -> vector<32x256xf32>
    %27 = arith.addf %22, %26 : vector<32x256xf32>
    %c0_17 = arith.constant 0 : index
    %c0_18 = arith.constant 0 : index
    %28 = vector.load %arg7[%c0_17, %c0_18] : memref<32x1xf32, #tpu.memory_space<vmem>>, vector<32x1xf32>
    %29 = vector.broadcast %28 : vector<32x1xf32> to vector<32x256xf32>
    %30 = arith.addf %27, %29 : vector<32x256xf32>
    %cst_19 = arith.constant 0.00999999977 : f32
    %31 = vector.broadcast %cst_19 : f32 to vector<32x256xf32>
    %32 = arith.mulf %31, %30 : vector<32x256xf32>
    %33 = arith.maximumf %30, %32 : vector<32x256xf32>
    %c0_20 = arith.constant 0 : index
    %c0_21 = arith.constant 0 : index
    %34 = vector.load %arg9[%c0_20, %c0_21] : memref<32x1xf32, #tpu.memory_space<vmem>>, vector<32x1xf32>
    %c0_22 = arith.constant 0 : index
    %c0_23 = arith.constant 0 : index
    %35 = vector.load %arg8[%c0_22, %c0_23] : memref<32x32xbf16, #tpu.memory_space<vmem>>, vector<32x32xbf16>
    %36 = arith.truncf %33 : vector<32x256xf32> to vector<32x256xbf16>
    %cst_24 = arith.constant dense<0.000000e+00> : vector<32x256xf32>
    %37 = tpu.matmul %35, %36, %cst_24 {dimension_numbers = #tpu.dot_dimension_numbers<[1], [0], [0], [1], [0, 0, 1, 1], [], []>} : vector<32x32xbf16>, vector<32x256xbf16>, vector<32x256xf32> -> vector<32x256xf32>
    %38 = vector.broadcast %34 : vector<32x1xf32> to vector<32x256xf32>
    %39 = arith.addf %37, %38 : vector<32x256xf32>
    %cst_25 = arith.constant 0.00999999977 : f32
    %40 = vector.broadcast %cst_25 : f32 to vector<32x256xf32>
    %41 = arith.mulf %40, %39 : vector<32x256xf32>
    %42 = arith.maximumf %39, %41 : vector<32x256xf32>
    %c0_26 = arith.constant 0 : index
    %c0_27 = arith.constant 0 : index
    %43 = vector.load %arg11[%c0_26, %c0_27] : memref<3x1xf32, #tpu.memory_space<vmem>>, vector<3x1xf32>
    %c0_28 = arith.constant 0 : index
    %c0_29 = arith.constant 0 : index
    %44 = vector.load %arg10[%c0_28, %c0_29] : memref<3x32xbf16, #tpu.memory_space<vmem>>, vector<3x32xbf16>
    %45 = arith.truncf %42 : vector<32x256xf32> to vector<32x256xbf16>
    %cst_30 = arith.constant dense<0.000000e+00> : vector<3x256xf32>
    %46 = tpu.matmul %44, %45, %cst_30 {dimension_numbers = #tpu.dot_dimension_numbers<[1], [0], [0], [1], [0, 0, 1, 1], [], []>} : vector<3x32xbf16>, vector<32x256xbf16>, vector<3x256xf32> -> vector<3x256xf32>
    %47 = vector.broadcast %43 : vector<3x1xf32> to vector<3x256xf32>
    %48 = arith.addf %46, %47 : vector<3x256xf32>
    %49 = arith.addf %0, %48 : vector<3x256xf32>
    %c0_31 = arith.constant 0 : index
    %c0_32 = arith.constant 0 : index
    %50 = vector.load %arg16[%c0_31, %c0_32] : memref<32x3xbf16, #tpu.memory_space<vmem>>, vector<32x3xbf16>
    %51 = arith.truncf %49 : vector<3x256xf32> to vector<3x256xbf16>
    %cst_33 = arith.constant dense<0.000000e+00> : vector<32x256xf32>
    %52 = tpu.matmul %50, %51, %cst_33 {dimension_numbers = #tpu.dot_dimension_numbers<[1], [0], [0], [1], [0, 0, 1, 1], [], []>} : vector<32x3xbf16>, vector<3x256xbf16>, vector<32x256xf32> -> vector<32x256xf32>
    %cst_34 = arith.constant 3.14159274 : f32
    %53 = vector.broadcast %cst_34 : f32 to vector<3x256xf32>
    %54 = arith.mulf %53, %49 : vector<3x256xf32>
    %c0_35 = arith.constant 0 : index
    %c0_36 = arith.constant 0 : index
    %55 = vector.load %arg12[%c0_35, %c0_36] : memref<32x3xbf16, #tpu.memory_space<vmem>>, vector<32x3xbf16>
    %56 = math.sin %54 : vector<3x256xf32>
    %57 = arith.truncf %56 : vector<3x256xf32> to vector<3x256xbf16>
    %cst_37 = arith.constant dense<0.000000e+00> : vector<32x256xf32>
    %58 = tpu.matmul %55, %57, %cst_37 {dimension_numbers = #tpu.dot_dimension_numbers<[1], [0], [0], [1], [0, 0, 1, 1], [], []>} : vector<32x3xbf16>, vector<3x256xbf16>, vector<32x256xf32> -> vector<32x256xf32>
    %59 = arith.addf %52, %58 : vector<32x256xf32>
    %c0_38 = arith.constant 0 : index
    %c0_39 = arith.constant 0 : index
    %60 = vector.load %arg14[%c0_38, %c0_39] : memref<32x3xbf16, #tpu.memory_space<vmem>>, vector<32x3xbf16>
    %61 = math.cos %54 : vector<3x256xf32>
    %62 = arith.truncf %61 : vector<3x256xf32> to vector<3x256xbf16>
    %cst_40 = arith.constant dense<0.000000e+00> : vector<32x256xf32>
    %63 = tpu.matmul %60, %62, %cst_40 {dimension_numbers = #tpu.dot_dimension_numbers<[1], [0], [0], [1], [0, 0, 1, 1], [], []>} : vector<32x3xbf16>, vector<3x256xbf16>, vector<32x256xf32> -> vector<32x256xf32>
    %64 = arith.addf %59, %63 : vector<32x256xf32>
    %cst_41 = arith.constant 6.28318548 : f32
    %65 = vector.broadcast %cst_41 : f32 to vector<3x256xf32>
    %66 = arith.mulf %65, %49 : vector<3x256xf32>
    %c0_42 = arith.constant 0 : index
    %c0_43 = arith.constant 0 : index
    %67 = vector.load %arg13[%c0_42, %c0_43] : memref<32x3xbf16, #tpu.memory_space<vmem>>, vector<32x3xbf16>
    %68 = math.sin %66 : vector<3x256xf32>
    %69 = arith.truncf %68 : vector<3x256xf32> to vector<3x256xbf16>
    %cst_44 = arith.constant dense<0.000000e+00> : vector<32x256xf32>
    %70 = tpu.matmul %67, %69, %cst_44 {dimension_numbers = #tpu.dot_dimension_numbers<[1], [0], [0], [1], [0, 0, 1, 1], [], []>} : vector<32x3xbf16>, vector<3x256xbf16>, vector<32x256xf32> -> vector<32x256xf32>
    %71 = arith.addf %64, %70 : vector<32x256xf32>
    %c0_45 = arith.constant 0 : index
    %c0_46 = arith.constant 0 : index
    %72 = vector.load %arg15[%c0_45, %c0_46] : memref<32x3xbf16, #tpu.memory_space<vmem>>, vector<32x3xbf16>
    %73 = math.cos %66 : vector<3x256xf32>
    %74 = arith.truncf %73 : vector<3x256xf32> to vector<3x256xbf16>
    %cst_47 = arith.constant dense<0.000000e+00> : vector<32x256xf32>
    %75 = tpu.matmul %72, %74, %cst_47 {dimension_numbers = #tpu.dot_dimension_numbers<[1], [0], [0], [1], [0, 0, 1, 1], [], []>} : vector<32x3xbf16>, vector<3x256xbf16>, vector<32x256xf32> -> vector<32x256xf32>
    %76 = arith.addf %71, %75 : vector<32x256xf32>
    %c0_48 = arith.constant 0 : index
    %c0_49 = arith.constant 0 : index
    %77 = vector.load %arg17[%c0_48, %c0_49] : memref<32x1xf32, #tpu.memory_space<vmem>>, vector<32x1xf32>
    %78 = vector.broadcast %77 : vector<32x1xf32> to vector<32x256xf32>
    %79 = arith.addf %76, %78 : vector<32x256xf32>
    %cst_50 = arith.constant 0.00999999977 : f32
    %80 = vector.broadcast %cst_50 : f32 to vector<32x256xf32>
    %81 = arith.mulf %80, %79 : vector<32x256xf32>
    %82 = arith.maximumf %79, %81 : vector<32x256xf32>
    %c0_51 = arith.constant 0 : index
    %c0_52 = arith.constant 0 : index
    %83 = vector.load %arg19[%c0_51, %c0_52] : memref<32x1xf32, #tpu.memory_space<vmem>>, vector<32x1xf32>
    %c0_53 = arith.constant 0 : index
    %c0_54 = arith.constant 0 : index
    %84 = vector.load %arg18[%c0_53, %c0_54] : memref<32x32xbf16, #tpu.memory_space<vmem>>, vector<32x32xbf16>
    %85 = arith.truncf %82 : vector<32x256xf32> to vector<32x256xbf16>
    %cst_55 = arith.constant dense<0.000000e+00> : vector<32x256xf32>
    %86 = tpu.matmul %84, %85, %cst_55 {dimension_numbers = #tpu.dot_dimension_numbers<[1], [0], [0], [1], [0, 0, 1, 1], [], []>} : vector<32x32xbf16>, vector<32x256xbf16>, vector<32x256xf32> -> vector<32x256xf32>
    %87 = vector.broadcast %83 : vector<32x1xf32> to vector<32x256xf32>
    %88 = arith.addf %86, %87 : vector<32x256xf32>
    %cst_56 = arith.constant 0.00999999977 : f32
    %89 = vector.broadcast %cst_56 : f32 to vector<32x256xf32>
    %90 = arith.mulf %89, %88 : vector<32x256xf32>
    %91 = arith.maximumf %88, %90 : vector<32x256xf32>
    %c0_57 = arith.constant 0 : index
    %c0_58 = arith.constant 0 : index
    %92 = vector.load %arg21[%c0_57, %c0_58] : memref<3x1xf32, #tpu.memory_space<vmem>>, vector<3x1xf32>
    %c0_59 = arith.constant 0 : index
    %c0_60 = arith.constant 0 : index
    %93 = vector.load %arg20[%c0_59, %c0_60] : memref<3x32xbf16, #tpu.memory_space<vmem>>, vector<3x32xbf16>
    %94 = arith.truncf %91 : vector<32x256xf32> to vector<32x256xbf16>
    %cst_61 = arith.constant dense<0.000000e+00> : vector<3x256xf32>
    %95 = tpu.matmul %93, %94, %cst_61 {dimension_numbers = #tpu.dot_dimension_numbers<[1], [0], [0], [1], [0, 0, 1, 1], [], []>} : vector<3x32xbf16>, vector<32x256xbf16>, vector<3x256xf32> -> vector<3x256xf32>
    %96 = vector.broadcast %92 : vector<3x1xf32> to vector<3x256xf32>
    %97 = arith.addf %95, %96 : vector<3x256xf32>
    %98 = arith.addf %49, %97 : vector<3x256xf32>
    %c0_62 = arith.constant 0 : index
    %c0_63 = arith.constant 0 : index
    %99 = vector.load %arg22[%c0_62, %c0_63] : memref<3x256xf32, #tpu.memory_space<vmem>>, vector<3x256xf32>
    tpu.vector_store %arg22[%c0_62, %c0_63], %98 {strides = array<i32>} : memref<3x256xf32, #tpu.memory_space<vmem>>, vector<3x256xf32>,
    return
  }
  func.func @transform_0(%arg0: i32) -> (i32, i32) {
    %c0_i32 = arith.constant 0 : i32
    %c0_i32_0 = arith.constant 0 : i32
    return %c0_i32, %arg0 : i32, i32
  }
  func.func @transform_1(%arg0: i32) -> (i32, i32) {
    %c0_i32 = arith.constant 0 : i32
    %c0_i32_0 = arith.constant 0 : i32
    %c0_i32_1 = arith.constant 0 : i32
    return %c0_i32, %c0_i32_0 : i32, i32
  }
  func.func @transform_2(%arg0: i32) -> (i32, i32) {
    %c0_i32 = arith.constant 0 : i32
    %c0_i32_0 = arith.constant 0 : i32
    %c0_i32_1 = arith.constant 0 : i32
    return %c0_i32, %c0_i32_0 : i32, i32
  }
  func.func @transform_3(%arg0: i32) -> (i32, i32) {
    %c0_i32 = arith.constant 0 : i32
    %c0_i32_0 = arith.constant 0 : i32
    %c0_i32_1 = arith.constant 0 : i32
    return %c0_i32, %c0_i32_0 : i32, i32
  }
  func.func @transform_4(%arg0: i32) -> (i32, i32) {
    %c0_i32 = arith.constant 0 : i32
    %c0_i32_0 = arith.constant 0 : i32
    %c0_i32_1 = arith.constant 0 : i32
    return %c0_i32, %c0_i32_0 : i32, i32
  }
  func.func @transform_5(%arg0: i32) -> (i32, i32) {
    %c0_i32 = arith.constant 0 : i32
    %c0_i32_0 = arith.constant 0 : i32
    %c0_i32_1 = arith.constant 0 : i32
    return %c0_i32, %c0_i32_0 : i32, i32
  }
  func.func @transform_6(%arg0: i32) -> (i32, i32) {
    %c0_i32 = arith.constant 0 : i32
    %c0_i32_0 = arith.constant 0 : i32
    %c0_i32_1 = arith.constant 0 : i32
    return %c0_i32, %c0_i32_0 : i32, i32
  }
  func.func @transform_7(%arg0: i32) -> (i32, i32) {
    %c0_i32 = arith.constant 0 : i32
    %c0_i32_0 = arith.constant 0 : i32
    %c0_i32_1 = arith.constant 0 : i32
    return %c0_i32, %c0_i32_0 : i32, i32
  }
  func.func @transform_8(%arg0: i32) -> (i32, i32) {
    %c0_i32 = arith.constant 0 : i32
    %c0_i32_0 = arith.constant 0 : i32
    %c0_i32_1 = arith.constant 0 : i32
    return %c0_i32, %c0_i32_0 : i32, i32
  }
  func.func @transform_9(%arg0: i32) -> (i32, i32) {
    %c0_i32 = arith.constant 0 : i32
    %c0_i32_0 = arith.constant 0 : i32
    %c0_i32_1 = arith.constant 0 : i32
    return %c0_i32, %c0_i32_0 : i32, i32
  }
  func.func @transform_10(%arg0: i32) -> (i32, i32) {
    %c0_i32 = arith.constant 0 : i32
    %c0_i32_0 = arith.constant 0 : i32
    %c0_i32_1 = arith.constant 0 : i32
    return %c0_i32, %c0_i32_0 : i32, i32
  }
  func.func @transform_11(%arg0: i32) -> (i32, i32) {
    %c0_i32 = arith.constant 0 : i32
    %c0_i32_0 = arith.constant 0 : i32
    %c0_i32_1 = arith.constant 0 : i32
    return %c0_i32, %c0_i32_0 : i32, i32
  }
  func.func @transform_12(%arg0: i32) -> (i32, i32) {
    %c0_i32 = arith.constant 0 : i32
    %c0_i32_0 = arith.constant 0 : i32
    %c0_i32_1 = arith.constant 0 : i32
    return %c0_i32, %c0_i32_0 : i32, i32
  }
  func.func @transform_13(%arg0: i32) -> (i32, i32) {
    %c0_i32 = arith.constant 0 : i32
    %c0_i32_0 = arith.constant 0 : i32
    %c0_i32_1 = arith.constant 0 : i32
    return %c0_i32, %c0_i32_0 : i32, i32
  }
  func.func @transform_14(%arg0: i32) -> (i32, i32) {
    %c0_i32 = arith.constant 0 : i32
    %c0_i32_0 = arith.constant 0 : i32
    %c0_i32_1 = arith.constant 0 : i32
    return %c0_i32, %c0_i32_0 : i32, i32
  }
  func.func @transform_15(%arg0: i32) -> (i32, i32) {
    %c0_i32 = arith.constant 0 : i32
    %c0_i32_0 = arith.constant 0 : i32
    %c0_i32_1 = arith.constant 0 : i32
    return %c0_i32, %c0_i32_0 : i32, i32
  }
  func.func @transform_16(%arg0: i32) -> (i32, i32) {
    %c0_i32 = arith.constant 0 : i32
    %c0_i32_0 = arith.constant 0 : i32
    %c0_i32_1 = arith.constant 0 : i32
    return %c0_i32, %c0_i32_0 : i32, i32
  }
  func.func @transform_17(%arg0: i32) -> (i32, i32) {
    %c0_i32 = arith.constant 0 : i32
    %c0_i32_0 = arith.constant 0 : i32
    %c0_i32_1 = arith.constant 0 : i32
    return %c0_i32, %c0_i32_0 : i32, i32
  }
  func.func @transform_18(%arg0: i32) -> (i32, i32) {
    %c0_i32 = arith.constant 0 : i32
    %c0_i32_0 = arith.constant 0 : i32
    %c0_i32_1 = arith.constant 0 : i32
    return %c0_i32, %c0_i32_0 : i32, i32
  }
  func.func @transform_19(%arg0: i32) -> (i32, i32) {
    %c0_i32 = arith.constant 0 : i32
    %c0_i32_0 = arith.constant 0 : i32
    %c0_i32_1 = arith.constant 0 : i32
    return %c0_i32, %c0_i32_0 : i32, i32
  }
  func.func @transform_20(%arg0: i32) -> (i32, i32) {
    %c0_i32 = arith.constant 0 : i32
    %c0_i32_0 = arith.constant 0 : i32
    %c0_i32_1 = arith.constant 0 : i32
    return %c0_i32, %c0_i32_0 : i32, i32
  }
  func.func @transform_21(%arg0: i32) -> (i32, i32) {
    %c0_i32 = arith.constant 0 : i32
    %c0_i32_0 = arith.constant 0 : i32
    return %c0_i32, %arg0 : i32, i32
  }
}

</mosaic_0001>

<bundles_post_ra>
// kernel: tpu_custom_call.1
= control target key start
LH: loop header
LB: loop body
LE: loop exit
PB: predicated region body
PF: predicated region fallthrough
CT: control target
= control target key end

     0   :  { %s5987_s0 = inlined_call_operand.vmem [shape: f32[2000,3], index: 0, kind: input, shape index: {}]   ;;  %s5988_s1 = inlined_call_operand.vmem [shape: bf16[32,3], index: 1, kind: input, shape index: {}]   ;;  %s5989_s2 = inlined_call_operand.vmem [shape: bf16[32,3], index: 2, kind: input, shape index: {}]   ;;  %s5990_s3 = inlined_call_operand.vmem [shape: bf16[32,3], index: 3, kind: input, shape index: {}]   ;;  %s5991_s4 = inlined_call_operand.vmem [shape: bf16[32,3], index: 4, kind: input, shape index: {}]   ;;  %s5992_s5 = inlined_call_operand.vmem [shape: bf16[32,3], index: 5, kind: input, shape index: {}]   ;;  %s5993_s6 = inlined_call_operand.vmem [shape: f32[32,1], index: 6, kind: input, shape index: {}]   ;;  %s5994_s7 = inlined_call_operand.vmem [shape: bf16[32,32], index: 7, kind: input, shape index: {}]   ;;  %s5995_s8 = inlined_call_operand.vmem [shape: f32[32,1], index: 8, kind: input, shape index: {}]   ;;  %s5996_s9 = inlined_call_operand.vmem [shape: bf16[3,32], index: 9, kind: input, shape index: {}]   ;;  %s5997_s10 = inlined_call_operand.vmem [shape: f32[3,1], index: 10, kind: input, shape index: {}]   ;;  %s5998_s11 = inlined_call_operand.vmem [shape: bf16[32,3], index: 11, kind: input, shape index: {}]   ;;  %s5999_s12 = inlined_call_operand.vmem [shape: bf16[32,3], index: 12, kind: input, shape index: {}]   ;;  %s6000_s13 = inlined_call_operand.vmem [shape: bf16[32,3], index: 13, kind: input, shape index: {}]   ;;  %s6001_s14 = inlined_call_operand.vmem [shape: bf16[32,3], index: 14, kind: input, shape index: {}]   ;;  %s6002_s15 = inlined_call_operand.vmem [shape: bf16[32,3], index: 15, kind: input, shape index: {}]   ;;  %s6003_s16 = inlined_call_operand.vmem [shape: f32[32,1], index: 16, kind: input, shape index: {}]   ;;  %s6004_s17 = inlined_call_operand.vmem [shape: bf16[32,32], index: 17, kind: input, shape index: {}]   ;;  %s6005_s18 = inlined_call_operand.vmem [shape: f32[32,1], index: 18, kind: input, shape index: {}]   ;;  %s6006_s19 = inlined_call_operand.vmem [shape: bf16[3,32], index: 19, kind: input, shape index: {}]   ;;  %s6007_s20 = inlined_call_operand.vmem [shape: f32[3,1], index: 20, kind: input, shape index: {}]   ;;  %s6008_s21 = inlined_call_operand.vmem [shape: f32[2000,3], index: 21, kind: output, shape index: {}]  }
   0x1   :  { %6015 = sst [smem:[#allocation3_spill]] %s5987_s0 }
   0x2   :  { %6016 = sst [smem:[#allocation4_spill]] %s5988_s1 }
   0x3   :  { %6017 = sst [smem:[#allocation5_spill]] %s5989_s2 }
   0x4   :  { %6018 = sst [smem:[#allocation6_spill]] %s5990_s3 }
   0x5   :  { %6019 = sst [smem:[#allocation7_spill]] %s5991_s4 }
   0x6   :  { %6020 = sst [smem:[#allocation8_spill]] %s5992_s5 }
   0x7   :  { %6021 = sst [smem:[#allocation9_spill]] %s5993_s6 }
   0x8   :  { %6022 = sst [smem:[#allocation10_spill]] %s5994_s7 }
   0x9   :  { %6023 = sst [smem:[#allocation11_spill]] %s5995_s8 }
   0xa   :  { %6024 = sst [smem:[#allocation12_spill]] %s5996_s9 }
   0xb   :  { %6025 = sst [smem:[#allocation13_spill]] %s5997_s10 }
   0xc   :  { %6026 = sst [smem:[#allocation14_spill]] %s5998_s11 }
   0xd   :  { %6027 = sst [smem:[#allocation15_spill]] %s5999_s12 }
   0xe   :  { %6028 = sst [smem:[#allocation16_spill]] %s6003_s16 }
   0xf   :  { %s4780_s2 = smov 0   ;;  %s4782_s25 = smov 0  }
  0x10   :  { %s4784_s26 = smov 0  }
  0x11 LB: > { %s4793_s27 = sadd.s32 4294967295, %s4628_s26   ;;  %s4795_s3 = sadd.s32 1, %s4628_s26   ;;  %s4628_s26 = sphi %s4784_s26, %s6058_s26   ;;  %s4624_s25 = sphi %s4782_s25, %s6057_s25   ;;  %s4620_s2 = sphi %s4780_s2, %s6056_s2  }
  0x12   : > { %s481_s28 = ssub.s32 %s4628_s26, %s4795_s3  ;;  %s484_s29 = sadd.s32 1, %s4624_s25 }
  0x13   : > { %p482_p0 = scmp.eq.s32.totalorder %s481_s28, 0  ;;  %p494_p1 = scmp.ne.s32.totalorder %s4624_s25, %s4620_s2 }
  0x14   : > { %p495_p2 = scmp.eq.s32.totalorder %s4793_s27, 7  ;;  %p4185_p3 = scmp.ge.s32.totalorder %s4628_s26, 1 }
  0x15   : > { %s4803_s0 = scalar_select %p482_p0, %s4624_s25, %s484_s29  }
  0x16   : > { %p4805_p4 = por %p495_p2, %p494_p1  ;;  %p596_p5 = scmp.lt.s32.totalorder %s4628_s26, 9 }
  0x18   : > { %p597_p6 = pnand %p4185_p3, %p596_p5 }
  0x19   : > { %s4810_s30 = sshll.u32 (!%p597_p6), %s4793_s27, 5  ;;  %s6030_s24 = sld [smem:[#allocation3_spill]] (!%p597_p6)  ;;  %v4662_v61 = vmov (!%p597_p6), 683565275   ;;  %v4663_v63 = vmov (!%p597_p6), 2475754826  }
  0x1a   : > { %600 = sbr.rel (%p597_p6) target bundleno = 2138 (0x85a), region = 104  ;;  %p664_p7 = scmp.lt.s32.totalorder (!%p597_p6), %s4810_s30, 249 }
  0x1b   : > { %s6031_s6 = sld [smem:[#allocation9_spill]] (!%p597_p6)  ;;  %s6032_s8 = sld [smem:[#allocation11_spill]] (!%p597_p6) }
  0x1c   : > { %s6033_s16 = sld [smem:[#allocation16_spill]] (!%p597_p6)  ;;  %s6034_s10 = sld [smem:[#allocation13_spill]] (!%p597_p6) }
  0x1d   : > { %s6041_s29 = sld [smem:[#allocation6_spill]] (!%p597_p6)  ;;  %s6042_s26 = sld [smem:[#allocation5_spill]] (!%p597_p6) }
  0x1e   : > { %s6045_s7 = sld [smem:[#allocation10_spill]] (!%p597_p6)  ;;  %s6046_s9 = sld [smem:[#allocation12_spill]] (!%p597_p6) }
  0x1f   : > { %s6049_s11 = sld [smem:[#allocation14_spill]] (!%p597_p6)  ;;  %s6050_s12 = sld [smem:[#allocation15_spill]] (!%p597_p6) }
  0x20   : > { %s656_s23 = sand.u32 (!%p597_p6), 1, %s4620_s2  }
  0x21   : > { %s665_s5 = scalar_select %p664_p7, %s4810_s30, 249 }
  0x22   : > { %s4186_s1 = sshll.u32 %s656_s23, 8  ;;  %s3851_s2 = ssub.s32 (%p4805_p4), 250, %s4810_s30 }
  0x23   : > { %s4188_s22 = sshll.u32 %s665_s5, 3  ;;  %p3852_p8 = scmp.lt.s32.totalorder (%p4805_p4), %s3851_s2, 32 }
  0x24   : > { %s4817_s28 = scalar_lea.vmem %s6030_s24, %s4188_s22  ;;  %s6039_s24 = sld [smem:[#allocation4_spill]] }
  0x25   : > { %v695_v0 = vld [vmem:[%s4817_s28 + $0x80] sm:$0xff]  ;;  %v696_v2 = vld [vmem:[%s4817_s28 + $0x88] sm:$0xff]  ;;  %v697_v4 = vld [vmem:[%s4817_s28 + $0x90] sm:$0xff]  ;;  %s6040_s22 = sld [smem:[#allocation8_spill]] }
  0x26   : > { %v679_v1 = vld [vmem:[%s4817_s28] sm:$0xff]  ;;  %743 = vxpose.xlu0.b32.start [1/16] (narrow) %v695_v0, 8  ;;  %v680_v3 = vld [vmem:[%s4817_s28 + $0x8] sm:$0xff]  ;;  %v681_v5 = vld [vmem:[%s4817_s28 + $0x10] sm:$0xff] }
  0x27   : > { %711 = vxpose.xlu1.b32.start [1/16] (narrow) %v679_v1, 8  ;;  %v698_v6 = vld [vmem:[%s4817_s28 + $0x98] sm:$0xff]  ;;  %v699_v8 = vld [vmem:[%s4817_s28 + $0xa0] sm:$0xff]  ;;  %v700_v10 = vld [vmem:[%s4817_s28 + $0xa8] sm:$0xff] }
  0x28   : > { %v682_v7 = vld [vmem:[%s4817_s28 + $0x18] sm:$0xff]  ;;  %v683_v9 = vld [vmem:[%s4817_s28 + $0x20] sm:$0xff]  ;;  %v684_v11 = vld [vmem:[%s4817_s28 + $0x28] sm:$0xff] }
  0x29   : > { %v701_v12 = vld [vmem:[%s4817_s28 + $0xb0] sm:$0xff]  ;;  %v702_v14 = vld [vmem:[%s4817_s28 + $0xb8] sm:$0xff]  ;;  %v703_v16 = vld [vmem:[%s4817_s28 + $0xc0] sm:$0xff] }
  0x2a   : > { %744 = vxpose.xlu0.b32.cont [2/16] (narrow) %v696_v2, 8  ;;  %v685_v13 = vld [vmem:[%s4817_s28 + $0x30] sm:$0xff]  ;;  %v686_v15 = vld [vmem:[%s4817_s28 + $0x38] sm:$0xff]  ;;  %v687_v17 = vld [vmem:[%s4817_s28 + $0x40] sm:$0xff]  ;;  %v4664_v2 = vmov 2131351028  }
  0x2b   : > { %712 = vxpose.xlu1.b32.cont [2/16] (narrow) %v680_v3, 8  ;;  %v704_v18 = vld [vmem:[%s4817_s28 + $0xc8] sm:$0xff]  ;;  %v705_v20 = vld [vmem:[%s4817_s28 + $0xd0] sm:$0xff]  ;;  %v706_v22 = vld [vmem:[%s4817_s28 + $0xd8] sm:$0xff] }
  0x2c   : > { %v688_v19 = vld [vmem:[%s4817_s28 + $0x48] sm:$0xff]  ;;  %v689_v21 = vld [vmem:[%s4817_s28 + $0x50] sm:$0xff]  ;;  %v690_v23 = vld [vmem:[%s4817_s28 + $0x58] sm:$0xff] }
  0x2d   : > { %v707_v24 = vld [vmem:[%s4817_s28 + $0xe0] sm:$0xff]  ;;  %v708_v26 = vld [vmem:[%s4817_s28 + $0xe8] sm:$0xff]  ;;  %v709_v28 = vld [vmem:[%s4817_s28 + $0xf0] sm:$0xff] }
  0x2e   : > { %745 = vxpose.xlu0.b32.cont [3/16] (narrow) %v697_v4, 8  ;;  %v691_v25 = vld [vmem:[%s4817_s28 + $0x60] sm:$0xff]  ;;  %v692_v27 = vld [vmem:[%s4817_s28 + $0x68] sm:$0xff]  ;;  %v693_v29 = vld [vmem:[%s4817_s28 + $0x70] sm:$0xff] }
  0x2f   : > { %713 = vxpose.xlu1.b32.cont [3/16] (narrow) %v681_v5, 8  ;;  %v710_v30 = vld [vmem:[%s4817_s28 + $0xf8] sm:$0xff]  ;;  %v4665_v5 = vmov 2102212464  }
  0x30   : > { %v694_v31 = vld [vmem:[%s4817_s28 + $0x78] sm:$0xff]  ;;  %s5782_s28 = scalar_lea.vmem [#allocation2], %s4186_s1  }
  0x32   : > { %746 = vxpose.xlu0.b32.cont [4/16] (narrow) %v698_v6, 8 }
  0x33   : > { %714 = vxpose.xlu1.b32.cont [4/16] (narrow) %v682_v7, 8 }
  0x36   : > { %747 = vxpose.xlu0.b32.cont [5/16] (narrow) %v699_v8, 8  ;;  %v4666_v8 = vmov 920167782  }
  0x37   : > { %715 = vxpose.xlu1.b32.cont [5/16] (narrow) %v683_v9, 8 }
  0x3a   : > { %748 = vxpose.xlu0.b32.cont [6/16] (narrow) %v700_v10, 8 }
  0x3b   : > { %716 = vxpose.xlu1.b32.cont [6/16] (narrow) %v684_v11, 8  ;;  %v4667_v11 = vmov 1326507024  }
  0x3e   : > { %749 = vxpose.xlu0.b32.cont [7/16] (narrow) %v701_v12, 8 }
  0x3f   : > { %717 = vxpose.xlu1.b32.cont [7/16] (narrow) %v685_v13, 8 }
  0x42   : > { %750 = vxpose.xlu0.b32.cont [8/16] (narrow) %v702_v14, 8 }
  0x43   : > { %718 = vxpose.xlu1.b32.cont [8/16] (narrow) %v686_v15, 8 }
  0x46   : > { %751 = vxpose.xlu0.b32.cont [9/16] (narrow) %v703_v16, 8 }
  0x47   : > { %719 = vxpose.xlu1.b32.cont [9/16] (narrow) %v687_v17, 8 }
  0x4a   : > { %752 = vxpose.xlu0.b32.cont [10/16] (narrow) %v704_v18, 8 }
  0x4b   : > { %720 = vxpose.xlu1.b32.cont [10/16] (narrow) %v688_v19, 8 }
  0x4e   : > { %753 = vxpose.xlu0.b32.cont [11/16] (narrow) %v705_v20, 8 }
  0x4f   : > { %721 = vxpose.xlu1.b32.cont [11/16] (narrow) %v689_v21, 8 }
  0x52   : > { %754 = vxpose.xlu0.b32.cont [12/16] (narrow) %v706_v22, 8 }
  0x53   : > { %722 = vxpose.xlu1.b32.cont [12/16] (narrow) %v690_v23, 8 }
  0x56   : > { %755 = vxpose.xlu0.b32.cont [13/16] (narrow) %v707_v24, 8 }
  0x57   : > { %723 = vxpose.xlu1.b32.cont [13/16] (narrow) %v691_v25, 8 }
  0x5a   : > { %756 = vxpose.xlu0.b32.cont [14/16] (narrow) %v708_v26, 8 }
  0x5b   : > { %724 = vxpose.xlu1.b32.cont [14/16] (narrow) %v692_v27, 8 }
  0x5e   : > { %757 = vxpose.xlu0.b32.cont [15/16] (narrow) %v709_v28, 8 }
  0x5f   : > { %725 = vxpose.xlu1.b32.cont [15/16] (narrow) %v693_v29, 8 }
  0x62   : > { %758 = vxpose.xlu0.b32.end [16/16] (narrow) %v710_v30, 8 }
  0x63   : > { %726 = vxpose.xlu1.b32.end [16/16] (narrow) %v694_v31, 8 }
  0xa6   : > { %v4851_v32 = vpop.trf.xlu0 }
  0xa7   : > { %v4853_v33 = vpop.trf.xlu1  ;;  %v4856_v34 = vmul.f32 3.1415927, %v4851_v32  ;;  %v4859_v35 = vmul.f32 6.2831855, %v4851_v32 }
  0xa8   : > { %v4862_v36 = vmul.f32 6.2831855, %v4853_v33  ;;  %v4868_v44 = vmul.f32 3.1415927, %v4853_v33 }
  0xa9   : > { %v894_v37 = vand.u32 2139095040, %v4856_v34  ;;  %v1560_v38 = vand.u32 2139095040, %v4859_v35  ;;  %v1557_v47 = vand.u32 2147483647, %v4859_v35  ;;  %v891_v55 = vand.u32 2147483647, %v4856_v34 }
  0xaa   : > { %v1456_v39 = vand.u32 2139095040, %v4862_v36  ;;  %v790_v49 = vand.u32 2139095040, %v4868_v44  ;;  %v1453_v50 = vand.u32 2147483647, %v4862_v36 }
  0xab   : > { %v1561_v40 = vshrl.u32 %v1560_v38, 23  ;;  %v895_v42 = vshrl.u32 %v894_v37, 23  ;;  %v1564_v54 = vand.u32 8388607, %v1557_v47 }
  0xac   : > { %v1457_v41 = vshrl.u32 %v1456_v39, 23  ;;  %v791_v58 = vshrl.u32 %v790_v49, 23  ;;  %v1460_v59 = vand.u32 8388607, %v1453_v50 }
  0xad   : > { %v4221_v43 = vadd.s32 4294967169, %v1561_v40  ;;  %v4193_v48 = vadd.s32 4294967169, %v895_v42  ;;  %v1565_v13 = vor.u32 8388608, %v1564_v54 }
  0xae   : > { %v4217_v45 = vadd.s32 4294967169, %v1457_v41  ;;  %v4189_v24 = vadd.s32 4294967169, %v791_v58  ;;  %v1461_v42 = vor.u32 8388608, %v1460_v59 }
  0xaf   : > { %v1567_v46 = vadd.s32 1, %v4221_v43  ;;  %v901_v56 = vadd.s32 1, %v4193_v48  ;;  %v4895_v27 = vshll.u32 %v1565_v13, 8  ;;  %v898_v48 = vand.u32 8388607, %v891_v55 }
  0xb0   : > { %v1463_v52 = vadd.s32 1, %v4217_v45 }
  0xb1   : > { %vm1568_vm0 = vcmp.gt.s32.totalorder %v1567_v46, 0  ;;  %vm902_vm2 = vcmp.gt.s32.totalorder %v901_v56, 0  ;;  %v899_v58 = vor.u32 8388608, %v898_v48 }
  0xb2   : > { %v1569_v51 = vsel %vm1568_vm0, %v1567_v46, 0  ;;  %vm1464_vm1 = vcmp.gt.s32.totalorder %v1463_v52, 0  ;;  %v903_v28 = vsel %vm902_vm2, %v901_v56, 0  ;;  %v797_v46 = vadd.s32 1, %v4189_v24 }
  0xb3   : > { %v1571_v53 = vand.u32 31, %v1569_v51  ;;  %v1570_v60 = vshrl.u32 %v1569_v51, 5  ;;  %v1465_v21 = vsel %vm1464_vm1, %v1463_v52, 0  ;;  %v905_v43 = vand.u32 31, %v903_v28 }
  0xb4   : > { %v1467_v31 = vand.u32 31, %v1465_v21  ;;  %v4919_v54 = vshrl.u32 %v903_v28, 5  ;;  %vm798_vm7 = vcmp.gt.s32.totalorder %v797_v46, 0 }
  0xb5   : > { %v1572_v57 = vsub.s32 32, %v1571_v53  ;;  %v1574_v62 = vshll.u32 %v4662_v61, %v1571_v53  ;;  %v1577_v0 = vshll.u32 %v4663_v63, %v1571_v53  ;;  %v1580_v4 = vshll.u32 %v4664_v2, %v1571_v53 }
  0xb6   : > { %v1583_v7 = vshll.u32 %v4665_v5, %v1571_v53  ;;  %v1586_v10 = vshll.u32 %v4666_v8, %v1571_v53  ;;  %vm1589_vm3 = vcmp.lt.s32.totalorder %v1570_v60, 1  ;;  %vm1592_vm4 = vcmp.lt.s32.totalorder %v1570_v60, 4 }
  0xb7   : > { %v1575_v1 = vshrl.u32 %v4663_v63, %v1572_v57  ;;  %v1578_v3 = vshrl.u32 %v4664_v2, %v1572_v57  ;;  %v1581_v6 = vshrl.u32 %v4665_v5, %v1572_v57  ;;  %v1584_v9 = vshrl.u32 %v4666_v8, %v1572_v57 }
  0xb8   : > { %v1587_v12 = vshrl.u32 %v4667_v11, %v1572_v57  ;;  %vm1591_vm5 = vcmp.lt.s32.totalorder %v1570_v60, 3  ;;  %vm1590_vm6 = vcmp.lt.s32.totalorder %v1570_v60, 2  ;;  %v1573_v45 = vshrl.u32 %v4662_v61, %v1572_v57 }
  0xb9   : > { %v1576_v14 = vor.u32 %v1575_v1, %v1574_v62  ;;  %v1579_v15 = vor.u32 %v1578_v3, %v1577_v0  ;;  %v1582_v16 = vor.u32 %v1581_v6, %v1580_v4  ;;  %v1585_v17 = vor.u32 %v1584_v9, %v1583_v7 }
  0xba   : > { %v1588_v18 = vor.u32 %v1587_v12, %v1586_v10  ;;  %v4913_v49 = vsub.s32 32, %v1467_v31  ;;  %v4917_v53 = vshll.u32 %v1461_v42, 8  ;;  %v906_v56 = vsub.s32 32, %v905_v43 }
  0xbb   : > { %v1597_v19 = vsel %vm1589_vm3, %v1576_v14, %v1579_v15  ;;  %v1601_v20 = vsel %vm1589_vm3, %v1579_v15, %v1582_v16  ;;  %v1598_v22 = vsel %vm1592_vm4, %v1585_v17, 920167782  ;;  %v1594_v39 = vsel %vm1592_vm4, %v1582_v16, 2102212464 }
  0xbc   : > { %v1602_v23 = vsel %vm1592_vm4, %v1588_v18, 1326507024  ;;  %v1599_v25 = vsel %vm1591_vm5, %v1582_v16, %v1598_v22  ;;  %v1593_v51 = vsel %vm1589_vm3, %v1573_v45, %v1576_v14  ;;  %v1595_v52 = vsel %vm1591_vm5, %v1579_v15, %v1594_v39 }
  0xbd   : > { %v1603_v26 = vsel %vm1591_vm5, %v1585_v17, %v1602_v23  ;;  %v1600_v29 = vsel %vm1590_vm6, %v1597_v19, %v1599_v25  ;;  %v1596_v59 = vsel %vm1590_vm6, %v1593_v51, %v1595_v52  ;;  %v1471_v57 = vshrl.u32 %v4663_v63, %v4913_v49 }
  0xbe   : > { %v1604_v30 = vsel %vm1590_vm6, %v1601_v20, %v1603_v26  ;;  %v4901_v37 = vmul.u32.u64.low %v4895_v27, %v1600_v29  ;;  %v4902_v38 = vmul.u32.u64.high %v4895_v27, %v1600_v29, %v4901_v37  ;;  %v1480_v62 = vshrl.u32 %v4666_v8, %v4913_v49 }
  0xbf   : > { %v4907_v40 = vmul.u32.u64.low %v4895_v27, %v1604_v30  ;;  %v4908_v41 = vmul.u32.u64.high %v4895_v27, %v1604_v30, %v4907_v40  ;;  %v1483_v0 = vshrl.u32 %v4667_v11, %v4913_v49  ;;  %v4929_v3 = vshrl.u32 %v1465_v21, 5 }
  0xc0   : > { %v1615_v1 = vadd.s32 1, %v4902_v38  ;;  %v1474_v4 = vshrl.u32 %v4664_v2, %v4913_v49  ;;  %v1477_v60 = vshrl.u32 %v4665_v5, %v4913_v49  ;;  %v1470_v6 = vshll.u32 %v4662_v61, %v1467_v31 }
  0xc1   : > { %vm1614_vm8 = vc.u32 %v4908_v41, %v4901_v37  ;;  %v1479_v7 = vshll.u32 %v4665_v5, %v1467_v31  ;;  %v1482_v9 = vshll.u32 %v4666_v8, %v1467_v31  ;;  %v4940_v10 = vsel %vm798_vm7, %v797_v46, 0 }
  0xc2   : > { %v1473_v12 = vshll.u32 %v4663_v63, %v1467_v31  ;;  %v1476_v13 = vshll.u32 %v4664_v2, %v1467_v31  ;;  %v4944_v14 = vshll.u32 %v899_v58, 8  ;;  %v1612_v15 = vmul.u32 %v4895_v27, %v1596_v59 }
  0xc3   : > { %v4947_v16 = vor.u32 %v1471_v57, %v1470_v6  ;;  %v1481_v17 = vor.u32 %v1480_v62, %v1479_v7  ;;  %v1484_v18 = vor.u32 %v1483_v0, %v1482_v9  ;;  %v1616_v19 = vsel %vm1614_vm8, %v1615_v1, %v4902_v38 }
  0xc4   : > { %v4950_v20 = vor.u32 %v1474_v4, %v1473_v12  ;;  %v1478_v21 = vor.u32 %v1477_v60, %v1476_v13  ;;  %v909_v22 = vshrl.u32 %v4663_v63, %v906_v56  ;;  %vm1488_vm9 = vcmp.lt.s32.totalorder %v4929_v3, 4 }
  0xc5   : > { %v908_v23 = vshll.u32 %v4662_v61, %v905_v43  ;;  %v911_v24 = vshll.u32 %v4663_v63, %v905_v43  ;;  %v912_v25 = vshrl.u32 %v4664_v2, %v906_v56  ;;  %v914_v26 = vshll.u32 %v4664_v2, %v905_v43 }
  0xc6   : > { %v915_v27 = vshrl.u32 %v4665_v5, %v906_v56  ;;  %v917_v28 = vshll.u32 %v4665_v5, %v905_v43  ;;  %v918_v29 = vshrl.u32 %v4666_v8, %v906_v56  ;;  %vm1485_vm10 = vcmp.lt.s32.totalorder %v4929_v3, 1 }
  0xc7   : > { %vm1486_vm11 = vcmp.lt.s32.totalorder %v4929_v3, 2  ;;  %v1494_v30 = vsel %vm1488_vm9, %v1481_v17, 920167782  ;;  %v1498_v31 = vsel %vm1488_vm9, %v1484_v18, 1326507024  ;;  %v910_v38 = vor.u32 %v909_v22, %v908_v23 }
  0xc8   : > { %v913_v39 = vor.u32 %v912_v25, %v911_v24  ;;  %v916_v40 = vor.u32 %v915_v27, %v914_v26  ;;  %v919_v42 = vor.u32 %v918_v29, %v917_v28  ;;  %v1617_v45 = vadd.s32 %v1616_v19, %v1612_v15 }
  0xc9   : > { %vm1487_vm12 = vcmp.lt.s32.totalorder %v4929_v3, 3  ;;  %v920_v46 = vshll.u32 %v4666_v8, %v905_v43  ;;  %v921_v48 = vshrl.u32 %v4667_v11, %v906_v56  ;;  %v1493_v51 = vsel %vm1485_vm10, %v4947_v16, %v4950_v20 }
  0xca   : > { %v1495_v52 = vsel %vm1487_vm12, %v1478_v21, %v1494_v30  ;;  %v1497_v58 = vsel %vm1485_vm10, %v4950_v20, %v1478_v21  ;;  %v1499_v59 = vsel %vm1487_vm12, %v1481_v17, %v1498_v31  ;;  %v907_v57 = vshrl.u32 %v4662_v61, %v906_v56 }
  0xcb   : > { %v922_v43 = vor.u32 %v921_v48, %v920_v46  ;;  %vm923_vm13 = vcmp.lt.s32.totalorder %v4919_v54, 1  ;;  %vm926_vm14 = vcmp.lt.s32.totalorder %v4919_v54, 4  ;;  %vm925_vm15 = vcmp.lt.s32.totalorder %v4919_v54, 3 }
  0xcc   : > { %v928_v62 = vsel %vm926_vm14, %v916_v40, 2102212464  ;;  %v931_v0 = vsel %vm923_vm13, %v910_v38, %v913_v39  ;;  %v932_v1 = vsel %vm926_vm14, %v919_v42, 920167782  ;;  %v1496_v4 = vsel %vm1486_vm11, %v1493_v51, %v1495_v52 }
  0xcd   : > { %vm924_vm0 = vcmp.lt.s32.totalorder %v4919_v54, 2  ;;  %v933_v60 = vsel %vm925_vm15, %v916_v40, %v932_v1  ;;  %v935_v6 = vsel %vm923_vm13, %v913_v39, %v916_v40  ;;  %v1500_v56 = vsel %vm1486_vm11, %v1497_v58, %v1499_v59 }
  0xce   : > { %v927_v7 = vsel %vm923_vm13, %v907_v57, %v910_v38  ;;  %v934_v9 = vsel %vm924_vm0, %v931_v0, %v933_v60  ;;  %v936_v12 = vsel %vm926_vm14, %v922_v43, 1326507024  ;;  %v929_v13 = vsel %vm925_vm15, %v913_v39, %v928_v62 }
  0xcf   : > { %v937_v15 = vsel %vm925_vm15, %v919_v42, %v936_v12  ;;  %v4993_v17 = vmul.u32.u64.low %v4944_v14, %v934_v9  ;;  %v4994_v18 = vmul.u32.u64.high %v4944_v14, %v934_v9, %v4993_v17  ;;  %v1618_v19 = vadd.s32 536870912, %v1617_v45 }
  0xd0   : > { %v4998_v22 = vmul.u32.u64.low %v4917_v53, %v1496_v4  ;;  %v4999_v23 = vmul.u32.u64.high %v4917_v53, %v1496_v4, %v4998_v22  ;;  %v938_v24 = vsel %vm924_vm0, %v935_v6, %v937_v15  ;;  %v930_v29 = vsel %vm924_vm0, %v927_v7, %v929_v13 }
  0xd1   : > { %v5005_v25 = vmul.u32.u64.low %v4917_v53, %v1500_v56  ;;  %v5006_v26 = vmul.u32.u64.high %v4917_v53, %v1500_v56, %v5005_v25  ;;  %v5009_v27 = vmul.u32.u64.low %v4944_v14, %v938_v24  ;;  %v5010_v28 = vmul.u32.u64.high %v4944_v14, %v938_v24, %v5009_v27 }
  0xd2   : > { %v801_v30 = vand.u32 31, %v4940_v10  ;;  %v949_v31 = vadd.s32 1, %v4994_v18  ;;  %v1490_v38 = vsel %vm1488_vm9, %v1478_v21, 2102212464  ;;  %v5018_v39 = vshrl.u32 %v1618_v19, 30 }
  0xd3   : > { %v1469_v40 = vshrl.u32 %v4662_v61, %v4913_v49  ;;  %v946_v42 = vmul.u32 %v4944_v14, %v930_v29  ;;  %vm948_vm1 = vc.u32 %v5010_v28, %v4993_v17  ;;  %v1491_v21 = vsel %vm1487_vm12, %v4950_v20, %v1490_v38 }
  0xd4   : > { %v950_v54 = vsel %vm948_vm1, %v949_v31, %v4994_v18  ;;  %v802_v46 = vsub.s32 32, %v801_v30  ;;  %v1511_v52 = vadd.s32 1, %v4999_v23  ;;  %v1620_v49 = vshll.u32 %v5018_v39, 30 }
  0xd5   : > { %v1489_v48 = vsel %vm1485_vm10, %v1469_v40, %v4947_v16  ;;  %v951_v51 = vadd.s32 %v950_v54, %v946_v42  ;;  %vm1510_vm2 = vc.u32 %v5006_v26, %v4998_v22  ;;  %v787_v16 = vand.u32 2147483647, %v4868_v44 }
  0xd6   : > { %v1492_v58 = vsel %vm1486_vm11, %v1489_v48, %v1491_v21  ;;  %v805_v57 = vshrl.u32 %v4663_v63, %v802_v46  ;;  %v800_v20 = vshrl.u32 %v4940_v10, 5  ;;  %v1512_v43 = vsel %vm1510_vm2, %v1511_v52, %v4999_v23 }
  0xd7   : > { %v952_v14 = vadd.s32 536870912, %v951_v51  ;;  %v808_v62 = vshrl.u32 %v4664_v2, %v802_v46  ;;  %v814_v0 = vshrl.u32 %v4666_v8, %v802_v46  ;;  %v5046_v1 = vsub.s32 %v1617_v45, %v1620_v49 }
  0xd8   : > { %v1508_v4 = vmul.u32 %v4917_v53, %v1492_v58  ;;  %v804_v60 = vshll.u32 %v4662_v61, %v801_v30  ;;  %v807_v6 = vshll.u32 %v4663_v63, %v801_v30  ;;  %v811_v56 = vshrl.u32 %v4665_v5, %v802_v46 }
  0xd9   : > { %v5038_v59 = vshrl.u32 %v952_v14, 30  ;;  %v813_v10 = vshll.u32 %v4665_v5, %v801_v30  ;;  %v817_v7 = vshrl.u32 %v4667_v11, %v802_v46  ;;  %v794_v45 = vand.u32 8388607, %v787_v16 }
  0xda   : > { %v5055_v9 = vadd.s32 %v1512_v43, %v1508_v4  ;;  %v806_v13 = vor.u32 %v805_v57, %v804_v60  ;;  %v809_v53 = vor.u32 %v808_v62, %v807_v6  ;;  %v810_v15 = vshll.u32 %v4664_v2, %v801_v30 }
  0xdb   : > { %v954_v3 = vshll.u32 %v5038_v59, 30  ;;  %v815_v18 = vor.u32 %v814_v0, %v813_v10  ;;  %v816_v19 = vshll.u32 %v4666_v8, %v801_v30  ;;  %v795_v29 = vor.u32 8388608, %v794_v45 }
  0xdc   : > { %v812_v24 = vor.u32 %v811_v56, %v810_v15  ;;  %vm819_vm3 = vcmp.lt.s32.totalorder %v800_v20, 1  ;;  %vm822_vm4 = vcmp.lt.s32.totalorder %v800_v20, 4  ;;  %v1623_v31 = vsub.s32 0, %v5046_v1 }
  0xdd   : > { %v955_v12 = vsub.s32 %v951_v51, %v954_v3  ;;  %v818_v25 = vor.u32 %v817_v7, %v816_v19  ;;  %v1514_v38 = vadd.s32 536870912, %v5055_v9  ;;  %v827_v40 = vsel %vm819_vm3, %v806_v13, %v809_v53 }
  0xde   : > { %v828_v42 = vsel %vm822_vm4, %v815_v18, 920167782  ;;  %v803_v48 = vshrl.u32 %v4662_v61, %v802_v46  ;;  %vm820_vm5 = vcmp.lt.s32.totalorder %v800_v20, 2  ;;  %vm821_vm6 = vcmp.lt.s32.totalorder %v800_v20, 3 }
  0xdf   : > { %v957_v23 = vsub.s32 0, %v955_v12  ;;  %v824_v30 = vsel %vm822_vm4, %v812_v24, 2102212464  ;;  %v829_v21 = vsel %vm821_vm6, %v812_v24, %v828_v42  ;;  %v831_v51 = vsel %vm819_vm3, %v809_v53, %v812_v24 }
  0xe0   : > { %v832_v52 = vsel %vm822_vm4, %v818_v25, 1326507024  ;;  %v830_v14 = vsel %vm820_vm5, %v827_v40, %v829_v21  ;;  %v835_v57 = vshll.u32 %v795_v29, 8  ;;  %v5067_v43 = vshrl.u32 %v1514_v38, 30 }
  0xe1   : > { %v4194_v27 = vmin.u32 %v957_v23, %v955_v12  ;;  %v833_v58 = vsel %vm821_vm6, %v815_v18, %v832_v52  ;;  %v823_v62 = vsel %vm819_vm3, %v803_v48, %v806_v13  ;;  %v825_v46 = vsel %vm821_vm6, %v809_v53, %v824_v30 }
  0xe2   : > { %v834_v0 = vsel %vm820_vm5, %v831_v51, %v833_v58  ;;  %v4222_v60 = vmin.u32 %v1623_v31, %v5046_v1  ;;  %v5075_v56 = vmul.u32.u64.low %v835_v57, %v830_v14  ;;  %v5076_v10 = vmul.u32.u64.high %v835_v57, %v830_v14, %v5075_v56 }
  0xe3   : > { %v959_v54 = vclz %v4194_v27  ;;  %v5071_v4 = vmul.u32.u64.low %v835_v57, %v834_v0  ;;  %v5072_v3 = vmul.u32.u64.high %v835_v57, %v834_v0, %v5071_v4  ;;  %v947_v7 = vadd.s32 %v4993_v17, %v5010_v28  ;;  %v2090_v0 = vld [vmem:[%s6032_s8 + $0x8] sm:$0xff] }
  0xe4   : > { %v826_v13 = vsel %vm820_vm5, %v823_v62, %v825_v46  ;;  %v4668_v18 = vmov 0   ;;  %v1516_v53 = vshll.u32 %v5067_v43, 30  ;;  %v1625_v25 = vclz %v4222_v60 }
  0xe5   : > { %v4195_v49 = vadd.s32 4294967294, %v959_v54  ;;  %1056 = vmatprep.mubr.bf16.mxu0 %v4668_v18  ;;  %4517 = vset.pattern.permute.xlu1 %v4668_v18  ;;  %vm844_vm8 = vc.u32 %v5072_v3, %v5075_v56  ;;  %v845_v17 = vadd.s32 1, %v5076_v10  ;;  %v842_v27 = vmul.u32 %v835_v57, %v826_v13  ;;  %v2043_v57 = vld [vmem:[%s6031_s6 + $0x10] sm:$0xff] }
  0xe6   : > { %4516 = vset.pattern.permute.xlu0 %v4668_v18  ;;  %2170 = vmatprep.mubr.bf16.mxu1 %v4668_v18  ;;  %v5092_v31 = vsub.s32 %v5055_v9, %v1516_v53  ;;  %v4223_v40 = vadd.s32 4294967294, %v1625_v25  ;;  %v977_v30 = vsub.s32 4, %v5038_v59  ;;  %v2041_v9 = vld [vmem:[%s6031_s6] sm:$0xff]  ;;  %vm893_vm10 = vcmp.lt.s32.totalorder %v4856_v34, 0 }
  0xe7   : > { %vm4196_vm7 = vcmp.lt.s32.totalorder %v4195_v49, 0  ;;  %v846_v29 = vsel %vm844_vm8, %v845_v17, %v5076_v10  ;;  %2047 = vperm.xlu0 %4516, %v2041_v9   ;;  %vm892_vm11 = vcmp.le.f32.partialorder %v891_v55, 0.7853982  ;;  %v2044_v55 = vld [vmem:[%s6031_s6 + $0x18] sm:$0xff]  ;;  %v3525_v17 = vld [vmem:[%s6033_s16] sm:$0xff]  ;;  %vm1014_vm12 = vcmask 1040384  }
  0xe8   : > { %v962_v6 = vsel %vm4196_vm7, 0, %v4195_v49  ;;  %v847_v38 = vadd.s32 %v846_v29, %v842_v27  ;;  %v1519_v21 = vsub.s32 0, %v5092_v31  ;;  %v2042_v49 = vld [vmem:[%s6031_s6 + $0x8] sm:$0xff]  ;;  %vm4224_vm9 = vcmp.lt.s32.totalorder %v4223_v40, 0  ;;  %s6043_s6 = smov %s6042_s26 }
  0xe9   : > { %v963_v45 = vsub.s32 32, %v962_v6  ;;  %v967_v15 = vsub.s32 4294967266, %v962_v6  ;;  %v964_v19 = vshll.u32 %v955_v12, %v962_v6  ;;  %2052 = vperm.xlu1 %4517, %v2042_v49   ;;  %v978_v62 = vsel %vm893_vm10, %v977_v30, %v5038_v59 }
  0xea   : > { %v848_v48 = vadd.s32 536870912, %v847_v38  ;;  %v5115_v46 = vsel %vm4224_vm9, 0, %v4223_v40  ;;  %v4218_v4 = vmin.u32 %v1519_v21, %v5092_v31  ;;  %vm1015_vm14 = vcmask 1041408  }
  0xeb   : > { %v965_v23 = vshrl.u32 %v947_v7, %v963_v45  ;;  %v968_v24 = vadd.s32 127, %v967_v15  ;;  %v5119_v7 = vsel %vm892_vm11, 0, %v978_v62  ;;  %2108 = vperm.xlu0 %4516, %v2090_v0   ;;  %v1633_v59 = vsub.s32 4294967266, %v5115_v46  ;;  %v2092_v15 = vld [vmem:[%s6032_s8 + $0x18] sm:$0xff] }
  0xec   : > { %v5096_v52 = vshrl.u32 %v848_v48, 30  ;;  %v1521_v13 = vclz %v4218_v4  ;;  %v1629_v27 = vsub.s32 32, %v5115_v46  ;;  %v843_v30 = vadd.s32 %v5075_v56, %v5072_v3  ;;  %v2207_v3 = vld [vmem:[%s6034_s10] sm:$0x7] }
  0xed   : > { %v966_v28 = vor.u32 %v965_v23, %v964_v19  ;;  %v969_v20 = vshll.u32 %v968_v24, 23  ;;  %2057 = vperm.xlu1 %4517, %v2043_v57   ;;  %v984_v19 = vadd.s32 3, %v5119_v7  ;;  %v2089_v24 = vld [vmem:[%s6032_s8] sm:$0xff]  ;;  %v1634_v25 = vadd.s32 127, %v1633_v59 }
  0xee   : > { %v850_v58 = vshll.u32 %v5096_v52, 30  ;;  %vm983_vm3 = vweird.f32 %v4856_v34  ;;  %vm788_vm4 = vcmp.le.f32.partialorder %v787_v16, 0.7853982  ;;  %vm789_vm5 = vcmp.lt.s32.totalorder %v4868_v44, 0 }
  0xef   : > { %v970_v12 = vor.u32 4788187, %v969_v20  ;;  %v973_v54 = vcvt.s32.f32 %v966_v28  ;;  %2118 = vperm.xlu0 %4516, %v2092_v15   ;;  %v4219_v28 = vadd.s32 4294967294, %v1521_v13  ;;  %v985_v29 = vand.u32 3, %v984_v19  ;;  %v3526_v19 = vld [vmem:[%s6033_s16 + $0x8] sm:$0xff] }
  0xf0   : > { %v851_v6 = vsub.s32 %v847_v38, %v850_v58  ;;  %v1613_v38 = vadd.s32 %v4901_v37, %v4908_v41  ;;  %v1635_v40 = vshll.u32 %v1634_v25, 23  ;;  %v1630_v37 = vshll.u32 %v5046_v1, %v5115_v46  ;;  %v3573_v46 = vld [vmem:[%s6005_s18] sm:$0xff]  ;;  %v3575_v25 = vld [vmem:[%s6005_s18 + $0x10] sm:$0xff] }
  0xf1   : > { %v971_v42 = vand.u32 2147483647, %v970_v12  ;;  %2062 = vperm.xlu1 %4517, %v2044_v55   ;;  %v2091_v12 = vld [vmem:[%s6032_s8 + $0x10] sm:$0xff]  ;;  %vm4220_vm15 = vcmp.lt.s32.totalorder %v4219_v28, 0  ;;  %vm990_vm0 = vcmp.eq.s32.totalorder %v985_v29, 2  ;;  %vm987_vm1 = vcmp.eq.s32.totalorder %v985_v29, 0 }
  0xf2   : > { %v853_v45 = vsub.s32 0, %v851_v6  ;;  %v1631_v41 = vshrl.u32 %v1613_v38, %v1629_v27  ;;  %v1636_v56 = vor.u32 4788187, %v1635_v40  ;;  %v1524_v0 = vsel %vm4220_vm15, 0, %v4219_v28  ;;  %s4320_s8 = sshll.u32 (%p4805_p4), %s4793_s27, 8 }
  0xf3   : > { %v974_v51 = vmul.f32 %v973_v54, %v971_v42  ;;  %3531 = vperm.xlu0 %4516, %v3525_v17   ;;  %v3527_v54 = vld [vmem:[%s6033_s16 + $0x10] sm:$0xff]  ;;  %vm986_vm2 = vcmp.lt.s32.totalorder %v985_v29, 2  ;;  %v4669_v55 = vmov 65535   ;;  %v1529_v15 = vsub.s32 4294967266, %v1524_v0  ;;  %s5855_s5 = scalar_lea.vmem (%p4805_p4), %s6008_s21, %s4320_s8  }
  0xf4   : > { %v4190_v53 = vmin.u32 %v853_v45, %v851_v6  ;;  %v1016_v59 = vsel %vm1014_vm12, 4294967295, %v4669_v55  ;;  %v873_v40 = vsub.s32 4, %v5096_v52  ;;  %vm1559_vm6 = vcmp.lt.s32.totalorder %v4859_v35, 0 }
  0xf5   : > { %v975_v14 = vxor.u32 2147483648, %v974_v51  ;;  %2103 = vperm.xlu1 %4517, %v2089_v24   ;;  %v5178_v17 = vsel %vm1015_vm14, %v1016_v59, 0  ;;  %vm5207_vm7 = vcmp.le.f32.partialorder %v1557_v47, 0.7853982  ;;  %v1643_v59 = vsub.s32 4, %v5018_v39 }
  0xf6   : > { %v855_v23 = vclz %v4190_v53  ;;  %vm879_vm14 = vweird.f32 %v4868_v44  ;;  %vm1455_vm15 = vcmp.lt.s32.totalorder %v4862_v36, 0 }
  0xf7   : > { %v976_v60 = vsel %vm893_vm10, %v975_v14, %v974_v51  ;;  %3541 = vperm.xlu0 %4516, %v3527_v54  }
  0xf8   : > { %v979_v10 = vsel %vm892_vm11, %v4856_v34, %v976_v60  ;;  %v4191_v20 = vadd.s32 4294967294, %v855_v23  ;;  %v1637_v23 = vand.u32 2147483647, %v1636_v56 }
  0xf9   : > { %4542 = vcosq.f32 %v979_v10  ;;  %2113 = vperm.xlu1 %4517, %v2091_v12   ;;  %v1530_v12 = vadd.s32 127, %v1529_v15 }
  0xfa   : > { %4544 = vsinq.f32 %v979_v10  ;;  %vm4192_vm13 = vcmp.lt.s32.totalorder %v4191_v20, 0  ;;  %v1632_v10 = vor.u32 %v1631_v41, %v1630_v37  ;;  %v1509_v37 = vadd.s32 %v4998_v22, %v5006_v26 }
  0xfb   : > { %v858_v42 = vsel %vm4192_vm13, 0, %v4191_v20  ;;  %3587 = vperm.xlu0 %4516, %v3573_v46   ;;  %v1531_v41 = vshll.u32 %v1530_v12, 23  ;;  %v1526_v22 = vshll.u32 %v5092_v31, %v1524_v0  ;;  %v1352_v31 = vand.u32 3, %v5119_v7 }
  0xfc   : > { %v859_v21 = vsub.s32 32, %v858_v42  ;;  %v863_v51 = vsub.s32 4294967266, %v858_v42  ;;  %v860_v58 = vshll.u32 %v851_v6, %v858_v42  ;;  %v1639_v27 = vcvt.s32.f32 %v1632_v10  ;;  %v3528_v42 = vld [vmem:[%s6033_s16 + $0x18] sm:$0xff]  ;;  %s6044_s16 = sld [smem:[#allocation7_spill]] }
  0xfd   : > { %2215 = vperm.xlu1 %4517, %v2207_v3   ;;  %v1532_v26 = vor.u32 4788187, %v1531_v41  ;;  %vm1354_vm8 = vcmp.eq.s32.totalorder %v1352_v31, 0  ;;  %vm1357_vm9 = vcmp.eq.s32.totalorder %v1352_v31, 2  ;;  %vm1353_vm11 = vcmp.lt.s32.totalorder %v1352_v31, 2 }
  0xfe   : > { %v861_v57 = vshrl.u32 %v843_v30, %v859_v21  ;;  %v864_v62 = vadd.s32 127, %v863_v51  ;;  %v1640_v54 = vmul.f32 %v1639_v27, %v1637_v23  ;;  %v3690_v30 = vld [vmem:[%s6007_s20] sm:$0x7]  ;;  %v1525_v21 = vsub.s32 32, %v1524_v0 }
  0xff   : > { %3597 = vperm.xlu0 %4516, %v3575_v25   ;;  %v1533_v10 = vand.u32 2147483647, %v1532_v26 }
 0x100   : > { %v862_v60 = vor.u32 %v861_v57, %v860_v58  ;;  %v865_v6 = vshll.u32 %v864_v62, 23  ;;  %v874_v57 = vsel %vm789_vm5, %v873_v40, %v5096_v52  ;;  %v3574_v62 = vld [vmem:[%s6005_s18 + $0x8] sm:$0xff]  ;;  %v1641_v3 = vxor.u32 2147483648, %v1640_v54  ;;  %v3576_v52 = vld [vmem:[%s6005_s18 + $0x18] sm:$0xff] }
 0x101   : > { %3536 = vperm.xlu1 %4517, %v3526_v19   ;;  %v876_v16 = vsel %vm788_vm4, 0, %v874_v57 }
 0x102   : > { %v866_v53 = vor.u32 4788187, %v865_v6  ;;  %v869_v20 = vcvt.s32.f32 %v862_v60  ;;  %v1642_v46 = vsel %vm1559_vm6, %v1641_v3, %v1640_v54  ;;  %v880_v60 = vadd.s32 3, %v876_v16 }
 0x103   : > { %v5144_v48 = vpop.eup %4542  ;;  %3698 = vperm.xlu0 %4516, %v3690_v30   ;;  %v1645_v0 = vsel %vm5207_vm7, %v4859_v35, %v1642_v46 }
 0x104   : > { %v5148_v49 = vpop.eup %4544  ;;  %v991_v9 = vxor.u32 2147483648, %v5144_v48  ;;  %v867_v28 = vand.u32 2147483647, %v866_v53  ;;  %v881_v55 = vand.u32 3, %v880_v60 }
 0x105   : > { %v988_v14 = vxor.u32 2147483648, %v5148_v49  ;;  %3546 = vperm.xlu1 %4517, %v3528_v42   ;;  %v779_v42 = vpack.c.bf16 %v4853_v33, %v4853_v33 }
 0x106   : > { %v992_v1 = vsel %vm990_vm0, %v991_v9, %v5148_v49  ;;  %v870_v38 = vmul.f32 %v869_v20, %v867_v28  ;;  %v1359_v7 = vsel %vm1357_vm9, %v991_v9, %v5148_v49  ;;  %vm886_vm10 = vcmp.eq.s32.totalorder %v881_v55, 2 }
 0x107   : > { %v989_v4 = vsel %vm987_vm1, %v5144_v48, %v988_v14  ;;  %v1356_v53 = vsel %vm1354_vm8, %v5144_v48, %v988_v14  ;;  %vm883_vm12 = vcmp.eq.s32.totalorder %v881_v55, 0  ;;  %vm882_vm13 = vcmp.lt.s32.totalorder %v881_v55, 2 }
 0x108   : > { %v993_v45 = vsel %vm986_vm2, %v989_v4, %v992_v1  ;;  %v871_v51 = vxor.u32 2147483648, %v870_v38  ;;  %v1527_v1 = vshrl.u32 %v1509_v37, %v1525_v21  ;;  %v1360_v20 = vsel %vm1353_vm11, %v1356_v53, %v1359_v7  ;;  %v4518_v37 = vld [vmem:[%s6039_s24] sm:$0xff]  }
 0x109   : > { %v994_v13 = vsel %vm983_vm3, nan, %v993_v45  ;;  %3592 = vperm.xlu1 %4517, %v3574_v62   ;;  %v780_v49 = vpack.c.bf16 %v4851_v32, %v4851_v32  ;;  %vm5246_vm0 = vcmp.le.f32.partialorder %v1453_v50, 0.7853982  ;;  %vm1007_vm1 = vcmask 23552  }
 0x10a   : > { %v996_v24 = vpack.c.bf16 %v994_v13, %v994_v13  ;;  %v872_v58 = vsel %vm789_vm5, %v871_v51, %v870_v38  ;;  %v1528_v4 = vor.u32 %v1527_v1, %v1526_v22  ;;  %v1094_v50 = vand.u32 %v5178_v17, %v779_v42 }
 0x10b   : > { %v875_v56 = vsel %vm788_vm4, %v4868_v44, %v872_v58  ;;  %v1097_v51 = vand.u32 %v5178_v17, %v780_v49  ;;  %v1249_v58 = vand.u32 3, %v876_v16  ;;  %vm1649_vm8 = vweird.f32 %v4859_v35 }
 0x10c   : > { %v1022_v29 = vand.u32 %v5178_v17, %v996_v24  ;;  %4546 = vcosq.f32 %v875_v56  ;;  %v1535_v45 = vcvt.s32.f32 %v1528_v4  ;;  %v1644_v24 = vsel %vm1559_vm6, %v1643_v59, %v5018_v39  ;;  %v4519_v4 = vld [vmem:[%s6039_s24 + $0x8] sm:$0xff]  }
 0x10d   : > { %4548 = vsinq.f32 %v875_v56  ;;  %3602 = vperm.xlu1 %4517, %v3576_v52   ;;  %v1646_v48 = vsel %vm5207_vm7, 0, %v1644_v24  ;;  %v1361_v39 = vsel %vm983_vm3, nan, %v1360_v20  ;;  %v1539_v56 = vsub.s32 4, %v5067_v43 }
 0x10e   : > { %1024 = vmatprep.subr.bf16.mxu0 %v1022_v29  ;;  %4550 = vcosq.f32 %v1645_v0  ;;  %v1536_v13 = vmul.f32 %v1535_v45, %v1533_v10  ;;  %v1650_v38 = vadd.s32 3, %v1646_v48  ;;  %v1363_v34 = vpack.c.bf16 %v1361_v39, %v1361_v39 }
 0x10f   : > { %4552 = vsinq.f32 %v1645_v0  ;;  %vm1251_vm2 = vcmp.eq.s32.totalorder %v1249_v58, 0  ;;  %vm1254_vm3 = vcmp.eq.s32.totalorder %v1249_v58, 2  ;;  %v1540_v46 = vsel %vm1455_vm15, %v1539_v56, %v5067_v43 }
 0x110   : > { %v1537_v28 = vxor.u32 2147483648, %v1536_v13  ;;  %v1651_v57 = vand.u32 3, %v1650_v38  ;;  %v1384_v1 = vand.u32 %v1363_v34, %v5178_v17  ;;  %vm1250_vm6 = vcmp.lt.s32.totalorder %v1249_v58, 2  ;;  %v4525_v58 = vld [vmem:[%s6043_s6 + $0x8] sm:$0xff]  }
 0x111   : > { %v1542_v10 = vsel %vm5246_vm0, 0, %v1540_v46  ;;  %v1946_v7 = vand.u32 3, %v1646_v48 }
 0x112   : > { %v1538_v12 = vsel %vm1455_vm15, %v1537_v28, %v1536_v13  ;;  %vm1653_vm4 = vcmp.eq.s32.totalorder %v1651_v57, 0  ;;  %vm1656_vm5 = vcmp.eq.s32.totalorder %v1651_v57, 2  ;;  %vm1652_vm7 = vcmp.lt.s32.totalorder %v1651_v57, 2  ;;  %v4527_v57 = vld [vmem:[%s6044_s16 + $0x8] sm:$0xff]  }
 0x113   : > { %v1541_v41 = vsel %vm5246_vm0, %v4862_v36, %v1538_v12  ;;  %v1546_v0 = vadd.s32 3, %v1542_v10  ;;  %vm1948_vm11 = vcmp.eq.s32.totalorder %v1946_v7, 0  ;;  %vm1545_vm15 = vweird.f32 %v4862_v36  ;;  %v4526_v36 = vld [vmem:[%s6044_s16] sm:$0xff]  }
 0x114   : > { %4554 = vcosq.f32 %v1541_v41  ;;  %v1843_v38 = vand.u32 3, %v1542_v10 }
 0x115   : > { %4556 = vsinq.f32 %v1541_v41  ;;  %v1547_v44 = vand.u32 3, %v1546_v0 }
 0x116   : > { %v4547_v15 = vpop.eup %4546  ;;  %vm1845_vm0 = vcmp.eq.s32.totalorder %v1843_v38, 0 }
 0x117   : > { %v4549_v47 = vpop.eup %4548  ;;  %v887_v19 = vxor.u32 2147483648, %v4547_v15  ;;  %vm1549_vm9 = vcmp.eq.s32.totalorder %v1547_v44, 0 }
 0x118   : > { %v884_v23 = vxor.u32 2147483648, %v4549_v47  ;;  %v5237_v40 = vpop.eup %4550 }
 0x119   : > { %v888_v25 = vsel %vm886_vm10, %v887_v19, %v4549_v47  ;;  %v5242_v30 = vpop.eup %4552  ;;  %v1657_v3 = vxor.u32 2147483648, %v5237_v40  ;;  %v1256_v22 = vsel %vm1254_vm3, %v887_v19, %v4549_v47  ;;  %vm1552_vm10 = vcmp.eq.s32.totalorder %v1547_v44, 2 }
 0x11a   : > { %v885_v27 = vsel %vm883_vm12, %v4547_v15, %v884_v23  ;;  %v1654_v62 = vxor.u32 2147483648, %v5242_v30  ;;  %v1253_v16 = vsel %vm1251_vm2, %v4547_v15, %v884_v23  ;;  %v4520_v15 = vld [vmem:[%s6040_s22] sm:$0xff]   ;;  %vm1951_vm12 = vcmp.eq.s32.totalorder %v1946_v7, 2 }
 0x11b   : > { %v889_v14 = vsel %vm882_vm13, %v885_v27, %v888_v25  ;;  %v1658_v52 = vsel %vm1656_vm5, %v1657_v3, %v5242_v30  ;;  %v1257_v60 = vsel %vm1250_vm6, %v1253_v16, %v1256_v22  ;;  %v1953_v20 = vsel %vm1951_vm12, %v1657_v3, %v5242_v30  ;;  %v4521_v27 = vld [vmem:[%s6040_s22 + $0x8] sm:$0xff]  }
 0x11c   : > { %v890_v9 = vsel %vm879_vm14, nan, %v889_v14  ;;  %v1655_v26 = vsel %vm1653_vm4, %v5237_v40, %v1654_v62  ;;  %v1258_v31 = vsel %vm879_vm14, nan, %v1257_v60  ;;  %v1950_v28 = vsel %vm1948_vm11, %v5237_v40, %v1654_v62  ;;  %v4523_v30 = vld [vmem:[%s6041_s29 + $0x8] sm:$0xff]  }
 0x11d   : > { %v995_v29 = vpack.c.bf16 %v890_v9, %v890_v9  ;;  %v1659_v6 = vsel %vm1652_vm7, %v1655_v26, %v1658_v52  ;;  %v1362_v59 = vpack.c.bf16 %v1258_v31, %v1258_v31  ;;  %vm1548_vm13 = vcmp.lt.s32.totalorder %v1547_v44, 2 }
 0x11e   : > { %v1660_v43 = vsel %vm1649_vm8, nan, %v1659_v6  ;;  %v4555_v45 = vpop.eup %4554  ;;  %vm1947_vm14 = vcmp.lt.s32.totalorder %v1946_v7, 2  ;;  %vm1848_vm2 = vcmp.eq.s32.totalorder %v1843_v38, 2  ;;  %vm1844_vm3 = vcmp.lt.s32.totalorder %v1843_v38, 2  ;;  %v4528_v38 = vld [vmem:[%s6045_s7] sm:$0xff]  }
 0x11f   : > { %v1019_v54 = vand.u32 %v5178_v17, %v995_v29  ;;  %v4557_v55 = vpop.eup %4556  ;;  %v1662_v13 = vpack.c.bf16 %v1660_v43, %v1660_v43  ;;  %v1553_v53 = vxor.u32 2147483648, %v4555_v45  ;;  %v1381_v19 = vand.u32 %v1362_v59, %v5178_v17  ;;  %v4522_v29 = vld [vmem:[%s6041_s29] sm:$0xff]  }
 0x120   : > { %v1550_v47 = vxor.u32 2147483648, %v4557_v55  ;;  %v1954_v48 = vsel %vm1947_vm14, %v1950_v28, %v1953_v20  ;;  %vm2131_vm4 = vcmask 261120  }
 0x121   : > { %1025 = vmatpush1.bf16.msra.mxu0 %v1019_v54  ;;  %v1683_v23 = vand.u32 %v1662_v13, %v5178_v17  ;;  %v1554_v25 = vsel %vm1552_vm10, %v1553_v53, %v4557_v55  ;;  %v1955_v9 = vsel %vm1649_vm8, nan, %v1954_v48  ;;  %v1850_v54 = vsel %vm1848_vm2, %v1553_v53, %v4557_v55 }
 0x122   : > { %1099 = vmatprep.subr.bf16.mxu0 %v1097_v51  ;;  %v1551_v24 = vsel %vm1549_vm9, %v4555_v45, %v1550_v47  ;;  %v1957_v12 = vpack.c.bf16 %v1955_v9, %v1955_v9  ;;  %v1847_v35 = vsel %vm1845_vm0, %v4555_v45, %v1550_v47 }
 0x123   : > { %v1555_v14 = vsel %vm1548_vm13, %v1551_v24, %v1554_v25  ;;  %v1851_v21 = vsel %vm1844_vm3, %v1847_v35, %v1850_v54 }
 0x124   : > { %4199 = vmatmul.mubr.msk.bf16.vlgmr.msra.gmra.mrb[0].mxu0 %vm1007_vm1, %v4518_v37  ;;  %v1556_v49 = vsel %vm1545_vm15, nan, %v1555_v14  ;;  %v1978_v42 = vand.u32 %v1957_v12, %v5178_v17  ;;  %v1852_v34 = vsel %vm1545_vm15, nan, %v1851_v21  ;;  %v4524_v37 = vld [vmem:[%s6042_s26] sm:$0xff]  }
 0x125   : > { %1100 = vmatpush1.bf16.msra.mxu0 %v1094_v50  ;;  %1066 = vmatprep.mubr.bf16.mxu0 %v4668_v18  ;;  %v1661_v39 = vpack.c.bf16 %v1556_v49, %v1556_v49  ;;  %v1956_v51 = vpack.c.bf16 %v1852_v34, %v1852_v34 }
 0x126   : > { %1386 = vmatprep.subr.bf16.mxu0 %v1384_v1 }
 0x127   : > { %v1680_v40 = vand.u32 %v1661_v39, %v5178_v17  ;;  %v1975_v41 = vand.u32 %v1956_v51, %v5178_v17 }
 0x12c   : > { %4200 = vmatmul.mubr.msk.bf16.gmra.mrb[4].mxu0 %vm1007_vm1, %v4519_v4 }
 0x12d   : > { %1131 = vmatprep.mubr.bf16.mxu0 %v4668_v18 }
 0x134   : > { %4203 = vmatmul.mubr.msk.bf16.vlgmr.msra.gmra.mrb[0].mxu0 %vm1007_vm1, %v4520_v15 }
 0x135   : > { %1387 = vmatpush1.bf16.msra.mxu0 %v1381_v19  ;;  %1141 = vmatprep.mubr.bf16.mxu0 %v4668_v18 }
 0x136   : > { %1685 = vmatprep.subr.bf16.mxu0 %v1683_v23 }
 0x13c   : > { %4204 = vmatmul.mubr.msk.bf16.gmra.mrb[4].mxu0 %vm1007_vm1, %v4521_v27 }
 0x13d   : > { %1418 = vmatprep.mubr.bf16.mxu0 %v4668_v18 }
 0x144   : > { %4215 = vmatmul.mubr.msk.bf16.vlgmr.msra.gmra.mrb[0].mxu0 %vm1007_vm1, %v4522_v29 }
 0x145   : > { %1686 = vmatpush1.bf16.msra.mxu0 %v1680_v40  ;;  %1428 = vmatprep.mubr.bf16.mxu0 %v4668_v18  ;;  %v4529_v40 = vld [vmem:[%s6045_s7 + $0x8] sm:$0xff]  }
 0x146   : > { %1980 = vmatprep.subr.bf16.mxu0 %v1978_v42 }
 0x14c   : > { %4216 = vmatmul.mubr.msk.bf16.gmra.mrb[4].mxu0 %vm1007_vm1, %v4523_v30 }
 0x14d   : > { %1717 = vmatprep.mubr.bf16.mxu0 %v4668_v18 }
 0x154   : > { %4227 = vmatmul.mubr.msk.bf16.vlgmr.msra.gmra.mrb[0].mxu0 %vm1007_vm1, %v4524_v37 }
 0x155   : > { %1981 = vmatpush1.bf16.msra.mxu0 %v1975_v41  ;;  %1727 = vmatprep.mubr.bf16.mxu0 %v4668_v18 }
 0x15c   : > { %4228 = vmatmul.mubr.msk.bf16.gmra.mrb[4].mxu0 %vm1007_vm1, %v4525_v58 }
 0x15d   : > { %2012 = vmatprep.mubr.bf16.mxu0 %v4668_v18 }
 0x164   : > { %4239 = vmatmul.mubr.msk.bf16.vlgmr.msra.gmra.mrb[0].mxu0 %vm1007_vm1, %v4526_v36 }
 0x165   : > { %2022 = vmatprep.mubr.bf16.mxu0 %v4668_v18 }
 0x166   : > { %v2048_v62 = vpop.permute.xlu0 %2047 }
 0x168   : > { %v2053_v50 = vpop.permute.xlu1 %2052 }
 0x16a   : > { %v2109_v21 = vpop.permute.xlu0 %2108 }
 0x16c   : > { %4240 = vmatmul.mubr.msk.bf16.gmra.mrb[4].mxu0 %vm1007_vm1, %v4527_v57  ;;  %v2058_v4 = vpop.permute.xlu1 %2057 }
 0x16d   : > { %3653 = vmatprep.mubr.bf16.mxu0 %v4668_v18 }
 0x170   : > { %v2063_v47 = vpop.permute.xlu1 %2062 }
 0x174   : > { %v2104_v42 = vpop.permute.xlu1 %2103 }
 0x237   : > { %v2014_v3 = vpop.f32.mrb[0].mxu0 }
 0x238   : > { %v2065_v56 = vadd.f32 %v2048_v62, %v2014_v3  ;;  %v2016_v1 = vpop.f32.mrb[1].mxu0 }
 0x239   : > { %v2066_v16 = vadd.f32 %v2048_v62, %v2016_v1  ;;  %v2018_v22 = vpop.f32.mrb[2].mxu0  ;;  %v2114_v1 = vpop.permute.xlu1 %2113 }
 0x23a   : > { %v2073_v26 = vmul.f32 0.01, %v2065_v56  ;;  %v2067_v52 = vadd.f32 %v2053_v50, %v2018_v22  ;;  %v2020_v46 = vpop.f32.mrb[3].mxu0 }
 0x23b   : > { %v2074_v60 = vmul.f32 0.01, %v2066_v16  ;;  %v2068_v6 = vadd.f32 %v2053_v50, %v2020_v46 }
 0x23c   : > { %v2075_v10 = vmul.f32 0.01, %v2067_v52  ;;  %v2081_v43 = vmax.f32 %v2065_v56, %v2073_v26 }
 0x23d   : > { %v2076_v31 = vmul.f32 0.01, %v2068_v6  ;;  %v2082_v55 = vmax.f32 %v2066_v16, %v2074_v60  ;;  %v2119_v60 = vpop.permute.xlu0 %2118 }
 0x23e   : > { %v2083_v0 = vmax.f32 %v2067_v52, %v2075_v10 }
 0x23f   : > { %v2024_v45 = vpop.f32.mrb[4].mxu0  ;;  %v2084_v59 = vmax.f32 %v2068_v6, %v2076_v31 }
 0x240   : > { %v2069_v15 = vadd.f32 %v2058_v4, %v2024_v45  ;;  %v2026_v13 = vpop.f32.mrb[5].mxu0  ;;  %v2097_v44 = vpack.c.bf16 %v2083_v0, %v2081_v43 }
 0x241   : > { %v2070_v53 = vadd.f32 %v2058_v4, %v2026_v13  ;;  %v2028_v7 = vpop.f32.mrb[6].mxu0  ;;  %v2098_v19 = vpack.c.bf16 %v2084_v59, %v2082_v55 }
 0x242   : > { %v2077_v23 = vmul.f32 0.01, %v2069_v15  ;;  %v2071_v24 = vadd.f32 %v2063_v47, %v2028_v7  ;;  %v2030_v25 = vpop.f32.mrb[7].mxu0 }
 0x243   : > { %v2078_v28 = vmul.f32 0.01, %v2070_v53  ;;  %v2072_v20 = vadd.f32 %v2063_v47, %v2030_v25  ;;  %2138 = vmatprep.subr.bf16.mxu1 %v2098_v19  ;;  %v2216_v25 = vpop.permute.xlu1 %2215 }
 0x244   : > { %v2079_v27 = vmul.f32 0.01, %v2071_v24  ;;  %2139 = vmatpush1.bf16.msra.mxu1 %v2097_v44  ;;  %v2085_v48 = vmax.f32 %v2069_v15, %v2077_v23 }
 0x245   : > { %v2080_v14 = vmul.f32 0.01, %v2072_v20  ;;  %v2086_v9 = vmax.f32 %v2070_v53, %v2078_v28 }
 0x246   : > { %v2087_v49 = vmax.f32 %v2071_v24, %v2079_v27  ;;  %v2208_v24 = vld [vmem:[%s6046_s9] sm:$0x3] }
 0x247   : > { %v2088_v39 = vmax.f32 %v2072_v20, %v2080_v14 }
 0x248   : > { %v2099_v29 = vpack.c.bf16 %v2087_v49, %v2085_v48 }
 0x249   : > { %v2100_v12 = vpack.c.bf16 %v2088_v39, %v2086_v9 }
 0x24b   : > { %2140 = vmatprep.subr.bf16.mxu1 %v2100_v12 }
 0x24c   : > { %2141 = vmatpush1.bf16.msra.mxu1 %v2099_v29 }
 0x24f   : > { %4243 = vmatmul.mubr.msk.bf16.vlgmr.msra.gmra.mrb[0].mxu1 %vm2131_vm4, %v4528_v38 }
 0x250   : > { %2180 = vmatprep.mubr.bf16.mxu1 %v4668_v18 }
 0x257   : > { %4244 = vmatmul.mubr.msk.bf16.gmra.mrb[4].mxu1 %vm2131_vm4, %v4529_v40 }
 0x258   : > { %2253 = vmatprep.mubr.bf16.mxu1 %v4668_v18 }
 0x322   : > { %v2172_v35 = vpop.f32.mrb[0].mxu1 }
 0x323   : > { %v2173_v54 = vadd.f32 %v2172_v35, %v2104_v42  ;;  %v2174_v30 = vpop.f32.mrb[1].mxu1 }
 0x324   : > { %v2175_v34 = vadd.f32 %v2174_v30, %v2104_v42  ;;  %v2176_v51 = vpop.f32.mrb[2].mxu1 }
 0x325   : > { %v2191_v37 = vmul.f32 0.01, %v2173_v54  ;;  %v2177_v41 = vadd.f32 %v2176_v51, %v2109_v21  ;;  %v2178_v58 = vpop.f32.mrb[3].mxu1 }
 0x326   : > { %v2192_v36 = vmul.f32 0.01, %v2175_v34  ;;  %v2179_v57 = vadd.f32 %v2178_v58, %v2109_v21 }
 0x327   : > { %v2193_v50 = vmul.f32 0.01, %v2177_v41  ;;  %v2199_v3 = vmax.f32 %v2173_v54, %v2191_v37 }
 0x328   : > { %v2194_v62 = vmul.f32 0.01, %v2179_v57  ;;  %v2200_v16 = vmax.f32 %v2175_v34, %v2192_v36 }
 0x329   : > { %v2201_v56 = vmax.f32 %v2177_v41, %v2193_v50 }
 0x32a   : > { %v2202_v22 = vmax.f32 %v2179_v57, %v2194_v62  ;;  %v2182_v26 = vpop.f32.mrb[4].mxu1 }
 0x32b   : > { %v2209_v52 = vpack.c.bf16 %v2201_v56, %v2199_v3  ;;  %v2183_v46 = vadd.f32 %v2182_v26, %v2114_v1  ;;  %v2184_v4 = vpop.f32.mrb[5].mxu1 }
 0x32c   : > { %v2185_v6 = vadd.f32 %v2184_v4, %v2114_v1  ;;  %v2186_v10 = vpop.f32.mrb[6].mxu1  ;;  %v2210_v31 = vpack.c.bf16 %v2202_v22, %v2200_v16 }
 0x32d   : > { %v2195_v43 = vmul.f32 0.01, %v2183_v46  ;;  %v2187_v0 = vadd.f32 %v2186_v10, %v2119_v60  ;;  %v2188_v45 = vpop.f32.mrb[7].mxu1 }
 0x32e   : > { %v2196_v55 = vmul.f32 0.01, %v2185_v6  ;;  %v2189_v59 = vadd.f32 %v2188_v45, %v2119_v60  ;;  %2221 = vmatprep.subr.bf16.mxu1 %v2210_v31 }
 0x32f   : > { %v2197_v15 = vmul.f32 0.01, %v2187_v0  ;;  %2222 = vmatpush1.bf16.msra.mxu1 %v2209_v52  ;;  %v2203_v44 = vmax.f32 %v2183_v46, %v2195_v43 }
 0x330   : > { %v2198_v13 = vmul.f32 0.01, %v2189_v59  ;;  %v2204_v53 = vmax.f32 %v2185_v6, %v2196_v55 }
 0x331   : > { %v2205_v47 = vmax.f32 %v2187_v0, %v2197_v15 }
 0x332   : > { %v2206_v7 = vmax.f32 %v2189_v59, %v2198_v13 }
 0x333   : > { %v2211_v19 = vpack.c.bf16 %v2205_v47, %v2203_v44 }
 0x334   : > { %v2212_v23 = vpack.c.bf16 %v2206_v7, %v2204_v53 }
 0x336   : > { %2223 = vmatprep.subr.bf16.mxu1 %v2212_v23 }
 0x337   : > { %2224 = vmatpush1.bf16.msra.mxu1 %v2211_v19 }
 0x33a   : > { %4245 = vmatmul.mubr.msk.bf16.vlgmr.msra.gmra.mrb[8].mxu1 %vm2131_vm4, %v2208_v24 }
 0x33b   : > { %2540 = vmatprep.mubr.bf16.mxu1 %v4668_v18 }
 0x40d   : > { %v2255_v28 = vpop.f32.mrb[8].mxu1 }
 0x40e   : > { %v2256_v20 = vadd.f32 %v2255_v28, %v2216_v25  ;;  %v2257_v27 = vpop.f32.mrb[9].mxu1 }
 0x40f   : > { %v2258_v14 = vadd.f32 %v2257_v27, %v2216_v25  ;;  %v2259_v48 = vpop.f32.mrb[10].mxu1 }
 0x410   : > { %v5351_v49 = vadd.f32 %v2256_v20, %v4853_v33  ;;  %v2260_v9 = vpop.f32.mrb[11].mxu1 }
 0x411   : > { %v5354_v39 = vadd.f32 %v2258_v14, %v4851_v32 }
 0x412   : > { %v5357_v29 = vmul.f32 3.1415927, %v5351_v49  ;;  %v5360_v12 = vmul.f32 6.2831855, %v5351_v49 }
 0x413   : > { %v5363_v38 = vmul.f32 3.1415927, %v5354_v39  ;;  %v5366_v40 = vmul.f32 6.2831855, %v5354_v39 }
 0x414   : > { %v2279_v42 = vand.u32 2139095040, %v5357_v29  ;;  %v2940_v33 = vand.u32 2139095040, %v5360_v12  ;;  %v2276_v58 = vand.u32 2147483647, %v5357_v29 }
 0x415   : > { %v2383_v35 = vand.u32 2139095040, %v5363_v38  ;;  %v3044_v32 = vand.u32 2139095040, %v5366_v40  ;;  %v2380_v41 = vand.u32 2147483647, %v5363_v38 }
 0x416   : > { %v2280_v54 = vshrl.u32 %v2279_v42, 23  ;;  %v2941_v30 = vshrl.u32 %v2940_v33, 23  ;;  %v2283_v16 = vand.u32 8388607, %v2276_v58 }
 0x417   : > { %v2384_v21 = vshrl.u32 %v2383_v35, 23  ;;  %v3045_v34 = vshrl.u32 %v3044_v32, 23  ;;  %v2387_v1 = vand.u32 8388607, %v2380_v41 }
 0x418   : > { %v4246_v51 = vadd.s32 4294967169, %v2280_v54  ;;  %v4274_v37 = vadd.s32 4294967169, %v2941_v30  ;;  %v2284_v60 = vor.u32 8388608, %v2283_v16 }
 0x419   : > { %v4250_v36 = vadd.s32 4294967169, %v2384_v21  ;;  %v4278_v57 = vadd.s32 4294967169, %v3045_v34  ;;  %v2388_v4 = vor.u32 8388608, %v2387_v1 }
 0x41a   : > { %v2286_v50 = vadd.s32 1, %v4246_v51  ;;  %v2947_v62 = vadd.s32 1, %v4274_v37  ;;  %v5393_v59 = vshll.u32 %v2284_v60, 8 }
 0x41b   : > { %v2390_v3 = vadd.s32 1, %v4250_v36  ;;  %v3051_v56 = vadd.s32 1, %v4278_v57  ;;  %v5391_v55 = vshll.u32 %v2388_v4, 8 }
 0x41c   : > { %vm2287_vm5 = vcmp.gt.s32.totalorder %v2286_v50, 0  ;;  %vm2948_vm7 = vcmp.gt.s32.totalorder %v2947_v62, 0 }
 0x41d   : > { %v2288_v22 = vsel %vm2287_vm5, %v2286_v50, 0  ;;  %vm2391_vm6 = vcmp.gt.s32.totalorder %v2390_v3, 0  ;;  %vm3052_vm8 = vcmp.gt.s32.totalorder %v3051_v56, 0  ;;  %v5383_v6 = vsel %vm2948_vm7, %v2947_v62, 0 }
 0x41e   : > { %v5378_v26 = vand.u32 31, %v2288_v22  ;;  %v2392_v52 = vsel %vm2391_vm6, %v2390_v3, 0  ;;  %v5385_v31 = vshrl.u32 %v2288_v22, 5  ;;  %v5389_v0 = vsel %vm3052_vm8, %v3051_v56, 0 }
 0x41f   : > { %v2394_v10 = vand.u32 31, %v2392_v52  ;;  %v5402_v47 = vand.u32 31, %v5383_v6  ;;  %v2393_v53 = vshrl.u32 %v2392_v52, 5  ;;  %v5405_v7 = vand.u32 31, %v5389_v0 }
 0x420   : > { %v5381_v46 = vsub.s32 32, %v5378_v26  ;;  %v2302_v15 = vshll.u32 %v4665_v5, %v5378_v26  ;;  %v2305_v13 = vshll.u32 %v4666_v8, %v5378_v26  ;;  %vm2311_vm9 = vcmp.lt.s32.totalorder %v5385_v31, 4 }
 0x421   : > { %v2395_v45 = vsub.s32 32, %v2394_v10  ;;  %v2397_v19 = vshll.u32 %v4662_v61, %v2394_v10  ;;  %v2400_v25 = vshll.u32 %v4663_v63, %v2394_v10  ;;  %v2403_v20 = vshll.u32 %v4664_v2, %v2394_v10 }
 0x422   : > { %v2303_v43 = vshrl.u32 %v4666_v8, %v5381_v46  ;;  %v2306_v44 = vshrl.u32 %v4667_v11, %v5381_v46  ;;  %v2406_v48 = vshll.u32 %v4665_v5, %v2394_v10  ;;  %v2409_v35 = vshll.u32 %v4666_v8, %v2394_v10 }
 0x423   : > { %v2398_v23 = vshrl.u32 %v4663_v63, %v2395_v45  ;;  %v2401_v28 = vshrl.u32 %v4664_v2, %v2395_v45  ;;  %v2404_v14 = vshrl.u32 %v4665_v5, %v2395_v45  ;;  %v2407_v9 = vshrl.u32 %v4666_v8, %v2395_v45 }
 0x424   : > { %v2304_v24 = vor.u32 %v2303_v43, %v2302_v15  ;;  %v2307_v42 = vor.u32 %v2306_v44, %v2305_v13  ;;  %v2410_v32 = vshrl.u32 %v4667_v11, %v2395_v45  ;;  %v2396_v54 = vshrl.u32 %v4662_v61, %v2395_v45 }
 0x425   : > { %v2399_v27 = vor.u32 %v2398_v23, %v2397_v19  ;;  %v2402_v33 = vor.u32 %v2401_v28, %v2400_v25  ;;  %v2405_v30 = vor.u32 %v2404_v14, %v2403_v20  ;;  %v2408_v21 = vor.u32 %v2407_v9, %v2406_v48 }
 0x426   : > { %vm2412_vm10 = vcmp.lt.s32.totalorder %v2393_v53, 1  ;;  %v2411_v34 = vor.u32 %v2410_v32, %v2409_v35  ;;  %vm2414_vm11 = vcmp.lt.s32.totalorder %v2393_v53, 3  ;;  %vm2415_vm12 = vcmp.lt.s32.totalorder %v2393_v53, 4 }
 0x427   : > { %v2420_v51 = vsel %vm2412_vm10, %v2399_v27, %v2402_v33  ;;  %v2416_v37 = vsel %vm2412_vm10, %v2396_v54, %v2399_v27  ;;  %v2417_v36 = vsel %vm2415_vm12, %v2405_v30, 2102212464  ;;  %v2421_v57 = vsel %vm2415_vm12, %v2408_v21, 920167782 }
 0x428   : > { %v2424_v50 = vsel %vm2412_vm10, %v2402_v33, %v2405_v30  ;;  %vm2413_vm13 = vcmp.lt.s32.totalorder %v2393_v53, 2  ;;  %v2418_v62 = vsel %vm2414_vm11, %v2402_v33, %v2417_v36  ;;  %v2422_v3 = vsel %vm2414_vm11, %v2405_v30, %v2421_v57 }
 0x429   : > { %v2425_v56 = vsel %vm2415_vm12, %v2411_v34, 1326507024  ;;  %v2423_v1 = vsel %vm2413_vm13, %v2420_v51, %v2422_v3  ;;  %v2293_v22 = vshll.u32 %v4662_v61, %v5378_v26  ;;  %v2294_v52 = vshrl.u32 %v4663_v63, %v5381_v46 }
 0x42a   : > { %v2426_v16 = vsel %vm2414_vm11, %v2408_v21, %v2425_v56  ;;  %v2419_v4 = vsel %vm2413_vm13, %v2416_v37, %v2418_v62  ;;  %v5424_v10 = vmul.u32.u64.low %v5391_v55, %v2423_v1  ;;  %v5425_v43 = vmul.u32.u64.high %v5391_v55, %v2423_v1, %v5424_v10 }
 0x42b   : > { %v2427_v60 = vsel %vm2413_vm13, %v2424_v50, %v2426_v16  ;;  %v2321_v45 = vsel %vm2311_vm9, %v2307_v42, 1326507024  ;;  %v2295_v44 = vor.u32 %v2294_v52, %v2293_v22  ;;  %v2296_v53 = vshll.u32 %v4663_v63, %v5378_v26 }
 0x42c   : > { %v5431_v15 = vmul.u32.u64.low %v5391_v55, %v2427_v60  ;;  %v5432_v13 = vmul.u32.u64.high %v5391_v55, %v2427_v60, %v5431_v15  ;;  %v2297_v19 = vshrl.u32 %v4664_v2, %v5381_v46  ;;  %v2299_v23 = vshll.u32 %v4664_v2, %v5378_v26 }
 0x42d   : > { %v2300_v25 = vshrl.u32 %v4665_v5, %v5381_v46  ;;  %v2317_v28 = vsel %vm2311_vm9, %v2304_v24, 920167782  ;;  %v2435_v20 = vmul.u32 %v5391_v55, %v2419_v4  ;;  %v2292_v27 = vshrl.u32 %v4662_v61, %v5381_v46 }
 0x42e   : > { %vm2308_vm14 = vcmp.lt.s32.totalorder %v5385_v31, 1  ;;  %v2438_v14 = vadd.s32 1, %v5425_v43  ;;  %v2298_v48 = vor.u32 %v2297_v19, %v2296_v53  ;;  %vm2310_vm15 = vcmp.lt.s32.totalorder %v5385_v31, 3 }
 0x42f   : > { %v2301_v9 = vor.u32 %v2300_v25, %v2299_v23  ;;  %vm2437_vm0 = vc.u32 %v5432_v13, %v5424_v10  ;;  %vm2309_vm2 = vcmp.lt.s32.totalorder %v5385_v31, 2  ;;  %v2312_v26 = vsel %vm2308_vm14, %v2292_v27, %v2295_v44 }
 0x430   : > { %v2322_v55 = vsel %vm2310_vm15, %v2304_v24, %v2321_v45  ;;  %v2439_v42 = vsel %vm2437_vm0, %v2438_v14, %v5425_v43  ;;  %v2316_v33 = vsel %vm2308_vm14, %v2295_v44, %v2298_v48  ;;  %v3056_v50 = vsub.s32 32, %v5405_v7 }
 0x431   : > { %v2313_v46 = vsel %vm2311_vm9, %v2301_v9, 2102212464  ;;  %v2318_v35 = vsel %vm2310_vm15, %v2301_v9, %v2317_v28  ;;  %v2440_v32 = vadd.s32 %v2439_v42, %v2435_v20  ;;  %v2320_v21 = vsel %vm2308_vm14, %v2298_v48, %v2301_v9 }
 0x432   : > { %v2314_v54 = vsel %vm2310_vm15, %v2298_v48, %v2313_v46  ;;  %v2319_v30 = vsel %vm2309_vm2, %v2316_v33, %v2318_v35  ;;  %v2323_v24 = vsel %vm2309_vm2, %v2320_v21, %v2322_v55  ;;  %v3041_v3 = vand.u32 2147483647, %v5366_v40 }
 0x433   : > { %v5467_v34 = vmul.u32.u64.low %v5393_v59, %v2319_v30  ;;  %v5468_v51 = vmul.u32.u64.high %v5393_v59, %v2319_v30, %v5467_v34  ;;  %v2441_v37 = vadd.s32 536870912, %v2440_v32  ;;  %v2315_v62 = vsel %vm2309_vm2, %v2312_v26, %v2314_v54 }
 0x434   : > { %v5472_v36 = vmul.u32.u64.low %v5393_v59, %v2323_v24  ;;  %v5473_v57 = vmul.u32.u64.high %v5393_v59, %v2323_v24, %v5472_v36  ;;  %v5480_v56 = vsub.s32 32, %v5402_v47  ;;  %v2331_v52 = vmul.u32 %v5393_v59, %v2315_v62 }
 0x435   : > { %v5482_v1 = vshrl.u32 %v2441_v37, 30  ;;  %v2334_v16 = vadd.s32 1, %v5468_v51  ;;  %v5490_v4 = vshrl.u32 %v5383_v6, 5  ;;  %v5495_v60 = vand.u32 8388607, %v3041_v3 }
 0x436   : > { %vm2333_vm3 = vc.u32 %v5473_v57, %v5467_v34  ;;  %v3068_v43 = vshrl.u32 %v4666_v8, %v3056_v50  ;;  %v2964_v45 = vshrl.u32 %v4666_v8, %v5480_v56  ;;  %v3071_v44 = vshrl.u32 %v4667_v11, %v3056_v50 }
 0x437   : > { %v2443_v22 = vshll.u32 %v5482_v1, 30  ;;  %v2335_v31 = vsel %vm2333_vm3, %v2334_v16, %v5468_v51  ;;  %v3059_v53 = vshrl.u32 %v4663_v63, %v3056_v50  ;;  %v3062_v6 = vshrl.u32 %v4664_v2, %v3056_v50 }
 0x438   : > { %v2336_v59 = vadd.s32 %v2335_v31, %v2331_v52  ;;  %v3065_v19 = vshrl.u32 %v4665_v5, %v3056_v50  ;;  %v3067_v23 = vshll.u32 %v4665_v5, %v5405_v7  ;;  %v3054_v25 = vshrl.u32 %v5389_v0, 5 }
 0x439   : > { %v5500_v15 = vsub.s32 %v2440_v32, %v2443_v22  ;;  %v3070_v27 = vshll.u32 %v4666_v8, %v5405_v7  ;;  %v3058_v14 = vshll.u32 %v4662_v61, %v5405_v7  ;;  %v3061_v48 = vshll.u32 %v4663_v63, %v5405_v7 }
 0x43a   : > { %v2337_v20 = vadd.s32 536870912, %v2336_v59  ;;  %v3064_v9 = vshll.u32 %v4664_v2, %v5405_v7  ;;  %v3069_v26 = vor.u32 %v3068_v43, %v3067_v23  ;;  %v2963_v55 = vshll.u32 %v4665_v5, %v5402_v47 }
 0x43b   : > { %v2446_v28 = vsub.s32 0, %v5500_v15  ;;  %v3072_v46 = vor.u32 %v3071_v44, %v3070_v27  ;;  %v2966_v33 = vshll.u32 %v4666_v8, %v5402_v47  ;;  %v3060_v35 = vor.u32 %v3059_v53, %v3058_v14 }
 0x43c   : > { %v5521_v42 = vshrl.u32 %v2337_v20, 30  ;;  %v3063_v32 = vor.u32 %v3062_v6, %v3061_v48  ;;  %v3066_v54 = vor.u32 %v3065_v19, %v3064_v9  ;;  %v5525_v30 = vor.u32 %v2964_v45, %v2963_v55 }
 0x43d   : > { %v4251_v0 = vmin.u32 %v2446_v28, %v5500_v15  ;;  %v2967_v7 = vshrl.u32 %v4667_v11, %v5480_v56  ;;  %vm2382_vm5 = vcmp.lt.s32.totalorder %v5363_v38, 0  ;;  %vm3076_vm6 = vcmp.lt.s32.totalorder %v3054_v25, 4 }
 0x43e   : > { %v2436_v24 = vadd.s32 %v5424_v10, %v5432_v13  ;;  %v2339_v51 = vshll.u32 %v5521_v42, 30  ;;  %v3049_v37 = vor.u32 8388608, %v5495_v60  ;;  %v3082_v8 = vsel %vm3076_vm6, %v3069_v26, 920167782 }
 0x43f   : > { %v2448_v21 = vclz %v4251_v0  ;;  %v3057_v62 = vshrl.u32 %v4662_v61, %v3056_v50  ;;  %vm3073_vm7 = vcmp.lt.s32.totalorder %v3054_v25, 1  ;;  %v3086_v16 = vsel %vm3076_vm6, %v3072_v46, 1326507024 }
 0x440   : > { %v5535_v22 = vsub.s32 %v2336_v59, %v2339_v51  ;;  %vm3075_vm8 = vcmp.lt.s32.totalorder %v3054_v25, 3  ;;  %v3078_v11 = vsel %vm3076_vm6, %v3066_v54, 2102212464  ;;  %v3081_v52 = vsel %vm3073_vm7, %v3060_v35, %v3063_v32 }
 0x441   : > { %v4252_v36 = vadd.s32 4294967294, %v2448_v21  ;;  %vm5540_vm9 = vcmp.le.f32.partialorder %v2380_v41, 0.7853982  ;;  %v3083_v13 = vsel %vm3075_vm8, %v3066_v54, %v3082_v8  ;;  %v3085_v31 = vsel %vm3073_vm7, %v3063_v32, %v3066_v54 }
 0x442   : > { %v3087_v60 = vsel %vm3075_vm8, %v3069_v26, %v3086_v16  ;;  %v2466_v43 = vsub.s32 4, %v5482_v1  ;;  %v2342_v45 = vsub.s32 0, %v5535_v22  ;;  %vm3074_vm11 = vcmp.lt.s32.totalorder %v3054_v25, 2 }
 0x443   : > { %vm4253_vm10 = vcmp.lt.s32.totalorder %v4252_v36, 0  ;;  %v3077_v53 = vsel %vm3073_vm7, %v3057_v62, %v3060_v35  ;;  %v3079_v6 = vsel %vm3075_vm8, %v3063_v32, %v3078_v11  ;;  %v2968_v41 = vor.u32 %v2967_v7, %v2966_v33 }
 0x444   : > { %v2451_v50 = vsel %vm4253_vm10, 0, %v4252_v36  ;;  %v4247_v19 = vmin.u32 %v2342_v45, %v5535_v22  ;;  %v3084_v23 = vsel %vm3074_vm11, %v3081_v52, %v3083_v13  ;;  %v3088_v28 = vsel %vm3074_vm11, %v3085_v31, %v3087_v60 }
 0x445   : > { %v2452_v59 = vsub.s32 32, %v2451_v50  ;;  %v2456_v44 = vsub.s32 4294967266, %v2451_v50  ;;  %v2453_v20 = vshll.u32 %v5500_v15, %v2451_v50  ;;  %v3089_v48 = vshll.u32 %v3049_v37, 8 }
 0x446   : > { %v2467_v9 = vsel %vm2382_vm5, %v2466_v43, %v5482_v1  ;;  %v2344_v26 = vclz %v4247_v19  ;;  %v3080_v55 = vsel %vm3074_vm11, %v3077_v53, %v3079_v6  ;;  %v2937_v25 = vand.u32 2147483647, %v5360_v12 }
 0x447   : > { %v2454_v27 = vshrl.u32 %v2436_v24, %v2452_v59  ;;  %v2457_v14 = vadd.s32 127, %v2456_v44  ;;  %v5554_v33 = vmul.u32.u64.low %v3089_v48, %v3088_v28  ;;  %v5555_v35 = vmul.u32.u64.high %v3089_v48, %v3088_v28, %v5554_v33 }
 0x448   : > { %vm2972_vm12 = vcmp.lt.s32.totalorder %v5490_v4, 4  ;;  %v4248_v32 = vadd.s32 4294967294, %v2344_v26  ;;  %v5558_v15 = vmul.u32.u64.low %v3089_v48, %v3084_v23  ;;  %v5559_v54 = vmul.u32.u64.high %v3089_v48, %v3084_v23, %v5558_v15 }
 0x449   : > { %v2455_v0 = vor.u32 %v2454_v27, %v2453_v20  ;;  %v2458_v46 = vshll.u32 %v2457_v14, 23  ;;  %v2978_v1 = vsel %vm2972_vm12, %v5525_v30, 920167782  ;;  %v2982_v7 = vsel %vm2972_vm12, %v2968_v41, 1326507024 }
 0x44a   : > { %v2332_v24 = vadd.s32 %v5467_v34, %v5473_v57  ;;  %v5571_v37 = vsel %vm5540_vm9, 0, %v2467_v9  ;;  %vm4249_vm13 = vcmp.lt.s32.totalorder %v4248_v32, 0  ;;  %v3096_v8 = vmul.u32 %v3089_v48, %v3080_v55 }
 0x44b   : > { %v2459_v21 = vor.u32 4788187, %v2458_v46  ;;  %v2462_v51 = vcvt.s32.f32 %v2455_v0  ;;  %v2347_v62 = vsel %vm4249_vm13, 0, %v4248_v32  ;;  %vm3098_vm14 = vc.u32 %v5555_v35, %v5558_v15 }
 0x44c   : > { %v2944_v16 = vand.u32 8388607, %v2937_v25  ;;  %v2348_v11 = vsub.s32 32, %v2347_v62  ;;  %v2352_v52 = vsub.s32 4294967266, %v2347_v62  ;;  %v3099_v13 = vadd.s32 1, %v5559_v54 }
 0x44d   : > { %v2460_v36 = vand.u32 2147483647, %v2459_v21  ;;  %v2955_v34 = vshrl.u32 %v4663_v63, %v5480_v56  ;;  %v2349_v31 = vshll.u32 %v5535_v22, %v2347_v62  ;;  %v2954_v60 = vshll.u32 %v4662_v61, %v5402_v47 }
 0x44e   : > { %v2957_v50 = vshll.u32 %v4663_v63, %v5402_v47  ;;  %v2350_v43 = vshrl.u32 %v2332_v24, %v2348_v11  ;;  %v2353_v45 = vadd.s32 127, %v2352_v52  ;;  %v3100_v59 = vsel %vm3098_vm14, %v3099_v13, %v5559_v54 }
 0x44f   : > { %v2463_v57 = vmul.f32 %v2462_v51, %v2460_v36  ;;  %v2958_v44 = vshrl.u32 %v4664_v2, %v5480_v56  ;;  %vm2278_vm15 = vcmp.lt.s32.totalorder %v5357_v29, 0  ;;  %v3101_v6 = vadd.s32 %v3100_v59, %v3096_v8 }
 0x450   : > { %v2960_v22 = vshll.u32 %v4664_v2, %v5402_v47  ;;  %v2961_v41 = vshrl.u32 %v4665_v5, %v5480_v56  ;;  %v2351_v19 = vor.u32 %v2350_v43, %v2349_v31  ;;  %v2354_v23 = vshll.u32 %v2353_v45, 23 }
 0x451   : > { %v2464_v53 = vxor.u32 2147483648, %v2463_v57  ;;  %v2956_v63 = vor.u32 %v2955_v34, %v2954_v60  ;;  %v2959_v28 = vor.u32 %v2958_v44, %v2957_v50  ;;  %v2473_v27 = vadd.s32 3, %v5571_v37 }
 0x452   : > { %v3102_v14 = vadd.s32 536870912, %v3101_v6  ;;  %v2962_v48 = vor.u32 %v2961_v41, %v2960_v22  ;;  %v2355_v26 = vor.u32 4788187, %v2354_v23  ;;  %v2362_v2 = vsub.s32 4, %v5521_v42 }
 0x453   : > { %v2465_v20 = vsel %vm2382_vm5, %v2464_v53, %v2463_v57  ;;  %v2945_v47 = vor.u32 8388608, %v2944_v16  ;;  %v2358_v5 = vcvt.s32.f32 %v2351_v19  ;;  %vm2969_vm0 = vcmp.lt.s32.totalorder %v5490_v4, 1 }
 0x454   : > { %v2468_v9 = vsel %vm5540_vm9, %v5363_v38, %v2465_v20  ;;  %v5600_v55 = vshrl.u32 %v3102_v14, 30  ;;  %v2356_v0 = vand.u32 2147483647, %v2355_v26  ;;  %vm2971_vm2 = vcmp.lt.s32.totalorder %v5490_v4, 3 }
 0x455   : > { %4558 = vcosq.f32 %v2468_v9  ;;  %v2977_v46 = vsel %vm2969_vm0, %v2956_v63, %v2959_v28  ;;  %v2953_v33 = vshrl.u32 %v4662_v61, %v5480_v56  ;;  %vm2970_vm3 = vcmp.lt.s32.totalorder %v5490_v4, 2 }
 0x456   : > { %4560 = vsinq.f32 %v2468_v9  ;;  %v3104_v10 = vshll.u32 %v5600_v55, 30  ;;  %v2979_v32 = vsel %vm2971_vm2, %v2962_v48, %v2978_v1  ;;  %v2359_v54 = vmul.f32 %v2358_v5, %v2356_v0 }
 0x457   : > { %v2974_v21 = vsel %vm2972_vm12, %v2962_v48, 2102212464  ;;  %v2981_v24 = vsel %vm2969_vm0, %v2959_v28, %v2962_v48  ;;  %v2983_v51 = vsel %vm2971_vm2, %v5525_v30, %v2982_v7  ;;  %v2980_v61 = vsel %vm2970_vm3, %v2977_v46, %v2979_v32 }
 0x458   : > { %v5619_v8 = vsub.s32 %v3101_v6, %v3104_v10  ;;  %v2984_v56 = vsel %vm2970_vm3, %v2981_v24, %v2983_v51  ;;  %v2985_v1 = vshll.u32 %v2945_v47, 8  ;;  %v2474_v36 = vand.u32 3, %v2473_v27 }
 0x459   : > { %vm2277_vm5 = vcmp.le.f32.partialorder %v2276_v58, 0.7853982  ;;  %v2360_v62 = vxor.u32 2147483648, %v2359_v54  ;;  %v2363_v16 = vsel %vm2278_vm15, %v2362_v2, %v5521_v42  ;;  %v2973_v7 = vsel %vm2969_vm0, %v2953_v33, %v2956_v63 }
 0x45a   : > { %v3107_v30 = vsub.s32 0, %v5619_v8  ;;  %v5633_v11 = vmul.u32.u64.low %v2985_v1, %v2984_v56  ;;  %v5634_v52 = vmul.u32.u64.high %v2985_v1, %v2984_v56, %v5633_v11  ;;  %v2975_v34 = vsel %vm2971_vm2, %v2959_v28, %v2974_v21 }
 0x45b   : > { %v2361_v13 = vsel %vm2278_vm15, %v2360_v62, %v2359_v54  ;;  %v5640_v58 = vmul.u32.u64.low %v2985_v1, %v2980_v61  ;;  %v5641_v57 = vmul.u32.u64.high %v2985_v1, %v2980_v61, %v5640_v58  ;;  %v5646_v60 = vsel %vm2277_vm5, 0, %v2363_v16 }
 0x45c   : > { %v2364_v42 = vsel %vm2277_vm5, %v5357_v29, %v2361_v13  ;;  %v4279_v31 = vmin.u32 %v3107_v30, %v5619_v8  ;;  %v2976_v45 = vsel %vm2970_vm3, %v2973_v7, %v2975_v34  ;;  %vm2479_vm6 = vcmp.eq.s32.totalorder %v2474_v36, 2 }
 0x45d   : > { %4562 = vcosq.f32 %v2364_v42  ;;  %vm2994_vm7 = vc.u32 %v5634_v52, %v5640_v58  ;;  %v2369_v6 = vadd.s32 3, %v5646_v60  ;;  %v2995_v41 = vadd.s32 1, %v5641_v57 }
 0x45e   : > { %4564 = vsinq.f32 %v2364_v42  ;;  %v3109_v43 = vclz %v4279_v31  ;;  %vm2476_vm8 = vcmp.eq.s32.totalorder %v2474_v36, 0  ;;  %v2836_v23 = vand.u32 3, %v5571_v37 }
 0x45f   : > { %v4559_v50 = vpop.eup %4558  ;;  %v2992_v63 = vmul.u32 %v2985_v1, %v2976_v45  ;;  %vm2475_vm9 = vcmp.lt.s32.totalorder %v2474_v36, 2  ;;  %v2996_v28 = vsel %vm2994_vm7, %v2995_v41, %v5641_v57  ;;  %vm2472_vm11 = vweird.f32 %v5363_v38  ;;  %v4530_v41 = vld [vmem:[%s6049_s11] sm:$0xff]  }
 0x460   : > { %v4561_v59 = vpop.eup %4560  ;;  %v2480_v44 = vxor.u32 2147483648, %v4559_v50  ;;  %v4280_v22 = vadd.s32 4294967294, %v3109_v43  ;;  %v2370_v9 = vand.u32 3, %v2369_v6  ;;  %v3097_v26 = vadd.s32 %v5558_v15, %v5555_v35 }
 0x461   : > { %v2477_v53 = vxor.u32 2147483648, %v4561_v59  ;;  %v2997_v14 = vadd.s32 %v2996_v28, %v2992_v63  ;;  %vm2838_vm12 = vcmp.eq.s32.totalorder %v2836_v23, 0  ;;  %vm2841_vm13 = vcmp.eq.s32.totalorder %v2836_v23, 2 }
 0x462   : > { %v2481_v19 = vsel %vm2479_vm6, %v2480_v44, %v4561_v59  ;;  %vm4281_vm10 = vcmp.lt.s32.totalorder %v4280_v22, 0  ;;  %vm2375_vm14 = vcmp.eq.s32.totalorder %v2370_v9, 2  ;;  %v2843_v24 = vsel %vm2841_vm13, %v2480_v44, %v4561_v59 }
 0x463   : > { %v2478_v4 = vsel %vm2476_vm8, %v4559_v50, %v2477_v53  ;;  %v3112_v27 = vsel %vm4281_vm10, 0, %v4280_v22  ;;  %v2998_v5 = vadd.s32 536870912, %v2997_v14  ;;  %v2840_v15 = vsel %vm2838_vm12, %v4559_v50, %v2477_v53 }
 0x464   : > { %v2482_v20 = vsel %vm2475_vm9, %v2478_v4, %v2481_v19  ;;  %v3113_v2 = vsub.s32 32, %v3112_v27  ;;  %v3117_v47 = vsub.s32 4294967266, %v3112_v27  ;;  %v3114_v33 = vshll.u32 %v5619_v8, %v3112_v27 }
 0x465   : > { %v2483_v48 = vsel %vm2472_vm11, nan, %v2482_v20  ;;  %v5665_v54 = vshrl.u32 %v2998_v5, 30  ;;  %vm2371_vm15 = vcmp.lt.s32.totalorder %v2370_v9, 2  ;;  %vm2372_vm0 = vcmp.eq.s32.totalorder %v2370_v9, 0 }
 0x466   : > { %v2485_v37 = vpack.c.bf16 %v2483_v48, %v2483_v48  ;;  %v3115_v0 = vshrl.u32 %v3097_v26, %v3113_v2  ;;  %v3118_v32 = vadd.s32 127, %v3117_v47  ;;  %vm2837_vm2 = vcmp.lt.s32.totalorder %v2836_v23, 2 }
 0x467   : > { %v5661_v46 = vpop.eup %4562  ;;  %v3000_v1 = vshll.u32 %v5665_v54, 30  ;;  %v2844_v62 = vsel %vm2837_vm2, %v2840_v15, %v2843_v24  ;;  %vm2368_vm3 = vweird.f32 %v5357_v29  ;;  %v2269_v11 = vpack.c.bf16 %v5354_v39, %v5354_v39 }
 0x468   : > { %v2506_v10 = vand.u32 %v2485_v37, %v5178_v17  ;;  %v4565_v21 = vpop.eup %4564  ;;  %v2376_v35 = vxor.u32 2147483648, %v5661_v46  ;;  %v3116_v61 = vor.u32 %v3115_v0, %v3114_v33  ;;  %v3119_v56 = vshll.u32 %v3118_v32, 23  ;;  %v4531_v37 = vld [vmem:[%s6049_s11 + $0x8] sm:$0xff]  }
 0x469   : > { %v2373_v51 = vxor.u32 2147483648, %v4565_v21  ;;  %v3001_v30 = vsub.s32 %v2997_v14, %v3000_v1  ;;  %v2845_v50 = vsel %vm2472_vm11, nan, %v2844_v62  ;;  %v3127_v45 = vsub.s32 4, %v5600_v55  ;;  %v4532_v1 = vld [vmem:[%s6002_s15] sm:$0xff]  }
 0x46a   : > { %2508 = vmatprep.subr.bf16.mxu1 %v2506_v10  ;;  %v2377_v36 = vsel %vm2375_vm14, %v2376_v35, %v4565_v21  ;;  %v3120_v16 = vor.u32 4788187, %v3119_v56  ;;  %v3123_v57 = vcvt.s32.f32 %v3116_v61  ;;  %v2268_v53 = vpack.c.bf16 %v5351_v49, %v5351_v49 }
 0x46b   : > { %v2374_v8 = vsel %vm2372_vm0, %v5661_v46, %v2373_v51  ;;  %v3003_v42 = vsub.s32 0, %v3001_v30  ;;  %v2733_v6 = vand.u32 3, %v5646_v60  ;;  %v2581_v22 = vand.u32 %v2269_v11, %v5178_v17 }
 0x46c   : > { %v2378_v7 = vsel %vm2371_vm15, %v2374_v8, %v2377_v36  ;;  %v3121_v34 = vand.u32 2147483647, %v3120_v16  ;;  %v2847_v19 = vpack.c.bf16 %v2845_v50, %v2845_v50  ;;  %vm3043_vm5 = vcmp.lt.s32.totalorder %v5366_v40, 0 }
 0x46d   : > { %v2379_v13 = vsel %vm2368_vm3, nan, %v2378_v7  ;;  %v4275_v59 = vmin.u32 %v3003_v42, %v3001_v30  ;;  %vm3042_vm6 = vcmp.le.f32.partialorder %v3041_v3, 0.7853982  ;;  %v3128_v4 = vsel %vm3043_vm5, %v3127_v45, %v5600_v55  ;;  %v4533_v45 = vld [vmem:[%s6002_s15 + $0x8] sm:$0xff]  }
 0x46e   : > { %v2484_v31 = vpack.c.bf16 %v2379_v13, %v2379_v13  ;;  %v3124_v43 = vmul.f32 %v3123_v57, %v3121_v34  ;;  %v2578_v28 = vand.u32 %v2268_v53, %v5178_v17  ;;  %vm2735_vm7 = vcmp.eq.s32.totalorder %v2733_v6, 0 }
 0x46f   : > { %v3005_v23 = vclz %v4275_v59  ;;  %v2868_v27 = vand.u32 %v2847_v19, %v5178_v17  ;;  %vm2738_vm8 = vcmp.eq.s32.totalorder %v2733_v6, 2  ;;  %v3130_v3 = vsel %vm3042_vm6, 0, %v3128_v4 }
 0x470   : > { %v2503_v44 = vand.u32 %v2484_v31, %v5178_v17  ;;  %v3125_v38 = vxor.u32 2147483648, %v3124_v43  ;;  %v2993_v55 = vadd.s32 %v5640_v58, %v5634_v52  ;;  %v2737_v48 = vsel %vm2735_vm7, %v5661_v46, %v2373_v51 }
 0x471   : > { %v4276_v60 = vadd.s32 4294967294, %v3005_v23  ;;  %v2740_v9 = vsel %vm2738_vm8, %v2376_v35, %v4565_v21  ;;  %vm2734_vm10 = vcmp.lt.s32.totalorder %v2733_v6, 2  ;;  %v3134_v47 = vadd.s32 3, %v3130_v3 }
 0x472   : > { %2509 = vmatpush1.bf16.msra.mxu1 %v2503_v44  ;;  %v3126_v63 = vsel %vm3043_vm5, %v3125_v38, %v3124_v43  ;;  %v2741_v33 = vsel %vm2734_vm10, %v2737_v48, %v2740_v9  ;;  %v3023_v29 = vsub.s32 4, %v5665_v54  ;;  %vm3133_vm14 = vweird.f32 %v5366_v40 }
 0x473   : > { %2583 = vmatprep.subr.bf16.mxu1 %v2581_v22  ;;  %v3129_v20 = vsel %vm3042_vm6, %v5366_v40, %v3126_v63  ;;  %vm4277_vm9 = vcmp.lt.s32.totalorder %v4276_v60, 0  ;;  %v2742_v52 = vsel %vm2368_vm3, nan, %v2741_v33  ;;  %v3135_v58 = vand.u32 3, %v3134_v47  ;;  %v4534_v22 = vld [vmem:[%s6000_s13] sm:$0xff]   ;;  %v4535_v40 = vld [vmem:[%s6000_s13 + $0x8] sm:$0xff]   ;;  %v3532_v33 = vpop.permute.xlu0 %3531 }
 0x474   : > { %4566 = vcosq.f32 %v3129_v20  ;;  %v3008_v14 = vsel %vm4277_vm9, 0, %v4276_v60  ;;  %v2846_v61 = vpack.c.bf16 %v2742_v52, %v2742_v52  ;;  %vm2939_vm15 = vcmp.lt.s32.totalorder %v5360_v12, 0 }
 0x475   : > { %4256 = vmatmul.mubr.msk.bf16.vlgmr.msra.gmra.mrb[12].mxu1 %vm1007_vm1, %v4530_v41  ;;  %4568 = vsinq.f32 %v3129_v20  ;;  %v3009_v26 = vsub.s32 32, %v3008_v14  ;;  %v3013_v2 = vsub.s32 4294967266, %v3008_v14  ;;  %v3010_v5 = vshll.u32 %v3001_v30, %v3008_v14 }
 0x476   : > { %2584 = vmatpush1.bf16.msra.mxu1 %v2578_v28  ;;  %2550 = vmatprep.mubr.bf16.mxu1 %v4668_v18  ;;  %vm3140_vm11 = vcmp.eq.s32.totalorder %v3135_v58, 2  ;;  %vm3137_vm12 = vcmp.eq.s32.totalorder %v3135_v58, 0  ;;  %vm3136_vm13 = vcmp.lt.s32.totalorder %v3135_v58, 2  ;;  %v2865_v7 = vand.u32 %v2846_v61, %v5178_v17  ;;  %v3537_v58 = vpop.permute.xlu1 %3536 }
 0x477   : > { %2870 = vmatprep.subr.bf16.mxu1 %v2868_v27  ;;  %v3011_v0 = vshrl.u32 %v2993_v55, %v3009_v26  ;;  %v3014_v10 = vadd.s32 127, %v3013_v2  ;;  %vm2938_vm0 = vcmp.le.f32.partialorder %v2937_v25, 0.7853982  ;;  %v3024_v57 = vsel %vm2939_vm15, %v3023_v29, %v5665_v54 }
 0x478   : > { %v3026_v43 = vsel %vm2938_vm0, 0, %v3024_v57  ;;  %v3430_v59 = vand.u32 3, %v3130_v3  ;;  %vm3029_vm9 = vweird.f32 %v5360_v12 }
 0x479   : > { %v3012_v32 = vor.u32 %v3011_v0, %v3010_v5  ;;  %v3015_v15 = vshll.u32 %v3014_v10, 23  ;;  %v3030_v25 = vadd.s32 3, %v3026_v43  ;;  %v3327_v23 = vand.u32 3, %v3026_v43  ;;  %v4536_v5 = vld [vmem:[%s6050_s12] sm:$0xff]   ;;  %v4537_v10 = vld [vmem:[%s6050_s12 + $0x8] sm:$0xff]  }
 0x47a   : > { %vm3432_vm2 = vcmp.eq.s32.totalorder %v3430_v59, 0  ;;  %vm3435_vm3 = vcmp.eq.s32.totalorder %v3430_v59, 2  ;;  %vm3431_vm5 = vcmp.lt.s32.totalorder %v3430_v59, 2  ;;  %v3547_v57 = vpop.permute.xlu1 %3546 }
 0x47b   : > { %v3016_v46 = vor.u32 4788187, %v3015_v15  ;;  %v3019_v24 = vcvt.s32.f32 %v3012_v32  ;;  %v3031_v53 = vand.u32 3, %v3030_v25  ;;  %vm3329_vm10 = vcmp.eq.s32.totalorder %v3327_v23, 0 }
 0x47d   : > { %4257 = vmatmul.mubr.msk.bf16.gmra.mrb[16].mxu1 %vm1007_vm1, %v4531_v37  ;;  %v3017_v35 = vand.u32 2147483647, %v3016_v46  ;;  %vm3036_vm6 = vcmp.eq.s32.totalorder %v3031_v53, 2  ;;  %vm3033_vm7 = vcmp.eq.s32.totalorder %v3031_v53, 0  ;;  %vm3032_vm8 = vcmp.lt.s32.totalorder %v3031_v53, 2 }
 0x47e   : > { %2615 = vmatprep.mubr.bf16.mxu1 %v4668_v18  ;;  %v4567_v21 = vpop.eup %4566 }
 0x47f   : > { %v4569_v51 = vpop.eup %4568  ;;  %v3141_v56 = vxor.u32 2147483648, %v4567_v21  ;;  %v3020_v8 = vmul.f32 %v3019_v24, %v3017_v35 }
 0x480   : > { %v3138_v36 = vxor.u32 2147483648, %v4569_v51 }
 0x481   : > { %v3142_v62 = vsel %vm3140_vm11, %v3141_v56, %v4569_v51  ;;  %v3021_v30 = vxor.u32 2147483648, %v3020_v8  ;;  %v3437_v44 = vsel %vm3435_vm3, %v3141_v56, %v4569_v51  ;;  %vm3332_vm11 = vcmp.eq.s32.totalorder %v3327_v23, 2 }
 0x482   : > { %v3139_v16 = vsel %vm3137_vm12, %v4567_v21, %v3138_v36  ;;  %v3434_v54 = vsel %vm3432_vm2, %v4567_v21, %v3138_v36  ;;  %vm3328_vm12 = vcmp.lt.s32.totalorder %v3327_v23, 2 }
 0x483   : > { %v3143_v11 = vsel %vm3136_vm13, %v3139_v16, %v3142_v62  ;;  %v3022_v34 = vsel %vm2939_vm15, %v3021_v30, %v3020_v8  ;;  %v3438_v41 = vsel %vm3431_vm5, %v3434_v54, %v3437_v44  ;;  %v3542_v62 = vpop.permute.xlu0 %3541 }
 0x484   : > { %v3144_v13 = vsel %vm3133_vm14, nan, %v3143_v11  ;;  %v3025_v31 = vsel %vm2938_vm0, %v5360_v12, %v3022_v34  ;;  %v3439_v60 = vsel %vm3133_vm14, nan, %v3438_v41  ;;  %v4538_v12 = vld [vmem:[%s6001_s14] sm:$0xff]  }
 0x485   : > { %4260 = vmatmul.mubr.msk.bf16.vlgmr.msra.gmra.mrb[12].mxu1 %vm1007_vm1, %v4532_v1  ;;  %v3146_v42 = vpack.c.bf16 %v3144_v13, %v3144_v13  ;;  %4570 = vcosq.f32 %v3025_v31  ;;  %v3441_v3 = vpack.c.bf16 %v3439_v60, %v3439_v60 }
 0x486   : > { %2871 = vmatpush1.bf16.msra.mxu1 %v2865_v7  ;;  %2625 = vmatprep.mubr.bf16.mxu1 %v4668_v18  ;;  %4572 = vsinq.f32 %v3025_v31 }
 0x487   : > { %v3167_v50 = vand.u32 %v3146_v42, %v5178_v17  ;;  %v3462_v2 = vand.u32 %v3441_v3, %v5178_v17  ;;  %v3588_v60 = vpop.permute.xlu0 %3587  ;;  %v3593_v3 = vpop.permute.xlu1 %3592 }
 0x489   : > { %3169 = vmatprep.subr.bf16.mxu1 %v3167_v50 }
 0x48d   : > { %4261 = vmatmul.mubr.msk.bf16.gmra.mrb[16].mxu1 %vm1007_vm1, %v4533_v45 }
 0x48e   : > { %2902 = vmatprep.mubr.bf16.mxu1 %v4668_v18 }
 0x48f   : > { %v4571_v6 = vpop.eup %4570 }
 0x490   : > { %v4573_v19 = vpop.eup %4572  ;;  %v3037_v38 = vxor.u32 2147483648, %v4571_v6 }
 0x491   : > { %v3034_v63 = vxor.u32 2147483648, %v4573_v19 }
 0x492   : > { %v3038_v4 = vsel %vm3036_vm6, %v3037_v38, %v4573_v19  ;;  %v3334_v14 = vsel %vm3332_vm11, %v3037_v38, %v4573_v19 }
 0x493   : > { %v3035_v28 = vsel %vm3033_vm7, %v4571_v6, %v3034_v63  ;;  %v3331_v55 = vsel %vm3329_vm10, %v4571_v6, %v3034_v63  ;;  %v4540_v63 = vld [vmem:[%s6004_s17] sm:$0xff]  }
 0x494   : > { %v3039_v20 = vsel %vm3032_vm8, %v3035_v28, %v3038_v4  ;;  %v3335_v26 = vsel %vm3328_vm12, %v3331_v55, %v3334_v14  ;;  %v4541_v4 = vld [vmem:[%s6004_s17 + $0x8] sm:$0xff]  }
 0x495   : > { %4272 = vmatmul.mubr.msk.bf16.vlgmr.msra.gmra.mrb[12].mxu1 %vm1007_vm1, %v4534_v22  ;;  %v3040_v27 = vsel %vm3029_vm9, nan, %v3039_v20  ;;  %v3336_v37 = vsel %vm3029_vm9, nan, %v3335_v26 }
 0x496   : > { %2912 = vmatprep.mubr.bf16.mxu1 %v4668_v18  ;;  %v3145_v48 = vpack.c.bf16 %v3040_v27, %v3040_v27  ;;  %v3440_v47 = vpack.c.bf16 %v3336_v37, %v3336_v37 }
 0x498   : > { %v3164_v9 = vand.u32 %v3145_v48, %v5178_v17  ;;  %v3459_v0 = vand.u32 %v3440_v47, %v5178_v17  ;;  %v4539_v17 = vld [vmem:[%s6001_s14 + $0x8] sm:$0xff]  }
 0x49a   : > { %3170 = vmatpush1.bf16.msra.mxu1 %v3164_v9 }
 0x49b   : > { %3464 = vmatprep.subr.bf16.mxu1 %v3462_v2 }
 0x49d   : > { %4273 = vmatmul.mubr.msk.bf16.gmra.mrb[16].mxu1 %vm1007_vm1, %v4535_v40 }
 0x49e   : > { %3201 = vmatprep.mubr.bf16.mxu1 %v4668_v18 }
 0x4a5   : > { %4284 = vmatmul.mubr.msk.bf16.vlgmr.msra.gmra.mrb[12].mxu1 %vm1007_vm1, %v4536_v5 }
 0x4a6   : > { %3465 = vmatpush1.bf16.msra.mxu1 %v3459_v0  ;;  %3211 = vmatprep.mubr.bf16.mxu1 %v4668_v18 }
 0x4ad   : > { %4285 = vmatmul.mubr.msk.bf16.gmra.mrb[16].mxu1 %vm1007_vm1, %v4537_v10  ;;  %v3598_v10 = vpop.permute.xlu0 %3597 }
 0x4ae   : > { %3496 = vmatprep.mubr.bf16.mxu1 %v4668_v18 }
 0x4b5   : > { %4296 = vmatmul.mubr.msk.bf16.vlgmr.msra.gmra.mrb[12].mxu1 %vm1007_vm1, %v4538_v12 }
 0x4b6   : > { %3506 = vmatprep.mubr.bf16.mxu1 %v4668_v18 }
 0x4bd   : > { %4297 = vmatmul.mubr.msk.bf16.gmra.mrb[16].mxu1 %vm1007_vm1, %v4539_v17 }
 0x588   : > { %v3498_v32 = vpop.f32.mrb[12].mxu1 }
 0x589   : > { %v3549_v15 = vadd.f32 %v3532_v33, %v3498_v32  ;;  %v3500_v52 = vpop.f32.mrb[13].mxu1 }
 0x58a   : > { %v3550_v46 = vadd.f32 %v3532_v33, %v3500_v52  ;;  %v3502_v21 = vpop.f32.mrb[14].mxu1  ;;  %v3603_v52 = vpop.permute.xlu1 %3602 }
 0x58b   : > { %v3557_v35 = vmul.f32 0.01, %v3549_v15  ;;  %v3551_v24 = vadd.f32 %v3537_v58, %v3502_v21  ;;  %v3504_v51 = vpop.f32.mrb[15].mxu1 }
 0x58c   : > { %v3558_v61 = vmul.f32 0.01, %v3550_v46  ;;  %v3552_v56 = vadd.f32 %v3537_v58, %v3504_v51 }
 0x58d   : > { %v3559_v1 = vmul.f32 0.01, %v3551_v24  ;;  %v3565_v8 = vmax.f32 %v3549_v15, %v3557_v35 }
 0x58e   : > { %v3560_v36 = vmul.f32 0.01, %v3552_v56  ;;  %v3566_v16 = vmax.f32 %v3550_v46, %v3558_v61 }
 0x58f   : > { %v3567_v29 = vmax.f32 %v3551_v24, %v3559_v1 }
 0x590   : > { %v3568_v30 = vmax.f32 %v3552_v56, %v3560_v36  ;;  %v3508_v7 = vpop.f32.mrb[16].mxu1 }
 0x591   : > { %v3581_v11 = vpack.c.bf16 %v3567_v29, %v3565_v8  ;;  %v3553_v13 = vadd.f32 %v3542_v62, %v3508_v7  ;;  %v3510_v34 = vpop.f32.mrb[17].mxu1 }
 0x592   : > { %v3554_v42 = vadd.f32 %v3542_v62, %v3510_v34  ;;  %v3512_v31 = vpop.f32.mrb[18].mxu1  ;;  %v3582_v50 = vpack.c.bf16 %v3568_v30, %v3566_v16 }
 0x593   : > { %v3561_v43 = vmul.f32 0.01, %v3553_v13  ;;  %v3555_v45 = vadd.f32 %v3547_v57, %v3512_v31  ;;  %v3514_v59 = vpop.f32.mrb[19].mxu1 }
 0x594   : > { %v3562_v25 = vmul.f32 0.01, %v3554_v42  ;;  %v3556_v54 = vadd.f32 %v3547_v57, %v3514_v59  ;;  %3621 = vmatprep.subr.bf16.mxu0 %v3582_v50 }
 0x595   : > { %v3563_v44 = vmul.f32 0.01, %v3555_v45  ;;  %3622 = vmatpush1.bf16.msra.mxu0 %v3581_v11  ;;  %v3569_v6 = vmax.f32 %v3553_v13, %v3561_v43  ;;  %v3691_v11 = vld [vmem:[%s6006_s19] sm:$0x3]  ;;  %v3699_v13 = vpop.permute.xlu0 %3698 }
 0x596   : > { %v3564_v53 = vmul.f32 0.01, %v3556_v54  ;;  %v3570_v41 = vmax.f32 %v3554_v42, %v3562_v25 }
 0x597   : > { %v3571_v22 = vmax.f32 %v3555_v45, %v3563_v44 }
 0x598   : > { %v3572_v19 = vmax.f32 %v3556_v54, %v3564_v53 }
 0x599   : > { %v3583_v38 = vpack.c.bf16 %v3571_v22, %v3569_v6 }
 0x59a   : > { %v3584_v23 = vpack.c.bf16 %v3572_v19, %v3570_v41 }
 0x59c   : > { %3623 = vmatprep.subr.bf16.mxu0 %v3584_v23 }
 0x59d   : > { %3624 = vmatpush1.bf16.msra.mxu0 %v3583_v38 }
 0x5a0   : > { %4300 = vmatmul.mubr.msk.bf16.vlgmr.msra.gmra.mrb[8].mxu0 %vm2131_vm4, %v4540_v63 }
 0x5a1   : > { %3663 = vmatprep.mubr.bf16.mxu0 %v4668_v18 }
 0x5a8   : > { %4301 = vmatmul.mubr.msk.bf16.gmra.mrb[12].mxu0 %vm2131_vm4, %v4541_v4 }
 0x5a9   : > { %3736 = vmatprep.mubr.bf16.mxu0 %v4668_v18 }
 0x673   : > { %v3655_v28 = vpop.f32.mrb[8].mxu0 }
 0x674   : > { %v3656_v20 = vadd.f32 %v3655_v28, %v3588_v60  ;;  %v3657_v27 = vpop.f32.mrb[9].mxu0 }
 0x675   : > { %v3658_v55 = vadd.f32 %v3657_v27, %v3588_v60  ;;  %v3659_v14 = vpop.f32.mrb[10].mxu0 }
 0x676   : > { %v3674_v48 = vmul.f32 0.01, %v3656_v20  ;;  %v3660_v40 = vadd.f32 %v3659_v14, %v3593_v3  ;;  %v3661_v9 = vpop.f32.mrb[11].mxu0 }
 0x677   : > { %v3675_v26 = vmul.f32 0.01, %v3658_v55  ;;  %v3662_v2 = vadd.f32 %v3661_v9, %v3593_v3 }
 0x678   : > { %v3676_v37 = vmul.f32 0.01, %v3660_v40  ;;  %v3682_v5 = vmax.f32 %v3656_v20, %v3674_v48 }
 0x679   : > { %v3677_v47 = vmul.f32 0.01, %v3662_v2  ;;  %v3683_v12 = vmax.f32 %v3658_v55, %v3675_v26 }
 0x67a   : > { %v3684_v0 = vmax.f32 %v3660_v40, %v3676_v37 }
 0x67b   : > { %v3685_v17 = vmax.f32 %v3662_v2, %v3677_v47  ;;  %v3665_v18 = vpop.f32.mrb[12].mxu0 }
 0x67c   : > { %v3692_v33 = vpack.c.bf16 %v3684_v0, %v3682_v5  ;;  %v3666_v32 = vadd.f32 %v3665_v18, %v3598_v10  ;;  %v3667_v15 = vpop.f32.mrb[13].mxu0 }
 0x67d   : > { %v3668_v58 = vadd.f32 %v3667_v15, %v3598_v10  ;;  %v3669_v46 = vpop.f32.mrb[14].mxu0  ;;  %v3693_v21 = vpack.c.bf16 %v3685_v17, %v3683_v12 }
 0x67e   : > { %v3678_v35 = vmul.f32 0.01, %v3666_v32  ;;  %v3670_v24 = vadd.f32 %v3669_v46, %v3603_v52  ;;  %v3671_v51 = vpop.f32.mrb[15].mxu0 }
 0x67f   : > { %v3679_v61 = vmul.f32 0.01, %v3668_v58  ;;  %v3672_v56 = vadd.f32 %v3671_v51, %v3603_v52  ;;  %3704 = vmatprep.subr.bf16.mxu0 %v3693_v21 }
 0x680   : > { %v3680_v1 = vmul.f32 0.01, %v3670_v24  ;;  %3705 = vmatpush1.bf16.msra.mxu0 %v3692_v33  ;;  %v3686_v8 = vmax.f32 %v3666_v32, %v3678_v35 }
 0x681   : > { %v3681_v36 = vmul.f32 0.01, %v3672_v56  ;;  %v3687_v62 = vmax.f32 %v3668_v58, %v3679_v61 }
 0x682   : > { %v3688_v29 = vmax.f32 %v3670_v24, %v3680_v1 }
 0x683   : > { %v3689_v16 = vmax.f32 %v3672_v56, %v3681_v36 }
 0x684   : > { %v3694_v30 = vpack.c.bf16 %v3688_v29, %v3686_v8 }
 0x685   : > { %v3695_v7 = vpack.c.bf16 %v3689_v16, %v3687_v62 }
 0x687   : > { %3706 = vmatprep.subr.bf16.mxu0 %v3695_v7 }
 0x688   : > { %3707 = vmatpush1.bf16.msra.mxu0 %v3694_v30 }
 0x68b   : > { %4302 = vmatmul.mubr.msk.bf16.vlgmr.msra.gmra.mrb[16].mxu0 %vm2131_vm4, %v3691_v11 }
 0x75e   : > { %v3738_v34 = vpop.f32.mrb[16].mxu0 }
 0x75f   : > { %v3739_v57 = vadd.f32 %v3738_v34, %v3699_v13  ;;  %v3740_v42 = vpop.f32.mrb[17].mxu0 }
 0x760   : > { %v3741_v31 = vadd.f32 %v3740_v42, %v3699_v13  ;;  %v3742_v50 = vpop.f32.mrb[18].mxu0 }
 0x761   : > { %v3745_v43 = vadd.f32 %v3739_v57, %v5351_v49  ;;  %v3743_v45 = vpop.f32.mrb[19].mxu0 }
 0x762   : > { %v3746_v59 = vadd.f32 %v3741_v31, %v5354_v39 }
 0x763   : > { %3747 = vxpose.xlu1.b32.start.end [1/1] (short) %v3745_v43, 128 }
 0x764   : > { %3779 = vxpose.xlu0.b32.start.end [1/1] (short) %v3746_v59, 128 }
 0x7e3   : > { %v3763_v25 = vpop.trf.xlu1 }
 0x7e4   : > { %v3795_v54 = vpop.trf.xlu0  ;;  %3811 = vst.msk [vmem:[%s5782_s28] sm:$0xff] %vm1007_vm1, %v3763_v25 }
 0x7e5   : > { %3827 = vst.msk [vmem:[%s5782_s28 + $0x80] sm:$0xff] %vm1007_vm1, %v3795_v54 }
 0x7e7   : > { %v3764_v49 = vpop.trf.xlu1 }
 0x7e8   : > { %v3796_v39 = vpop.trf.xlu0  ;;  %3812 = vst.msk [vmem:[%s5782_s28 + $0x8] sm:$0xff] %vm1007_vm1, %v3764_v49 }
 0x7e9   : > { %3828 = vst.msk [vmem:[%s5782_s28 + $0x88] sm:$0xff] %vm1007_vm1, %v3796_v39 }
 0x7eb   : > { %v3765_v44 = vpop.trf.xlu1 }
 0x7ec   : > { %v3797_v53 = vpop.trf.xlu0  ;;  %3813 = vst.msk [vmem:[%s5782_s28 + $0x10] sm:$0xff] %vm1007_vm1, %v3765_v44 }
 0x7ed   : > { %3829 = vst.msk [vmem:[%s5782_s28 + $0x90] sm:$0xff] %vm1007_vm1, %v3797_v53 }
 0x7ef   : > { %v3766_v6 = vpop.trf.xlu1 }
 0x7f0   : > { %v3798_v22 = vpop.trf.xlu0  ;;  %3814 = vst.msk [vmem:[%s5782_s28 + $0x18] sm:$0xff] %vm1007_vm1, %v3766_v6 }
 0x7f1   : > { %3830 = vst.msk [vmem:[%s5782_s28 + $0x98] sm:$0xff] %vm1007_vm1, %v3798_v22 }
 0x7f3   : > { %v3767_v41 = vpop.trf.xlu1 }
 0x7f4   : > { %v3799_v19 = vpop.trf.xlu0  ;;  %3815 = vst.msk [vmem:[%s5782_s28 + $0x20] sm:$0xff] %vm1007_vm1, %v3767_v41 }
 0x7f5   : > { %3831 = vst.msk [vmem:[%s5782_s28 + $0xa0] sm:$0xff] %vm1007_vm1, %v3799_v19 }
 0x7f7   : > { %v3768_v38 = vpop.trf.xlu1 }
 0x7f8   : > { %v3800_v23 = vpop.trf.xlu0  ;;  %3816 = vst.msk [vmem:[%s5782_s28 + $0x28] sm:$0xff] %vm1007_vm1, %v3768_v38 }
 0x7f9   : > { %3832 = vst.msk [vmem:[%s5782_s28 + $0xa8] sm:$0xff] %vm1007_vm1, %v3800_v23 }
 0x7fb   : > { %v3769_v63 = vpop.trf.xlu1 }
 0x7fc   : > { %v3801_v4 = vpop.trf.xlu0  ;;  %3817 = vst.msk [vmem:[%s5782_s28 + $0x30] sm:$0xff] %vm1007_vm1, %v3769_v63 }
 0x7fd   : > { %3833 = vst.msk [vmem:[%s5782_s28 + $0xb0] sm:$0xff] %vm1007_vm1, %v3801_v4 }
 0x7ff   : > { %v3770_v60 = vpop.trf.xlu1 }
 0x800   : > { %v3802_v28 = vpop.trf.xlu0  ;;  %3818 = vst.msk [vmem:[%s5782_s28 + $0x38] sm:$0xff] %vm1007_vm1, %v3770_v60 }
 0x801   : > { %3834 = vst.msk [vmem:[%s5782_s28 + $0xb8] sm:$0xff] %vm1007_vm1, %v3802_v28 }
 0x803   : > { %v3771_v20 = vpop.trf.xlu1 }
 0x804   : > { %v3803_v27 = vpop.trf.xlu0  ;;  %3819 = vst.msk [vmem:[%s5782_s28 + $0x40] sm:$0xff] %vm1007_vm1, %v3771_v20 }
 0x805   : > { %3835 = vst.msk [vmem:[%s5782_s28 + $0xc0] sm:$0xff] %vm1007_vm1, %v3803_v27 }
 0x807   : > { %v3772_v3 = vpop.trf.xlu1 }
 0x808   : > { %v3804_v55 = vpop.trf.xlu0  ;;  %3820 = vst.msk [vmem:[%s5782_s28 + $0x48] sm:$0xff] %vm1007_vm1, %v3772_v3 }
 0x809   : > { %3836 = vst.msk [vmem:[%s5782_s28 + $0xc8] sm:$0xff] %vm1007_vm1, %v3804_v55 }
 0x80b   : > { %v3773_v14 = vpop.trf.xlu1 }
 0x80c   : > { %v3805_v48 = vpop.trf.xlu0  ;;  %3821 = vst.msk [vmem:[%s5782_s28 + $0x50] sm:$0xff] %vm1007_vm1, %v3773_v14 }
 0x80d   : > { %3837 = vst.msk [vmem:[%s5782_s28 + $0xd0] sm:$0xff] %vm1007_vm1, %v3805_v48 }
 0x80f   : > { %v3774_v40 = vpop.trf.xlu1 }
 0x810   : > { %v3806_v9 = vpop.trf.xlu0  ;;  %3822 = vst.msk [vmem:[%s5782_s28 + $0x58] sm:$0xff] %vm1007_vm1, %v3774_v40 }
 0x811   : > { %3838 = vst.msk [vmem:[%s5782_s28 + $0xd8] sm:$0xff] %vm1007_vm1, %v3806_v9 }
 0x813   : > { %v3775_v26 = vpop.trf.xlu1 }
 0x814   : > { %v3807_v2 = vpop.trf.xlu0  ;;  %3823 = vst.msk [vmem:[%s5782_s28 + $0x60] sm:$0xff] %vm1007_vm1, %v3775_v26 }
 0x815   : > { %3839 = vst.msk [vmem:[%s5782_s28 + $0xe0] sm:$0xff] %vm1007_vm1, %v3807_v2 }
 0x817   : > { %v3776_v37 = vpop.trf.xlu1 }
 0x818   : > { %v3808_v47 = vpop.trf.xlu0  ;;  %3824 = vst.msk [vmem:[%s5782_s28 + $0x68] sm:$0xff] %vm1007_vm1, %v3776_v37 }
 0x819   : > { %3840 = vst.msk [vmem:[%s5782_s28 + $0xe8] sm:$0xff] %vm1007_vm1, %v3808_v47 }
 0x81b   : > { %v3777_v5 = vpop.trf.xlu1  ;;  %3849 = sbr.rel (!%p4805_p4) target bundleno = 2138 (0x85a), region = 108 }
 0x81c   : > { %v3809_v0 = vpop.trf.xlu0  ;;  %3825 = vst.msk [vmem:[%s5782_s28 + $0x70] sm:$0xff] %vm1007_vm1, %v3777_v5 }
 0x81d   : > { %3841 = vst.msk [vmem:[%s5782_s28 + $0xf0] sm:$0xff] %vm1007_vm1, %v3809_v0 }
 0x81f   : > { %v3778_v10 = vpop.trf.xlu1 }
 0x820   : > { %v3810_v12 = vpop.trf.xlu0  ;;  %3826 = vst.msk [vmem:[%s5782_s28 + $0x78] sm:$0xff] %vm1007_vm1, %v3778_v10 }
 0x821   : > { %3842 = vst.msk [vmem:[%s5782_s28 + $0xf8] sm:$0xff] %vm1007_vm1, %v3810_v12 }
 0x822   : > { %s6060_s2 = smov (!%p3852_p8, %s3851_s2), 32 }
 0x823   : > { %s4305_s23 = sshll.u32 %s6060_s2, 7 }
 0x824   : > { %p4308_p9 = scmp.eq.s32.totalorder %s4305_s23, 0 }
 0x825   : > { %s5861_s1 = sshrl.u32 (!%p4308_p9), %s6060_s2, 5 }
 0x826   : > { %3860 = sbr.rel (%p4308_p9) target bundleno = 2138 (0x85a), region = 112  ;;  %p4309_p10 = scmp.le.s32.totalorder (!%p4308_p9), %s5861_s1, 0 }
 0x82d   : > { %4138 = sbr.rel (%p4309_p10) target bundleno = 2117 (0x845), region = 188  ;;  %s6051_s27 = smov (!%p4309_p10), %s5855_s5 }
 0x82e   : > { %s6052_s4 = smov (!%p4309_p10), %s5782_s28  ;;  %s5870_s30 = smov (!%p4309_p10), 0  }
 0x82f   : > { %s5872_s8 = smov (!%p4309_p10), 0  }
 0x834 LB: >> { %v3984_v17 = vld [vmem:[%s4636_s4] sm:$0xff]  ;;  %v3986_v18 = vld [vmem:[%s4636_s4 + $0x8] sm:$0xff]  ;;  %v3988_v33 = vld [vmem:[%s4636_s4 + $0x10] sm:$0xff]  ;;  %s4048_s10 = sadd.s32 1, %s4640_s30  ;;  %s3978_s8 = sadd.s32 1, %s4644_s8   ;;  %s4644_s8 = sphi %s5872_s8, %s3978_s8   ;;  %s4640_s30 = sphi %s5870_s30, %s6055_s30   ;;  %s4636_s4 = sphi %s6052_s4, %s6054_s4   ;;  %s4632_s27 = sphi %s6051_s27, %s6053_s27  }
 0x835   : >> { %3985 = vst [vmem:[%s4632_s27] sm:$0xff] %v3984_v17  ;;  %3987 = vst [vmem:[%s4632_s27 + $0x8] sm:$0xff] %v3986_v18  ;;  %v3990_v32 = vld [vmem:[%s4636_s4 + $0x18] sm:$0xff]  ;;  %v3992_v15 = vld [vmem:[%s4636_s4 + $0x20] sm:$0xff]  ;;  %p4049_p11 = scmp.ge.s32.totalorder %s4048_s10, %s5861_s1  ;;  %p3977_p12 = scmp.ge.s32.totalorder %s3978_s8, %s5861_s1 }
 0x836   : >> { %3989 = vst [vmem:[%s4632_s27 + $0x10] sm:$0xff] %v3988_v33  ;;  %v3994_v52 = vld [vmem:[%s4636_s4 + $0x28] sm:$0xff]  ;;  %3991 = vst [vmem:[%s4632_s27 + $0x18] sm:$0xff] %v3990_v32  ;;  %v3996_v58 = vld [vmem:[%s4636_s4 + $0x30] sm:$0xff] }
 0x837   : >> { %3993 = vst [vmem:[%s4632_s27 + $0x20] sm:$0xff] %v3992_v15  ;;  %3995 = vst [vmem:[%s4632_s27 + $0x28] sm:$0xff] %v3994_v52  ;;  %v3998_v46 = vld [vmem:[%s4636_s4 + $0x38] sm:$0xff]  ;;  %v4000_v21 = vld [vmem:[%s4636_s4 + $0x40] sm:$0xff]  ;;  %s6062_s10 = smov (%p4049_p11, %s4048_s10), 0 }
 0x838   : >> { %3997 = vst [vmem:[%s4632_s27 + $0x30] sm:$0xff] %v3996_v58  ;;  %3999 = vst [vmem:[%s4632_s27 + $0x38] sm:$0xff] %v3998_v46  ;;  %v4002_v35 = vld [vmem:[%s4636_s4 + $0x48] sm:$0xff]  ;;  %v4004_v24 = vld [vmem:[%s4636_s4 + $0x50] sm:$0xff]  ;;  %s4310_s26 = sshll.u32 %s6062_s10, 8 }
 0x839   : >> { %4001 = vst [vmem:[%s4632_s27 + $0x40] sm:$0xff] %v4000_v21  ;;  %v4006_v51 = vld [vmem:[%s4636_s4 + $0x58] sm:$0xff]  ;;  %4003 = vst [vmem:[%s4632_s27 + $0x48] sm:$0xff] %v4002_v35  ;;  %v4008_v61 = vld [vmem:[%s4636_s4 + $0x60] sm:$0xff]  ;;  %s5928_s23 = scalar_lea.vmem %s5782_s28, %s4310_s26 [#allocation2]   ;;  %s4054_s30 = scalar_lea.vmem %s5855_s5, %s4310_s26  }
 0x83a   : >> { %4005 = vst [vmem:[%s4632_s27 + $0x50] sm:$0xff] %v4004_v24  ;;  %4007 = vst [vmem:[%s4632_s27 + $0x58] sm:$0xff] %v4006_v51  ;;  %v4010_v56 = vld [vmem:[%s4636_s4 + $0x68] sm:$0xff]  ;;  %v4012_v1 = vld [vmem:[%s4636_s4 + $0x70] sm:$0xff] }
 0x83b   : >> { %4009 = vst [vmem:[%s4632_s27 + $0x60] sm:$0xff] %v4008_v61  ;;  %4011 = vst [vmem:[%s4632_s27 + $0x68] sm:$0xff] %v4010_v56  ;;  %v4014_v36 = vld [vmem:[%s4636_s4 + $0x78] sm:$0xff]  ;;  %v4016_v8 = vld [vmem:[%s4636_s4 + $0x80] sm:$0xff] }
 0x83c   : >> { %4013 = vst [vmem:[%s4632_s27 + $0x70] sm:$0xff] %v4012_v1  ;;  %v4018_v29 = vld [vmem:[%s4636_s4 + $0x88] sm:$0xff]  ;;  %4015 = vst [vmem:[%s4632_s27 + $0x78] sm:$0xff] %v4014_v36  ;;  %v4020_v62 = vld [vmem:[%s4636_s4 + $0x90] sm:$0xff] }
 0x83d   : >> { %4017 = vst [vmem:[%s4632_s27 + $0x80] sm:$0xff] %v4016_v8  ;;  %4019 = vst [vmem:[%s4632_s27 + $0x88] sm:$0xff] %v4018_v29  ;;  %v4022_v16 = vld [vmem:[%s4636_s4 + $0x98] sm:$0xff]  ;;  %v4024_v30 = vld [vmem:[%s4636_s4 + $0xa0] sm:$0xff] }
 0x83e   : >> { %4021 = vst [vmem:[%s4632_s27 + $0x90] sm:$0xff] %v4020_v62  ;;  %4023 = vst [vmem:[%s4632_s27 + $0x98] sm:$0xff] %v4022_v16  ;;  %v4026_v7 = vld [vmem:[%s4636_s4 + $0xa8] sm:$0xff]  ;;  %v4028_v11 = vld [vmem:[%s4636_s4 + $0xb0] sm:$0xff]  ;;  %3980 = sbr.rel (!%p3977_p12) target bundleno = 2100 (0x834), region = 194 }
 0x83f   : >> { %4025 = vst [vmem:[%s4632_s27 + $0xa0] sm:$0xff] %v4024_v30  ;;  %v4030_v13 = vld [vmem:[%s4636_s4 + $0xb8] sm:$0xff]  ;;  %4027 = vst [vmem:[%s4632_s27 + $0xa8] sm:$0xff] %v4026_v7  ;;  %v4032_v34 = vld [vmem:[%s4636_s4 + $0xc0] sm:$0xff] }
 0x840   : >> { %4029 = vst [vmem:[%s4632_s27 + $0xb0] sm:$0xff] %v4028_v11  ;;  %4031 = vst [vmem:[%s4632_s27 + $0xb8] sm:$0xff] %v4030_v13  ;;  %v4034_v57 = vld [vmem:[%s4636_s4 + $0xc8] sm:$0xff]  ;;  %v4036_v42 = vld [vmem:[%s4636_s4 + $0xd0] sm:$0xff] }
 0x841   : >> { %4033 = vst [vmem:[%s4632_s27 + $0xc0] sm:$0xff] %v4032_v34  ;;  %4035 = vst [vmem:[%s4632_s27 + $0xc8] sm:$0xff] %v4034_v57  ;;  %v4038_v31 = vld [vmem:[%s4636_s4 + $0xd8] sm:$0xff]  ;;  %v4040_v50 = vld [vmem:[%s4636_s4 + $0xe0] sm:$0xff] }
 0x842   : >> { %4037 = vst [vmem:[%s4632_s27 + $0xd0] sm:$0xff] %v4036_v42  ;;  %v4042_v43 = vld [vmem:[%s4636_s4 + $0xe8] sm:$0xff]  ;;  %4039 = vst [vmem:[%s4632_s27 + $0xd8] sm:$0xff] %v4038_v31  ;;  %v4044_v45 = vld [vmem:[%s4636_s4 + $0xf0] sm:$0xff] }
 0x843   : >> { %4041 = vst [vmem:[%s4632_s27 + $0xe0] sm:$0xff] %v4040_v50  ;;  %4043 = vst [vmem:[%s4632_s27 + $0xe8] sm:$0xff] %v4042_v43  ;;  %v4046_v59 = vld [vmem:[%s4636_s4 + $0xf8] sm:$0xff]  ;;  %s6054_s4 = smov %s5928_s23 }
 0x844   : >> { %4045 = vst [vmem:[%s4632_s27 + $0xf0] sm:$0xff] %v4044_v45  ;;  %4047 = vst [vmem:[%s4632_s27 + $0xf8] sm:$0xff] %v4046_v59  ;;  %s6053_s27 = smov %s4054_s30  ;;  %s6055_s30 = smov %s6062_s10 }
 0x845 PF: > { %s5969_s26 = sand.u32 31, %s6060_s2   ;;  %s4321_s6 = sshll.u32 %s5861_s1, 8 }
 0x846   : > { %s4059_s7 = scalar_lea.vmem %s5782_s28, %s4321_s6 [#allocation2]   ;;  %s4061_s9 = scalar_lea.vmem %s5855_s5, %s4321_s6  }
 0x847   : > { %p4315_p13 = scmp.le.s32.totalorder %s5969_s26, 0 }
 0x848   : > { %s4646_s11 = smov (!%p4315_p13), %s4061_s9   ;;  %s4650_s23 = smov (!%p4315_p13), %s4059_s7  }
 0x849   : > { %4152 = sbr.rel (%p4315_p13) target bundleno = 2138 (0x85a), region = 199  ;;  %s4654_s12 = smov (!%p4315_p13), 0  }
 0x84a   : > { %s4658_s10 = smov (!%p4315_p13), 0  }
 0x850 LB: >> { %v4071_v25 = vld [vmem:[%s4652_s23] sm:$0xff]  ;;  %s4073_s2 = sadd.s32 1, %s4656_s12  ;;  %s4065_s10 = sadd.s32 1, %s4660_s10   ;;  %s4660_s10 = sphi %s4658_s10, %s4065_s10   ;;  %s4656_s12 = sphi %s4654_s12, %s4655_s12   ;;  %s4652_s23 = sphi %s4650_s23, %s4078_s23   ;;  %s4648_s11 = sphi %s4646_s11, %s4079_s11  }
 0x851   : >> { %4072 = vst [vmem:[%s4648_s11] sm:$0xff] %v4071_v25  ;;  %p4074_p0 = scmp.ge.s32.totalorder %s4073_s2, %s5969_s26  ;;  %p4064_p1 = scmp.ge.s32.totalorder %s4065_s10, %s5969_s26 }
 0x853   : >> { %s6064_s2 = smov (%p4074_p0, %s4073_s2), 0  ;;  %4067 = sbr.rel (!%p4064_p1) target bundleno = 2128 (0x850), region = 205 }
 0x854   : >> { %s4316_s6 = sshll.u32 %s6064_s2, 3  ;;  %s4655_s12 = smov %s6064_s2  }
 0x855   : >> { %s4078_s23 = scalar_lea.vmem %s4059_s7, %s4316_s6 [#allocation2]   ;;  %s4079_s11 = scalar_lea.vmem %s4061_s9, %s4316_s6  }
 0x85a PF: > { %p28_p2 = scmp.ge.s32.totalorder %s4795_s3, 10   ;;  %s6056_s2 = smov %s4624_s25 }
 0x85b   : > { %s6057_s25 = smov %s4803_s0  ;;  %s6058_s26 = smov %s4795_s3 }
 0x85c   :  { %30 = sbr.rel (!%p28_p2) target bundleno = 17 (0x11), region = 216 }

// kernel: tpu_custom_call.1
= control target key start
LH: loop header
LB: loop body
LE: loop exit
PB: predicated region body
PF: predicated region fallthrough
CT: control target
= control target key end

     0   :  { %s3883_s0 = inlined_call_operand.vmem [shape: f32[3,2048], index: 0, kind: input, shape index: {}]   ;;  %s3884_s1 = inlined_call_operand.vmem [shape: bf16[32,3], index: 1, kind: input, shape index: {}]   ;;  %s3885_s2 = inlined_call_operand.vmem [shape: bf16[32,3], index: 2, kind: input, shape index: {}]   ;;  %s3886_s3 = inlined_call_operand.vmem [shape: bf16[32,3], index: 3, kind: input, shape index: {}]   ;;  %s3887_s4 = inlined_call_operand.vmem [shape: bf16[32,3], index: 4, kind: input, shape index: {}]   ;;  %s3888_s5 = inlined_call_operand.vmem [shape: bf16[32,3], index: 5, kind: input, shape index: {}]   ;;  %s3889_s6 = inlined_call_operand.vmem [shape: f32[32,1], index: 6, kind: input, shape index: {}]   ;;  %s3890_s7 = inlined_call_operand.vmem [shape: bf16[32,32], index: 7, kind: input, shape index: {}]   ;;  %s3891_s8 = inlined_call_operand.vmem [shape: f32[32,1], index: 8, kind: input, shape index: {}]   ;;  %s3892_s9 = inlined_call_operand.vmem [shape: bf16[3,32], index: 9, kind: input, shape index: {}]   ;;  %s3893_s10 = inlined_call_operand.vmem [shape: f32[3,1], index: 10, kind: input, shape index: {}]   ;;  %s3894_s11 = inlined_call_operand.vmem [shape: bf16[32,3], index: 11, kind: input, shape index: {}]   ;;  %s3895_s12 = inlined_call_operand.vmem [shape: bf16[32,3], index: 12, kind: input, shape index: {}]   ;;  %s3896_s13 = inlined_call_operand.vmem [shape: bf16[32,3], index: 13, kind: input, shape index: {}]   ;;  %s3897_s14 = inlined_call_operand.vmem [shape: bf16[32,3], index: 14, kind: input, shape index: {}]   ;;  %s3898_s15 = inlined_call_operand.vmem [shape: bf16[32,3], index: 15, kind: input, shape index: {}]   ;;  %s3899_s16 = inlined_call_operand.vmem [shape: f32[32,1], index: 16, kind: input, shape index: {}]   ;;  %s3900_s17 = inlined_call_operand.vmem [shape: bf16[32,32], index: 17, kind: input, shape index: {}]   ;;  %s3901_s18 = inlined_call_operand.vmem [shape: f32[32,1], index: 18, kind: input, shape index: {}]   ;;  %s3902_s19 = inlined_call_operand.vmem [shape: bf16[3,32], index: 19, kind: input, shape index: {}]   ;;  %s3903_s20 = inlined_call_operand.vmem [shape: f32[3,1], index: 20, kind: input, shape index: {}]   ;;  %s3904_s21 = inlined_call_operand.hbm [shape: f32[3,2048], index: 21, kind: output, shape index: {}]  }
   0x1   :  { %3915 = sst [smem:[#allocation7_spill]] %s3883_s0 }
   0x2   :  { %3916 = sst [smem:[#allocation8_spill]] %s3884_s1 }
   0x3   :  { %3917 = sst [smem:[#allocation9_spill]] %s3885_s2 }
   0x4   :  { %3918 = sst [smem:[#allocation10_spill]] %s3886_s3 }
   0x5   :  { %3919 = sst [smem:[#allocation11_spill]] %s3887_s4 }
   0x6   :  { %3920 = sst [smem:[#allocation12_spill]] %s3888_s5 }
   0x7   :  { %3921 = sst [smem:[#allocation13_spill]] %s3889_s6 }
   0x8   :  { %3922 = sst [smem:[#allocation14_spill]] %s3890_s7 }
   0x9   :  { %3923 = sst [smem:[#allocation15_spill]] %s3891_s8 }
   0xa   :  { %3924 = sst [smem:[#allocation16_spill]] %s3892_s9 }
   0xb   :  { %26 = vsyncpa [#allocation3], 0 }
   0xc   :  { %28 = vsyncpa [#allocation3 + $0x1], 0  ;;  %s3359_s2 = smov 0   ;;  %s3361_s25 = smov 0  }
   0xd   :  { %s3363_s26 = smov 0   ;;  %s3365_s27 = smov 0  }
   0xe LB: > { %3925 = sst [smem:[#allocation5_spill]] %s3234_s26  ;;  %s3380_s3 = sadd.s32 4294967295, %s3238_s27   ;;  %s3238_s27 = sphi %s3365_s27, %s3946_s27   ;;  %s3234_s26 = sphi %s3363_s26, %s3943_s26   ;;  %s3230_s25 = sphi %s3361_s25, %s3945_s25   ;;  %s3226_s2 = sphi %s3359_s2, %s3944_s2  }
   0xf   : > { %s2911_s28 = sadd.s32 4294967294, %s3238_s27   ;;  %s3384_s29 = sadd.s32 1, %s3238_s27  }
  0x10   : > { %s487_s0 = sadd.s32 1, %s3234_s26  ;;  %s484_s4 = ssub.s32 %s3238_s27, %s3384_s29 }
  0x11   : > { %p497_p0 = scmp.ne.s32.totalorder %s3234_s26, %s3230_s25  ;;  %p485_p1 = scmp.eq.s32.totalorder %s484_s4, 0 }
  0x12   : > { %p498_p2 = scmp.eq.s32.totalorder %s3380_s3, 7  ;;  %p503_p3 = scmp.ne.s32.totalorder %s3230_s25, %s3226_s2 }
  0x13   : > { %p504_p4 = scmp.eq.s32.totalorder %s2911_s28, 7  ;;  %p2914_p7 = scmp.ge.s32.totalorder %s3238_s27, 1 }
  0x14   : > { %s3395_s30 = scalar_select %p485_p1, %s3234_s26, %s487_s0  }
  0x15   : > { %p3397_p5 = por %p498_p2, %p497_p0  ;;  %p3401_p6 = por %p504_p4, %p503_p3 }
  0x16   : > { %3926 = sst [smem:[#allocation6_spill]] %s3395_s30  ;;  %p591_p8 = scmp.lt.s32.totalorder %s3238_s27, 9 }
  0x18   : > { %p592_p9 = pnand %p2914_p7, %p591_p8 }
  0x19   : > { %s2916_s23 = sshll.u32 (!%p592_p9), %s3380_s3, 1  ;;  %v3240_v0 = vmov (!%p592_p9), 0   ;;  %s3929_s0 = sld [smem:[#allocation7_spill]] (!%p592_p9)  ;;  %v3241_v23 = vmov (!%p592_p9), 683565275  }
  0x1a   : > { %595 = sbr.rel (%p592_p9) target bundleno = 1743 (0x6cf), region = 104  ;;  %p652_p10 = scmp.lt.s32.totalorder (!%p592_p9), %s2916_s23, 15  ;;  %842 = vmatprep.mubr.bf16.mxu0 (!%p592_p9), %v3240_v0  ;;  %3133 = vset.pattern.permute.xlu0 (!%p592_p9), %v3240_v0  ;;  %v3242_v25 = vmov (!%p592_p9), 2475754826   ;;  %v3243_v27 = vmov (!%p592_p9), 2131351028  }
  0x1b   : > { %3134 = vset.pattern.permute.xlu1 (!%p592_p9), %v3240_v0  ;;  %1654 = vmatprep.mubr.bf16.mxu1 (!%p592_p9), %v3240_v0  ;;  %v3244_v29 = vmov (!%p592_p9), 2102212464   ;;  %v3245_v31 = vmov (!%p592_p9), 920167782   ;;  %v3246_v39 = vmov (!%p592_p9), 1326507024  }
  0x1c   : > { %s3930_s6 = sld [smem:[#allocation13_spill]] (!%p592_p9)  ;;  %s3931_s8 = sld [smem:[#allocation15_spill]] (!%p592_p9) }
  0x1d   : > { %s3933_s28 = sld [smem:[#allocation12_spill]] (!%p592_p9)  ;;  %s3935_s26 = sld [smem:[#allocation9_spill]] (!%p592_p9) }
  0x1e   : > { %s3938_s7 = sld [smem:[#allocation14_spill]] (!%p592_p9)  ;;  %s3939_s9 = sld [smem:[#allocation16_spill]] (!%p592_p9) }
  0x1f   : > { %s648_s30 = sand.u32 (!%p592_p9), 1, %s3230_s25  }
  0x21   : > { %s3948_s23 = smov (!%p652_p10, %s2916_s23), 15 }
  0x22   : > { %s2917_s1 = sshll.u32 %s3948_s23, 2  ;;  %s3005_s23 = sshll.u32 %s3380_s3, 7 }
  0x23   : > { %s655_s4 = scalar_lea.vmem %s3929_s0, %s2917_s1  ;;  %s3934_s1 = sld [smem:[#allocation10_spill]] }
  0x24   : > { %v3415_v1 = vld [vmem:[%s655_s4] sm:$0x77]  ;;  %s3932_s4 = sld [smem:[#allocation8_spill]]  ;;  %s2915_s0 = sshll.u32 %s648_s30, 3 }
  0x25   : > { %v3418_v2 = vmul.f32 3.1415927, %v3415_v1  ;;  %v3421_v3 = vmul.f32 6.2831855, %v3415_v1  ;;  %s3248_s3 = smov [#allocation2]  }
  0x27   : > { %v674_v4 = vand.u32 2147483647, %v3418_v2  ;;  %v677_v5 = vand.u32 2139095040, %v3418_v2  ;;  %v1138_v7 = vand.u32 2147483647, %v3421_v3  ;;  %v1141_v8 = vand.u32 2139095040, %v3421_v3 }
  0x28   : > { %vm676_vm14 = vcmp.lt.s32.totalorder %v3418_v2, 0 }
  0x29   : > { %v678_v6 = vshrl.u32 %v677_v5, 23  ;;  %v681_v9 = vand.u32 8388607, %v674_v4  ;;  %v1142_v11 = vshrl.u32 %v1141_v8, 23  ;;  %v3431_v14 = vand.u32 8388607, %v1138_v7 }
  0x2a   : > { %vm675_vm15 = vcmp.le.f32.partialorder %v674_v4, 0.7853982 }
  0x2b   : > { %v2918_v10 = vadd.s32 4294967169, %v678_v6  ;;  %v2938_v13 = vadd.s32 4294967169, %v1142_v11  ;;  %v682_v15 = vor.u32 8388608, %v681_v9  ;;  %v1146_v21 = vor.u32 8388608, %v3431_v14 }
  0x2d   : > { %v684_v12 = vadd.s32 1, %v2918_v10  ;;  %v1148_v16 = vadd.s32 1, %v2938_v13  ;;  %v3433_v20 = vshll.u32 %v682_v15, 8 }
  0x2f   : > { %vm685_vm0 = vcmp.gt.s32.totalorder %v684_v12, 0  ;;  %vm1149_vm1 = vcmp.gt.s32.totalorder %v1148_v16, 0 }
  0x30   : > { %v686_v17 = vsel %vm685_vm0, %v684_v12, 0  ;;  %v1150_v33 = vsel %vm1149_vm1, %v1148_v16, 0  ;;  %vm800_vm0 = vcmask 1040384   ;;  %vm1140_vm1 = vcmp.lt.s32.totalorder %v3421_v3, 0 }
  0x31   : > { %v687_v18 = vshrl.u32 %v686_v17, 5  ;;  %v688_v19 = vand.u32 31, %v686_v17  ;;  %v1151_v46 = vshrl.u32 %v1150_v33, 5  ;;  %v1152_v47 = vand.u32 31, %v1150_v33 }
  0x33   : > { %v689_v22 = vsub.s32 32, %v688_v19  ;;  %v691_v24 = vshll.u32 %v3241_v23, %v688_v19  ;;  %v694_v26 = vshll.u32 %v3242_v25, %v688_v19  ;;  %v697_v28 = vshll.u32 %v3243_v27, %v688_v19 }
  0x34   : > { %v700_v30 = vshll.u32 %v3244_v29, %v688_v19  ;;  %v703_v32 = vshll.u32 %v3245_v31, %v688_v19  ;;  %vm706_vm2 = vcmp.lt.s32.totalorder %v687_v18, 1  ;;  %vm707_vm3 = vcmp.lt.s32.totalorder %v687_v18, 2 }
  0x35   : > { %v690_v34 = vshrl.u32 %v3241_v23, %v689_v22  ;;  %v692_v35 = vshrl.u32 %v3242_v25, %v689_v22  ;;  %v695_v36 = vshrl.u32 %v3243_v27, %v689_v22  ;;  %v698_v37 = vshrl.u32 %v3244_v29, %v689_v22 }
  0x36   : > { %v701_v38 = vshrl.u32 %v3245_v31, %v689_v22  ;;  %v704_v40 = vshrl.u32 %v3246_v39, %v689_v22  ;;  %vm708_vm4 = vcmp.lt.s32.totalorder %v687_v18, 3  ;;  %vm709_vm5 = vcmp.lt.s32.totalorder %v687_v18, 4 }
  0x37   : > { %v693_v41 = vor.u32 %v692_v35, %v691_v24  ;;  %v696_v42 = vor.u32 %v695_v36, %v694_v26  ;;  %v699_v43 = vor.u32 %v698_v37, %v697_v28  ;;  %v1153_v55 = vsub.s32 32, %v1152_v47 }
  0x38   : > { %v702_v44 = vor.u32 %v701_v38, %v700_v30  ;;  %v705_v45 = vor.u32 %v704_v40, %v703_v32  ;;  %v1155_v59 = vshll.u32 %v3241_v23, %v1152_v47  ;;  %v1158_v11 = vshll.u32 %v3242_v25, %v1152_v47 }
  0x39   : > { %v710_v48 = vsel %vm706_vm2, %v690_v34, %v693_v41  ;;  %v711_v49 = vsel %vm709_vm5, %v699_v43, 2102212464  ;;  %v714_v50 = vsel %vm706_vm2, %v693_v41, %v696_v42  ;;  %v718_v51 = vsel %vm706_vm2, %v696_v42, %v699_v43 }
  0x3a   : > { %v712_v52 = vsel %vm708_vm4, %v696_v42, %v711_v49  ;;  %v715_v53 = vsel %vm709_vm5, %v702_v44, 920167782  ;;  %v719_v54 = vsel %vm709_vm5, %v705_v45, 1326507024  ;;  %v1154_v63 = vshrl.u32 %v3241_v23, %v1153_v55 }
  0x3b   : > { %v713_v56 = vsel %vm707_vm3, %v710_v48, %v712_v52  ;;  %v716_v57 = vsel %vm708_vm4, %v699_v43, %v715_v53  ;;  %v720_v58 = vsel %vm708_vm4, %v702_v44, %v719_v54  ;;  %v1156_v10 = vshrl.u32 %v3242_v25, %v1153_v55 }
  0x3c   : > { %v717_v60 = vsel %vm707_vm3, %v714_v50, %v716_v57  ;;  %v721_v61 = vsel %vm707_vm3, %v718_v51, %v720_v58  ;;  %v729_v62 = vmul.u32 %v3433_v20, %v713_v56  ;;  %v1159_v12 = vshrl.u32 %v3243_v27, %v1153_v55  ;;  %v1525_v56 = vld [vmem:[%s3930_s6] sm:$0xff] }
  0x3d   : > { %v3460_v5 = vmul.u32.u64.low %v3433_v20, %v721_v61  ;;  %v3461_v6 = vmul.u32.u64.high %v3433_v20, %v721_v61, %v3460_v5  ;;  %v3464_v8 = vmul.u32.u64.low %v3433_v20, %v717_v60  ;;  %v3465_v9 = vmul.u32.u64.high %v3433_v20, %v717_v60, %v3464_v8  ;;  %1531 = vperm.xlu0 %3133, %v1525_v56  }
  0x3e   : > { %v1161_v13 = vshll.u32 %v3243_v27, %v1152_v47  ;;  %v1162_v15 = vshrl.u32 %v3244_v29, %v1153_v55  ;;  %v1164_v16 = vshll.u32 %v3244_v29, %v1152_v47  ;;  %v1165_v17 = vshrl.u32 %v3245_v31, %v1153_v55 }
  0x3f   : > { %v1167_v18 = vshll.u32 %v3245_v31, %v1152_v47  ;;  %v1157_v19 = vor.u32 %v1156_v10, %v1155_v59  ;;  %v1160_v20 = vor.u32 %v1159_v12, %v1158_v11  ;;  %v1168_v22 = vshrl.u32 %v3246_v39, %v1153_v55  ;;  %v1526_v59 = vld [vmem:[%s3930_s6 + $0x8] sm:$0xff] }
  0x40   : > { %vm1170_vm6 = vcmp.lt.s32.totalorder %v1151_v46, 1  ;;  %vm731_vm7 = vc.u32 %v3461_v6, %v3464_v8  ;;  %v732_v24 = vadd.s32 1, %v3465_v9  ;;  %v1163_v26 = vor.u32 %v1162_v15, %v1161_v13  ;;  %v1574_v11 = vld [vmem:[%s3931_s8 + $0x8] sm:$0xff] }
  0x41   : > { %v1186_v28 = vshll.u32 %v1146_v21, 8  ;;  %v1166_v30 = vor.u32 %v1165_v17, %v1164_v16  ;;  %v1169_v32 = vor.u32 %v1168_v22, %v1167_v18  ;;  %vm1171_vm8 = vcmp.lt.s32.totalorder %v1151_v46, 2  ;;  %1536 = vperm.xlu0 %3133, %v1526_v59   ;;  %v1575_v16 = vld [vmem:[%s3931_s8 + $0x10] sm:$0xff]  ;;  %v1576_v18 = vld [vmem:[%s3931_s8 + $0x18] sm:$0xff] }
  0x42   : > { %vm1172_vm9 = vcmp.lt.s32.totalorder %v1151_v46, 3  ;;  %v733_v33 = vsel %vm731_vm7, %v732_v24, %v3465_v9  ;;  %vm1173_vm10 = vcmp.lt.s32.totalorder %v1151_v46, 4  ;;  %v1174_v34 = vsel %vm1170_vm6, %v1154_v63, %v1157_v19  ;;  %v1527_v46 = vld [vmem:[%s3930_s6 + $0x10] sm:$0xff]  ;;  %v1573_v9 = vld [vmem:[%s3931_s8] sm:$0xff] }
  0x43   : > { %v1178_v35 = vsel %vm1170_vm6, %v1157_v19, %v1160_v20  ;;  %v734_v36 = vadd.s32 %v733_v33, %v729_v62  ;;  %v1175_v37 = vsel %vm1173_vm10, %v1163_v26, 2102212464  ;;  %v1179_v38 = vsel %vm1173_vm10, %v1166_v30, 920167782  ;;  %1541 = vperm.xlu1 %3134, %v1527_v46   ;;  %v1528_v62 = vld [vmem:[%s3930_s6 + $0x18] sm:$0xff]  ;;  %v2660_v46 = vld [vmem:[%s3901_s18 + $0x8] sm:$0xff] }
  0x44   : > { %v1182_v40 = vsel %vm1170_vm6, %v1160_v20, %v1163_v26  ;;  %v1176_v41 = vsel %vm1172_vm9, %v1160_v20, %v1175_v37  ;;  %v1180_v42 = vsel %vm1172_vm9, %v1163_v26, %v1179_v38  ;;  %v1183_v14 = vsel %vm1173_vm10, %v1169_v32, 1326507024  ;;  %v2612_v37 = vld [vmem:[%s3899_s16 + $0x8] sm:$0xff]  ;;  %s650_s6 = scalar_lea.vmem [#allocation2], %s2915_s0  ;;  %s3180_s0 = sshll.u32 %s3248_s3, 4  ;;  %s3181_s0 = int_to_ptr.vmem [resolvable:$false] %s3180_s0 }
  0x45   : > { %v735_v21 = vadd.s32 536870912, %v734_v36  ;;  %v1181_v43 = vsel %vm1171_vm8, %v1178_v35, %v1180_v42  ;;  %v1184_v44 = vsel %vm1172_vm9, %v1166_v30, %v1183_v14  ;;  %v1177_v45 = vsel %vm1171_vm8, %v1174_v34, %v1176_v41  ;;  %1587 = vperm.xlu0 %3133, %v1573_v9   ;;  %v1691_v30 = vld [vmem:[%s3893_s10] sm:$0x7]  ;;  %v2613_v41 = vld [vmem:[%s3899_s16 + $0x10] sm:$0xff]  ;;  %s2852_s8 = sshll.u32 %s650_s6, 4  ;;  %s3843_s8 = int_to_ptr.vmem [resolvable:$true] %s2852_s8 }
  0x46   : > { %v1185_v47 = vsel %vm1171_vm8, %v1182_v40, %v1184_v44  ;;  %v3489_v48 = vmul.u32.u64.low %v1186_v28, %v1181_v43  ;;  %v3490_v49 = vmul.u32.u64.high %v1186_v28, %v1181_v43, %v3489_v48  ;;  %v1193_v54 = vmul.u32 %v1186_v28, %v1177_v45  ;;  %v2614_v44 = vld [vmem:[%s3899_s16 + $0x18] sm:$0xff]  ;;  %v2776_v9 = vld [vmem:[%s3903_s20] sm:$0x7]  ;;  %p3183_p0 = scmp.lt.s32.totalorder %s3843_s8, %s3181_s0 }
  0x47   : > { %v3492_v50 = vshrl.u32 %v735_v21, 30  ;;  %v3494_v51 = vmul.u32.u64.low %v1186_v28, %v1185_v47  ;;  %v3495_v52 = vmul.u32.u64.high %v1186_v28, %v1185_v47, %v3494_v51  ;;  %1546 = vperm.xlu1 %3134, %v1528_v62   ;;  %v730_v17 = vadd.s32 %v3464_v8, %v3461_v6  ;;  %v2611_v6 = vld [vmem:[%s3899_s16] sm:$0xff] }
  0x48   : > { %v1196_v55 = vadd.s32 1, %v3490_v49  ;;  %vm1139_vm2 = vcmp.le.f32.partialorder %v1138_v7, 0.7853982  ;;  %vm801_vm3 = vcmask 1041408   ;;  %vm766_vm10 = vweird.f32 %v3418_v2 }
  0x49   : > { %v737_v53 = vshll.u32 %v3492_v50, 30  ;;  %vm1195_vm11 = vc.u32 %v3495_v52, %v3489_v48  ;;  %1597 = vperm.xlu0 %3133, %v1575_v16   ;;  %v760_v21 = vsub.s32 4, %v3492_v50  ;;  %v1194_v43 = vadd.s32 %v3489_v48, %v3495_v52 }
  0x4a   : > { %v1197_v58 = vsel %vm1195_vm11, %v1196_v55, %v3490_v49  ;;  %v2659_v49 = vld [vmem:[%s3901_s18] sm:$0xff] }
  0x4b   : > { %v738_v57 = vsub.s32 %v734_v36, %v737_v53  ;;  %v1198_v61 = vadd.s32 %v1197_v58, %v1193_v54  ;;  %1592 = vperm.xlu1 %3134, %v1574_v11   ;;  %v761_v52 = vsel %vm676_vm14, %v760_v21, %v3492_v50  ;;  %v2661_v58 = vld [vmem:[%s3901_s18 + $0x10] sm:$0xff] }
  0x4d   : > { %v740_v60 = vsub.s32 0, %v738_v57  ;;  %v1199_v5 = vadd.s32 536870912, %v1198_v61  ;;  %1699 = vperm.xlu0 %3133, %v1691_v30  }
  0x4f   : > { %v2919_v63 = vmin.u32 %v740_v60, %v738_v57  ;;  %v3519_v12 = vshrl.u32 %v1199_v5, 30  ;;  %1602 = vperm.xlu1 %3134, %v1576_v18   ;;  %v763_v60 = vsel %vm675_vm15, 0, %v761_v52 }
  0x50   : > { %v767_v5 = vadd.s32 3, %v763_v60  ;;  %v1035_v16 = vand.u32 3, %v763_v60 }
  0x51   : > { %v742_v10 = vclz %v2919_v63  ;;  %v1201_v15 = vshll.u32 %v3519_v12, 30  ;;  %2622 = vperm.xlu0 %3133, %v2612_v37   ;;  %v2662_v63 = vld [vmem:[%s3901_s18 + $0x18] sm:$0xff]  ;;  %v1224_v11 = vsub.s32 4, %v3519_v12 }
  0x52   : > { %vm1040_vm5 = vcmp.eq.s32.totalorder %v1035_v16, 2  ;;  %vm1037_vm7 = vcmp.eq.s32.totalorder %v1035_v16, 0  ;;  %vm1036_vm9 = vcmp.lt.s32.totalorder %v1035_v16, 2 }
  0x53   : > { %v2920_v13 = vadd.s32 4294967294, %v742_v10  ;;  %v1202_v20 = vsub.s32 %v1198_v61, %v1201_v15  ;;  %2617 = vperm.xlu1 %3134, %v2611_v6   ;;  %v768_v15 = vand.u32 3, %v767_v5  ;;  %v1225_v18 = vsel %vm1140_vm1, %v1224_v11, %v3519_v12 }
  0x54   : > { %v1227_v30 = vsel %vm1139_vm2, 0, %v1225_v18  ;;  %v3139_v18 = vld [vmem:[%s3933_s28 + $0x8] sm:$0xff]  }
  0x55   : > { %vm2921_vm12 = vcmp.lt.s32.totalorder %v2920_v13, 0  ;;  %v1204_v28 = vsub.s32 0, %v1202_v20  ;;  %2632 = vperm.xlu0 %3133, %v2614_v44   ;;  %vm773_vm4 = vcmp.eq.s32.totalorder %v768_v15, 2  ;;  %vm770_vm6 = vcmp.eq.s32.totalorder %v768_v15, 0 }
  0x56   : > { %v745_v19 = vsel %vm2921_vm12, 0, %v2920_v13  ;;  %vm769_vm8 = vcmp.lt.s32.totalorder %v768_v15, 2 }
  0x57   : > { %v746_v22 = vsub.s32 32, %v745_v19  ;;  %v747_v24 = vshll.u32 %v738_v57, %v745_v19  ;;  %v750_v26 = vsub.s32 4294967266, %v745_v19  ;;  %v2939_v8 = vmin.u32 %v1204_v28, %v1202_v20  ;;  %2627 = vperm.xlu1 %3134, %v2613_v41  }
  0x58   : > { %v3247_v19 = vmov 65535  }
  0x59   : > { %v748_v32 = vshrl.u32 %v730_v17, %v746_v22  ;;  %v751_v33 = vadd.s32 127, %v750_v26  ;;  %v1206_v36 = vclz %v2939_v8  ;;  %2678 = vperm.xlu0 %3133, %v2660_v46   ;;  %v665_v22 = vcombine.high %v3415_v1, %v3415_v1 }
  0x5a   : > { %v1231_v8 = vadd.s32 3, %v1227_v30 }
  0x5b   : > { %v749_v34 = vor.u32 %v748_v32, %v747_v24  ;;  %v752_v35 = vshll.u32 %v751_v33, 23  ;;  %v2940_v42 = vadd.s32 4294967294, %v1206_v36  ;;  %2673 = vperm.xlu1 %3134, %v2659_v49  }
  0x5c   : > { %v1232_v44 = vand.u32 3, %v1231_v8 }
  0x5d   : > { %v753_v38 = vor.u32 4788187, %v752_v35  ;;  %v756_v40 = vcvt.s32.f32 %v749_v34  ;;  %vm2941_vm13 = vcmp.lt.s32.totalorder %v2940_v42, 0  ;;  %2688 = vperm.xlu0 %3133, %v2662_v63  }
  0x5e   : > { %v1209_v47 = vsel %vm2941_vm13, 0, %v2940_v42  ;;  %v668_v42 = vpack.c.bf16 %v665_v22, %v665_v22  ;;  %vm1237_vm11 = vcmp.eq.s32.totalorder %v1232_v44, 2  ;;  %vm1234_vm12 = vcmp.eq.s32.totalorder %v1232_v44, 0 }
  0x5f   : > { %v754_v14 = vand.u32 2147483647, %v753_v38  ;;  %v1210_v51 = vsub.s32 32, %v1209_v47  ;;  %v1211_v53 = vshll.u32 %v1202_v20, %v1209_v47  ;;  %v1214_v54 = vsub.s32 4294967266, %v1209_v47  ;;  %2683 = vperm.xlu1 %3134, %v2661_v58  }
  0x60   : > { %v802_v20 = vsel %vm800_vm0, 4294967295, %v3247_v19  ;;  %v667_v47 = vpack.c.bf16 %v3415_v1, %v3415_v1  ;;  %vm793_vm13 = vcmask 23552  }
  0x61   : > { %v757_v45 = vmul.f32 %v756_v40, %v754_v14  ;;  %v1212_v55 = vshrl.u32 %v1194_v43, %v1210_v51  ;;  %v1215_v56 = vadd.s32 127, %v1214_v54  ;;  %v3577_v40 = vsel %vm801_vm3, %v802_v20, 0 }
  0x62   : > { %v880_v46 = vand.u32 %v3577_v40, %v667_v47  ;;  %vm1615_vm3 = vcmask 261120  }
  0x63   : > { %v758_v48 = vxor.u32 2147483648, %v757_v45  ;;  %v1213_v4 = vor.u32 %v1212_v55, %v1211_v53  ;;  %v1216_v61 = vshll.u32 %v1215_v56, 23  ;;  %2784 = vperm.xlu1 %3134, %v2776_v9   ;;  %v883_v53 = vand.u32 %v3577_v40, %v668_v42  ;;  %v3135_v55 = vld [vmem:[%s3932_s4] sm:$0xff]  }
  0x64   : > { %v3138_v9 = vld [vmem:[%s3933_s28] sm:$0xff]  }
  0x65   : > { %v759_v57 = vsel %vm676_vm14, %v758_v48, %v757_v45  ;;  %v1217_v50 = vor.u32 4788187, %v1216_v61  ;;  %v1220_v62 = vcvt.s32.f32 %v1213_v4  ;;  %vm1233_vm14 = vcmp.lt.s32.totalorder %v1232_v44, 2  ;;  %v3137_v61 = vld [vmem:[%s3932_s4 + $0x8] sm:$0xff]   ;;  %s3936_s4 = smov %s3935_s26 }
  0x66   : > { %v762_v59 = vsel %vm675_vm15, %v3418_v2, %v759_v57  ;;  %vm1230_vm15 = vweird.f32 %v3421_v3 }
  0x67   : > { %3160 = vcosq.f32 %v762_v59  ;;  %v1218_v10 = vand.u32 2147483647, %v1217_v50 }
  0x68   : > { %3162 = vsinq.f32 %v762_v59 }
  0x69   : > { %v1221_v13 = vmul.f32 %v1220_v62, %v1218_v10  ;;  %v1427_v62 = vand.u32 3, %v1227_v30 }
  0x6b   : > { %v1222_v17 = vxor.u32 2147483648, %v1221_v13  ;;  %vm1429_vm0 = vcmp.eq.s32.totalorder %v1427_v62, 0 }
  0x6d   : > { %v1223_v24 = vsel %vm1140_vm1, %v1222_v17, %v1221_v13  ;;  %vm1432_vm1 = vcmp.eq.s32.totalorder %v1427_v62, 2 }
  0x6e   : > { %v1226_v28 = vsel %vm1139_vm2, %v3421_v3, %v1223_v24  ;;  %vm1428_vm2 = vcmp.lt.s32.totalorder %v1427_v62, 2  ;;  %v3140_v24 = vld [vmem:[%s3934_s1] sm:$0xff]  }
  0x6f   : > { %3164 = vcosq.f32 %v1226_v28 }
  0x70   : > { %3166 = vsinq.f32 %v1226_v28  ;;  %v3141_v28 = vld [vmem:[%s3934_s1 + $0x8] sm:$0xff]   ;;  %s3937_s1 = sld [smem:[#allocation11_spill]] }
  0x71   : > { %v3161_v26 = vpop.eup %3160 }
  0x72   : > { %v3163_v32 = vpop.eup %3162  ;;  %v774_v33 = vxor.u32 2147483648, %v3161_v26 }
  0x73   : > { %v771_v7 = vxor.u32 2147483648, %v3163_v32 }
  0x74   : > { %v775_v12 = vsel %vm773_vm4, %v774_v33, %v3163_v32  ;;  %v1042_v6 = vsel %vm1040_vm5, %v774_v33, %v3163_v32  ;;  %v3142_v32 = vld [vmem:[%s3935_s26] sm:$0xff]  }
  0x75   : > { %v772_v34 = vsel %vm770_vm6, %v3161_v26, %v771_v7  ;;  %v1039_v35 = vsel %vm1037_vm7, %v3161_v26, %v771_v7  ;;  %v3143_v7 = vld [vmem:[%s3936_s4 + $0x8] sm:$0xff]   ;;  %s2838_s4 = scalar_lea.sflag [#allocation3], %s648_s30 }
  0x76   : > { %v776_v36 = vsel %vm769_vm8, %v772_v34, %v775_v12  ;;  %v1043_v37 = vsel %vm1036_vm9, %v1039_v35, %v1042_v6  ;;  %v3144_v12 = vld [vmem:[%s3937_s1] sm:$0xff]   ;;  %v3145_v6 = vld [vmem:[%s3937_s1 + $0x8] sm:$0xff]   ;;  %s3841_s1 = scalar_lea.hbm %s3904_s21, %s3005_s23 }
  0x77   : > { %v777_v38 = vsel %vm766_vm10, nan, %v776_v36  ;;  %v1044_v41 = vsel %vm766_vm10, nan, %v1043_v37 }
  0x78   : > { %v779_v14 = vcombine.high %v777_v38, %v777_v38  ;;  %v781_v21 = vpack.c.bf16 %v777_v38, %v777_v38  ;;  %v1046_v43 = vcombine.high %v1044_v41, %v1044_v41  ;;  %v1048_v63 = vpack.c.bf16 %v1044_v41, %v1044_v41 }
  0x79   : > { %v3165_v49 = vpop.eup %3164 }
  0x7a   : > { %v782_v45 = vpack.c.bf16 %v779_v14, %v779_v14  ;;  %v805_v2 = vand.u32 %v3577_v40, %v781_v21  ;;  %v1049_v54 = vpack.c.bf16 %v1046_v43, %v1046_v43  ;;  %v3167_v48 = vpop.eup %3166  ;;  %v1238_v52 = vxor.u32 2147483648, %v3165_v49 }
  0x7b   : > { %v1235_v56 = vxor.u32 2147483648, %v3167_v48  ;;  %v1067_v10 = vand.u32 %v1048_v63, %v3577_v40 }
  0x7c   : > { %v808_v51 = vand.u32 %v3577_v40, %v782_v45  ;;  %v1239_v57 = vsel %vm1237_vm11, %v1238_v52, %v3167_v48  ;;  %v1070_v58 = vand.u32 %v1049_v54, %v3577_v40  ;;  %v1434_v13 = vsel %vm1432_vm1, %v1238_v52, %v3167_v48 }
  0x7d   : > { %v1236_v59 = vsel %vm1234_vm12, %v3165_v49, %v1235_v56  ;;  %v1431_v11 = vsel %vm1429_vm0, %v3165_v49, %v1235_v56 }
  0x7e   : > { %810 = vmatprep.subr.bf16.mxu0 %v808_v51  ;;  %v1240_v60 = vsel %vm1233_vm14, %v1236_v59, %v1239_v57  ;;  %v1435_v16 = vsel %vm1428_vm2, %v1431_v11, %v1434_v13 }
  0x7f   : > { %811 = vmatpush1.bf16.msra.mxu0 %v805_v2  ;;  %v1241_v4 = vsel %vm1230_vm15, nan, %v1240_v60  ;;  %v1436_v17 = vsel %vm1230_vm15, nan, %v1435_v16 }
  0x80   : > { %885 = vmatprep.subr.bf16.mxu0 %v883_v53  ;;  %v1243_v50 = vcombine.high %v1241_v4, %v1241_v4  ;;  %v1438_v19 = vcombine.high %v1436_v17, %v1436_v17  ;;  %v1245_v20 = vpack.c.bf16 %v1241_v4, %v1241_v4  ;;  %v1440_v30 = vpack.c.bf16 %v1436_v17, %v1436_v17  ;;  %v3146_v17 = vld [vmem:[%s3938_s7] sm:$0xff]  }
  0x82   : > { %2924 = vmatmul.mubr.msk.bf16.vlgmr.msra.gmra.mrb[0].mxu0 %vm793_vm13, %v3135_v55  ;;  %v1246_v5 = vpack.c.bf16 %v1243_v50, %v1243_v50  ;;  %v1441_v22 = vpack.c.bf16 %v1438_v19, %v1438_v19  ;;  %v1264_v26 = vand.u32 %v1245_v20, %v3577_v40  ;;  %v1459_v33 = vand.u32 %v1440_v30, %v3577_v40 }
  0x83   : > { %886 = vmatpush1.bf16.msra.mxu0 %v880_v46  ;;  %852 = vmatprep.mubr.bf16.mxu0 %v3240_v0 }
  0x84   : > { %1072 = vmatprep.subr.bf16.mxu0 %v1070_v58  ;;  %v1267_v15 = vand.u32 %v1246_v5, %v3577_v40  ;;  %v1462_v3 = vand.u32 %v1441_v22, %v3577_v40 }
  0x8a   : > { %2925 = vmatmul.mubr.msk.bf16.gmra.mrb[4].mxu0 %vm793_vm13, %v3137_v61 }
  0x8b   : > { %917 = vmatprep.mubr.bf16.mxu0 %v3240_v0 }
  0x92   : > { %2928 = vmatmul.mubr.msk.bf16.vlgmr.msra.gmra.mrb[0].mxu0 %vm793_vm13, %v3138_v9 }
  0x93   : > { %1073 = vmatpush1.bf16.msra.mxu0 %v1067_v10  ;;  %927 = vmatprep.mubr.bf16.mxu0 %v3240_v0 }
  0x94   : > { %1269 = vmatprep.subr.bf16.mxu0 %v1267_v15 }
  0x9a   : > { %2929 = vmatmul.mubr.msk.bf16.gmra.mrb[4].mxu0 %vm793_vm13, %v3139_v18  ;;  %v3147_v18 = vld [vmem:[%s3938_s7 + $0x8] sm:$0xff]   ;;  %s3176_s7 = scalar_lea.vmem %s3843_s8, 128 }
  0x9b   : > { %1104 = vmatprep.mubr.bf16.mxu0 %v3240_v0  ;;  %p3177_p11 = scmp.ne.s32.totalorder %s3843_s8, %s3176_s7 }
  0x9d   : > { %p3178_p12 = pnand %p3177_p11, %p3397_p5 }
  0x9f   : > { %p3179_p13 = pneg %p3178_p12 }
  0xa2   : > { %2936 = vmatmul.mubr.msk.bf16.vlgmr.msra.gmra.mrb[0].mxu0 %vm793_vm13, %v3140_v24 }
  0xa3   : > { %1270 = vmatpush1.bf16.msra.mxu0 %v1264_v26  ;;  %1114 = vmatprep.mubr.bf16.mxu0 %v3240_v0 }
  0xa4   : > { %1464 = vmatprep.subr.bf16.mxu0 %v1462_v3 }
  0xaa   : > { %2937 = vmatmul.mubr.msk.bf16.gmra.mrb[4].mxu0 %vm793_vm13, %v3141_v28 }
  0xab   : > { %1301 = vmatprep.mubr.bf16.mxu0 %v3240_v0 }
  0xb2   : > { %2944 = vmatmul.mubr.msk.bf16.vlgmr.msra.gmra.mrb[0].mxu0 %vm793_vm13, %v3142_v32 }
  0xb3   : > { %1465 = vmatpush1.bf16.msra.mxu0 %v1459_v33  ;;  %1311 = vmatprep.mubr.bf16.mxu0 %v3240_v0 }
  0xba   : > { %2945 = vmatmul.mubr.msk.bf16.gmra.mrb[4].mxu0 %vm793_vm13, %v3143_v7 }
  0xbb   : > { %1496 = vmatprep.mubr.bf16.mxu0 %v3240_v0 }
  0xbc   : > { %v1532_v8 = vpop.permute.xlu0 %1531 }
  0xc0   : > { %v1537_v37 = vpop.permute.xlu0 %1536 }
  0xc2   : > { %2952 = vmatmul.mubr.msk.bf16.vlgmr.msra.gmra.mrb[0].mxu0 %vm793_vm13, %v3144_v12  ;;  %v1542_v43 = vpop.permute.xlu1 %1541 }
  0xc3   : > { %1506 = vmatprep.mubr.bf16.mxu0 %v3240_v0 }
  0xc4   : > { %v1588_v19 = vpop.permute.xlu0 %1587 }
  0xc6   : > { %v1547_v46 = vpop.permute.xlu1 %1546 }
  0xca   : > { %2953 = vmatmul.mubr.msk.bf16.gmra.mrb[4].mxu0 %vm793_vm13, %v3145_v6  ;;  %v1593_v26 = vpop.permute.xlu1 %1592 }
  0xcb   : > { %2739 = vmatprep.mubr.bf16.mxu0 %v3240_v0 }
 0x195   : > { %v1498_v34 = vpop.f32.mrb[0].mxu0 }
 0x196   : > { %v1549_v35 = vadd.f32 %v1532_v8, %v1498_v34  ;;  %v1500_v36 = vpop.f32.mrb[1].mxu0 }
 0x197   : > { %v1550_v38 = vadd.f32 %v1532_v8, %v1500_v36  ;;  %v1502_v41 = vpop.f32.mrb[2].mxu0  ;;  %v1598_v36 = vpop.permute.xlu0 %1597 }
 0x198   : > { %v1557_v42 = vmul.f32 0.01, %v1549_v35  ;;  %v1551_v14 = vadd.f32 %v1537_v37, %v1502_v41  ;;  %v1504_v21 = vpop.f32.mrb[3].mxu0 }
 0x199   : > { %v1558_v44 = vmul.f32 0.01, %v1550_v38  ;;  %v1552_v45 = vadd.f32 %v1537_v37, %v1504_v21 }
 0x19a   : > { %v1559_v2 = vmul.f32 0.01, %v1551_v14  ;;  %v1565_v49 = vmax.f32 %v1549_v35, %v1557_v42 }
 0x19b   : > { %v1560_v47 = vmul.f32 0.01, %v1552_v45  ;;  %v1566_v54 = vmax.f32 %v1550_v38, %v1558_v44 }
 0x19c   : > { %v1567_v51 = vmax.f32 %v1551_v14, %v1559_v2 }
 0x19d   : > { %v1508_v53 = vpop.f32.mrb[4].mxu0  ;;  %v1568_v48 = vmax.f32 %v1552_v45, %v1560_v47 }
 0x19e   : > { %v1553_v52 = vadd.f32 %v1542_v43, %v1508_v53  ;;  %v1510_v55 = vpop.f32.mrb[5].mxu0  ;;  %v1581_v56 = vpack.c.bf16 %v1567_v51, %v1565_v49 }
 0x19f   : > { %v1554_v57 = vadd.f32 %v1542_v43, %v1510_v55  ;;  %v1512_v58 = vpop.f32.mrb[6].mxu0  ;;  %v1582_v59 = vpack.c.bf16 %v1568_v48, %v1566_v54  ;;  %v1603_v43 = vpop.permute.xlu1 %1602 }
 0x1a0   : > { %v1561_v60 = vmul.f32 0.01, %v1553_v52  ;;  %v1555_v4 = vadd.f32 %v1547_v46, %v1512_v58  ;;  %v1514_v61 = vpop.f32.mrb[7].mxu0 }
 0x1a1   : > { %v1562_v50 = vmul.f32 0.01, %v1554_v57  ;;  %v1556_v62 = vadd.f32 %v1547_v46, %v1514_v61  ;;  %1622 = vmatprep.subr.bf16.mxu1 %v1582_v59 }
 0x1a2   : > { %v1563_v63 = vmul.f32 0.01, %v1555_v4  ;;  %1623 = vmatpush1.bf16.msra.mxu1 %v1581_v56  ;;  %v1569_v9 = vmax.f32 %v1553_v52, %v1561_v60  ;;  %v1692_v60 = vld [vmem:[%s3939_s9] sm:$0x3]  ;;  %s3182_s9 = scalar_lea.vmem %s3181_s0, 256 }
 0x1a3   : > { %v1564_v5 = vmul.f32 0.01, %v1556_v62  ;;  %v1570_v11 = vmax.f32 %v1554_v57, %v1562_v50  ;;  %p3184_p1 = scmp.lt.s32.totalorder %s3182_s9, %s3176_s7 }
 0x1a4   : > { %v1571_v10 = vmax.f32 %v1555_v4, %v1563_v63  ;;  %v1700_v4 = vpop.permute.xlu0 %1699 }
 0x1a5   : > { %v1572_v13 = vmax.f32 %v1556_v62, %v1564_v5  ;;  %p3185_p2 = por %p3184_p1, %p3183_p0 }
 0x1a6   : > { %v1583_v15 = vpack.c.bf16 %v1571_v10, %v1569_v9 }
 0x1a7   : > { %v1584_v16 = vpack.c.bf16 %v1572_v13, %v1570_v11  ;;  %p3186_p3 = pnand %p3185_p2, %p3179_p13 }
 0x1a9   : > { %1624 = vmatprep.subr.bf16.mxu1 %v1584_v16 }
 0x1aa   : > { %1625 = vmatpush1.bf16.msra.mxu1 %v1583_v15 }
 0x1ad   : > { %2956 = vmatmul.mubr.msk.bf16.vlgmr.msra.gmra.mrb[0].mxu1 %vm1615_vm3, %v3146_v17 }
 0x1ae   : > { %1664 = vmatprep.mubr.bf16.mxu1 %v3240_v0 }
 0x1b5   : > { %2957 = vmatmul.mubr.msk.bf16.gmra.mrb[4].mxu1 %vm1615_vm3, %v3147_v18 }
 0x1b6   : > { %1737 = vmatprep.mubr.bf16.mxu1 %v3240_v0 }
 0x280   : > { %v1656_v20 = vpop.f32.mrb[0].mxu1 }
 0x281   : > { %v1657_v22 = vadd.f32 %v1656_v20, %v1588_v19  ;;  %v1658_v24 = vpop.f32.mrb[1].mxu1 }
 0x282   : > { %v1659_v3 = vadd.f32 %v1658_v24, %v1588_v19  ;;  %v1660_v28 = vpop.f32.mrb[2].mxu1 }
 0x283   : > { %v1675_v30 = vmul.f32 0.01, %v1657_v22  ;;  %v1661_v32 = vadd.f32 %v1660_v28, %v1593_v26  ;;  %v1662_v33 = vpop.f32.mrb[3].mxu1 }
 0x284   : > { %v1676_v7 = vmul.f32 0.01, %v1659_v3  ;;  %v1663_v12 = vadd.f32 %v1662_v33, %v1593_v26 }
 0x285   : > { %v1677_v6 = vmul.f32 0.01, %v1661_v32  ;;  %v1683_v34 = vmax.f32 %v1657_v22, %v1675_v30 }
 0x286   : > { %v1678_v8 = vmul.f32 0.01, %v1663_v12  ;;  %v1684_v37 = vmax.f32 %v1659_v3, %v1676_v7 }
 0x287   : > { %v1685_v35 = vmax.f32 %v1661_v32, %v1677_v6 }
 0x288   : > { %v1686_v38 = vmax.f32 %v1663_v12, %v1678_v8  ;;  %v1666_v41 = vpop.f32.mrb[4].mxu1 }
 0x289   : > { %v1693_v42 = vpack.c.bf16 %v1685_v35, %v1683_v34  ;;  %v1667_v14 = vadd.f32 %v1666_v41, %v1598_v36  ;;  %v1668_v21 = vpop.f32.mrb[5].mxu1 }
 0x28a   : > { %v1669_v44 = vadd.f32 %v1668_v21, %v1598_v36  ;;  %v1670_v45 = vpop.f32.mrb[6].mxu1  ;;  %v1694_v2 = vpack.c.bf16 %v1686_v38, %v1684_v37 }
 0x28b   : > { %v1679_v47 = vmul.f32 0.01, %v1667_v14  ;;  %v1671_v49 = vadd.f32 %v1670_v45, %v1603_v43  ;;  %v1672_v51 = vpop.f32.mrb[7].mxu1 }
 0x28c   : > { %v1680_v53 = vmul.f32 0.01, %v1669_v44  ;;  %v1673_v54 = vadd.f32 %v1672_v51, %v1603_v43  ;;  %1705 = vmatprep.subr.bf16.mxu1 %v1694_v2 }
 0x28d   : > { %v1681_v48 = vmul.f32 0.01, %v1671_v49  ;;  %1706 = vmatpush1.bf16.msra.mxu1 %v1693_v42  ;;  %v1687_v55 = vmax.f32 %v1667_v14, %v1679_v47 }
 0x28e   : > { %v1682_v52 = vmul.f32 0.01, %v1673_v54  ;;  %v1688_v46 = vmax.f32 %v1669_v44, %v1680_v53 }
 0x28f   : > { %v1689_v56 = vmax.f32 %v1671_v49, %v1681_v48 }
 0x290   : > { %v1690_v57 = vmax.f32 %v1673_v54, %v1682_v52 }
 0x291   : > { %v1695_v58 = vpack.c.bf16 %v1689_v56, %v1687_v55 }
 0x292   : > { %v1696_v59 = vpack.c.bf16 %v1690_v57, %v1688_v46 }
 0x294   : > { %1707 = vmatprep.subr.bf16.mxu1 %v1696_v59 }
 0x295   : > { %1708 = vmatpush1.bf16.msra.mxu1 %v1695_v58 }
 0x298   : > { %2958 = vmatmul.mubr.msk.bf16.vlgmr.msra.gmra.mrb[8].mxu1 %vm1615_vm3, %v1692_v60 }
 0x299   : > { %1928 = vmatprep.mubr.bf16.mxu1 %v3240_v0 }
 0x36b   : > { %v1739_v61 = vpop.f32.mrb[8].mxu1 }
 0x36c   : > { %v1740_v50 = vadd.f32 %v1739_v61, %v1700_v4  ;;  %v1741_v62 = vpop.f32.mrb[9].mxu1 }
 0x36d   : > { %v1742_v63 = vadd.f32 %v1741_v62, %v1700_v4  ;;  %v1743_v5 = vpop.f32.mrb[10].mxu1 }
 0x36e   : > { %v1744_v9 = vpop.f32.mrb[11].mxu1 }
 0x36f   : > { %v1748_v10 = vcombine.low %v1740_v50, %v1742_v63 }
 0x371   : > { %v3662_v11 = vadd.f32 %v1748_v10, %v3415_v1 }
 0x373   : > { %v3665_v13 = vmul.f32 3.1415927, %v3662_v11  ;;  %v3668_v15 = vmul.f32 6.2831855, %v3662_v11 }
 0x375   : > { %v1768_v16 = vand.u32 2139095040, %v3665_v13  ;;  %v2227_v17 = vand.u32 2139095040, %v3668_v15  ;;  %v1765_v18 = vand.u32 2147483647, %v3665_v13  ;;  %v2224_v19 = vand.u32 2147483647, %v3668_v15 }
 0x377   : > { %v1769_v20 = vshrl.u32 %v1768_v16, 23  ;;  %v2228_v22 = vshrl.u32 %v2227_v17, 23  ;;  %v1772_v1 = vand.u32 8388607, %v1765_v18  ;;  %v2231_v3 = vand.u32 8388607, %v2224_v19 }
 0x379   : > { %v2959_v24 = vadd.s32 4294967169, %v1769_v20  ;;  %v2979_v26 = vadd.s32 4294967169, %v2228_v22  ;;  %v1773_v32 = vor.u32 8388608, %v1772_v1  ;;  %v2232_v33 = vor.u32 8388608, %v2231_v3 }
 0x37b   : > { %v1775_v28 = vadd.s32 1, %v2959_v24  ;;  %v2234_v30 = vadd.s32 1, %v2979_v26  ;;  %v3680_v37 = vshll.u32 %v1773_v32, 8  ;;  %v3682_v38 = vshll.u32 %v2232_v33, 8 }
 0x37d   : > { %vm1776_vm4 = vcmp.gt.s32.totalorder %v1775_v28, 0  ;;  %vm2235_vm5 = vcmp.gt.s32.totalorder %v2234_v30, 0 }
 0x37e   : > { %v1777_v7 = vsel %vm1776_vm4, %v1775_v28, 0  ;;  %v2236_v12 = vsel %vm2235_vm5, %v2234_v30, 0  ;;  %vm1767_vm4 = vcmp.lt.s32.totalorder %v3665_v13, 0  ;;  %vm1766_vm5 = vcmp.le.f32.partialorder %v1765_v18, 0.7853982 }
 0x37f   : > { %v1779_v6 = vand.u32 31, %v1777_v7  ;;  %v2238_v8 = vand.u32 31, %v2236_v12  ;;  %v1778_v34 = vshrl.u32 %v1777_v7, 5  ;;  %v3678_v36 = vshrl.u32 %v2236_v12, 5 }
 0x381   : > { %v1780_v35 = vsub.s32 32, %v1779_v6  ;;  %v2239_v41 = vsub.s32 32, %v2238_v8  ;;  %v1782_v42 = vshll.u32 %v3241_v23, %v1779_v6  ;;  %v1785_v14 = vshll.u32 %v3242_v25, %v1779_v6 }
 0x382   : > { %v1788_v21 = vshll.u32 %v3243_v27, %v1779_v6  ;;  %v1791_v2 = vshll.u32 %v3244_v29, %v1779_v6  ;;  %v1794_v49 = vshll.u32 %v3245_v31, %v1779_v6  ;;  %vm1797_vm6 = vcmp.lt.s32.totalorder %v1778_v34, 1 }
 0x383   : > { %v1783_v43 = vshrl.u32 %v3242_v25, %v1780_v35  ;;  %v1786_v44 = vshrl.u32 %v3243_v27, %v1780_v35  ;;  %v1789_v45 = vshrl.u32 %v3244_v29, %v1780_v35  ;;  %v1792_v47 = vshrl.u32 %v3245_v31, %v1780_v35 }
 0x384   : > { %v1795_v51 = vshrl.u32 %v3246_v39, %v1780_v35  ;;  %v1781_v53 = vshrl.u32 %v3241_v23, %v1780_v35  ;;  %vm1799_vm7 = vcmp.lt.s32.totalorder %v1778_v34, 3  ;;  %vm1800_vm8 = vcmp.lt.s32.totalorder %v1778_v34, 4 }
 0x385   : > { %v1784_v54 = vor.u32 %v1783_v43, %v1782_v42  ;;  %v1787_v48 = vor.u32 %v1786_v44, %v1785_v14  ;;  %v1790_v52 = vor.u32 %v1789_v45, %v1788_v21  ;;  %v1793_v55 = vor.u32 %v1792_v47, %v1791_v2 }
 0x386   : > { %v1796_v56 = vor.u32 %v1795_v51, %v1794_v49  ;;  %v2242_v50 = vshrl.u32 %v3242_v25, %v2239_v41  ;;  %vm1798_vm9 = vcmp.lt.s32.totalorder %v1778_v34, 2  ;;  %v2241_v5 = vshll.u32 %v3241_v23, %v2238_v8 }
 0x387   : > { %v1801_v46 = vsel %vm1797_vm6, %v1781_v53, %v1784_v54  ;;  %v1802_v57 = vsel %vm1800_vm8, %v1790_v52, 2102212464  ;;  %v1805_v58 = vsel %vm1797_vm6, %v1784_v54, %v1787_v48  ;;  %v1809_v59 = vsel %vm1797_vm6, %v1787_v48, %v1790_v52 }
 0x388   : > { %v1803_v60 = vsel %vm1799_vm7, %v1787_v48, %v1802_v57  ;;  %v1806_v4 = vsel %vm1800_vm8, %v1793_v55, 920167782  ;;  %v1810_v61 = vsel %vm1800_vm8, %v1796_v56, 1326507024  ;;  %v2244_v17 = vshll.u32 %v3242_v25, %v2238_v8 }
 0x389   : > { %v1807_v62 = vsel %vm1799_vm7, %v1790_v52, %v1806_v4  ;;  %v1811_v63 = vsel %vm1799_vm7, %v1793_v55, %v1810_v61  ;;  %v1804_v9 = vsel %vm1798_vm9, %v1801_v46, %v1803_v60  ;;  %v2243_v1 = vor.u32 %v2242_v50, %v2241_v5 }
 0x38a   : > { %v1808_v10 = vsel %vm1798_vm9, %v1805_v58, %v1807_v62  ;;  %v1812_v16 = vsel %vm1798_vm9, %v1809_v59, %v1811_v63  ;;  %v2245_v3 = vshrl.u32 %v3243_v27, %v2239_v41  ;;  %v2247_v28 = vshll.u32 %v3243_v27, %v2238_v8 }
 0x38b   : > { %v3699_v20 = vmul.u32.u64.low %v3680_v37, %v1812_v16  ;;  %v3700_v22 = vmul.u32.u64.high %v3680_v37, %v1812_v16, %v3699_v20  ;;  %v3703_v24 = vmul.u32.u64.low %v3680_v37, %v1808_v10  ;;  %v3704_v26 = vmul.u32.u64.high %v3680_v37, %v1808_v10, %v3703_v24 }
 0x38c   : > { %v2248_v30 = vshrl.u32 %v3244_v29, %v2239_v41  ;;  %v2240_v32 = vshrl.u32 %v3241_v23, %v2239_v41  ;;  %v2250_v33 = vshll.u32 %v3244_v29, %v2238_v8  ;;  %v2251_v25 = vshrl.u32 %v3245_v31, %v2239_v41 }
 0x38d   : > { %v2254_v7 = vshrl.u32 %v3246_v39, %v2239_v41  ;;  %v1820_v12 = vmul.u32 %v3680_v37, %v1804_v9  ;;  %v2246_v6 = vor.u32 %v2245_v3, %v2244_v17  ;;  %v2253_v35 = vshll.u32 %v3245_v31, %v2238_v8 }
 0x38e   : > { %v2249_v34 = vor.u32 %v2248_v30, %v2247_v28  ;;  %vm1822_vm10 = vc.u32 %v3700_v22, %v3703_v24  ;;  %v1823_v27 = vadd.s32 1, %v3704_v26  ;;  %v2252_v42 = vor.u32 %v2251_v25, %v2250_v33 }
 0x38f   : > { %vm2256_vm11 = vcmp.lt.s32.totalorder %v3678_v36, 1  ;;  %v2255_v23 = vor.u32 %v2254_v7, %v2253_v35  ;;  %vm2258_vm12 = vcmp.lt.s32.totalorder %v3678_v36, 3  ;;  %vm2259_vm14 = vcmp.lt.s32.totalorder %v3678_v36, 4 }
 0x390   : > { %v2264_v29 = vsel %vm2256_vm11, %v2243_v1, %v2246_v6  ;;  %v1824_v39 = vsel %vm1822_vm10, %v1823_v27, %v3704_v26  ;;  %v2261_v37 = vsel %vm2259_vm14, %v2249_v34, 2102212464  ;;  %v2265_v41 = vsel %vm2259_vm14, %v2252_v42, 920167782 }
 0x391   : > { %v2268_v14 = vsel %vm2256_vm11, %v2246_v6, %v2249_v34  ;;  %v1825_v21 = vadd.s32 %v1824_v39, %v1820_v12  ;;  %vm2257_vm15 = vcmp.lt.s32.totalorder %v3678_v36, 2  ;;  %v2266_v31 = vsel %vm2258_vm12, %v2249_v34, %v2265_v41 }
 0x392   : > { %v2269_v8 = vsel %vm2259_vm14, %v2255_v23, 1326507024  ;;  %v2260_v43 = vsel %vm2256_vm11, %v2240_v32, %v2243_v1  ;;  %v2262_v44 = vsel %vm2258_vm12, %v2246_v6, %v2261_v37  ;;  %v2267_v45 = vsel %vm2257_vm15, %v2264_v29, %v2266_v31 }
 0x393   : > { %v2270_v2 = vsel %vm2258_vm12, %v2252_v42, %v2269_v8  ;;  %v1826_v47 = vadd.s32 536870912, %v1825_v21  ;;  %v3723_v51 = vmul.u32.u64.low %v3682_v38, %v2267_v45  ;;  %v3724_v53 = vmul.u32.u64.high %v3682_v38, %v2267_v45, %v3723_v51 }
 0x394   : > { %v2271_v49 = vsel %vm2257_vm15, %v2268_v14, %v2270_v2  ;;  %v2263_v55 = vsel %vm2257_vm15, %v2260_v43, %v2262_v44  ;;  %v1821_v17 = vadd.s32 %v3703_v24, %v3700_v22  ;;  %vm2226_vm6 = vcmp.lt.s32.totalorder %v3668_v15, 0 }
 0x395   : > { %v3727_v54 = vmul.u32.u64.low %v3682_v38, %v2271_v49  ;;  %v3728_v48 = vmul.u32.u64.high %v3682_v38, %v2271_v49, %v3727_v54  ;;  %v1827_v52 = vshrl.u32 %v1826_v47, 30  ;;  %v2282_v36 = vadd.s32 1, %v3724_v53 }
 0x396   : > { %v2279_v46 = vmul.u32 %v3682_v38, %v2263_v55  ;;  %vm3743_vm7 = vcmp.le.f32.partialorder %v2224_v19, 0.7853982  ;;  %vm1857_vm15 = vweird.f32 %v3665_v13 }
 0x397   : > { %v1828_v56 = vshll.u32 %v1827_v52, 30  ;;  %vm2281_vm0 = vc.u32 %v3728_v48, %v3723_v51  ;;  %v2280_v35 = vadd.s32 %v3723_v51, %v3728_v48  ;;  %v1851_v24 = vsub.s32 4, %v1827_v52 }
 0x398   : > { %v2283_v58 = vsel %vm2281_vm0, %v2282_v36, %v3724_v53 }
 0x399   : > { %v1829_v57 = vsub.s32 %v1825_v21, %v1828_v56  ;;  %v2284_v59 = vadd.s32 %v2283_v58, %v2279_v46  ;;  %v1852_v31 = vsel %vm1767_vm4, %v1851_v24, %v1827_v52  ;;  %v3149_v24 = vld [vmem:[%s3894_s11 + $0x8] sm:$0xff]  }
 0x39a   : > { %v1854_v44 = vsel %vm1766_vm5, 0, %v1852_v31 }
 0x39b   : > { %v1831_v60 = vsub.s32 0, %v1829_v57  ;;  %v2285_v4 = vadd.s32 536870912, %v2284_v59  ;;  %v1858_v49 = vadd.s32 3, %v1854_v44  ;;  %v2121_v52 = vand.u32 3, %v1854_v44 }
 0x39d   : > { %v2960_v61 = vmin.u32 %v1831_v60, %v1829_v57  ;;  %v2286_v50 = vshrl.u32 %v2285_v4, 30  ;;  %v1859_v48 = vand.u32 3, %v1858_v49  ;;  %vm2122_vm9 = vcmp.lt.s32.totalorder %v2121_v52, 2 }
 0x39e   : > { %vm2126_vm10 = vcmp.eq.s32.totalorder %v2121_v52, 2  ;;  %vm2123_vm12 = vcmp.eq.s32.totalorder %v2121_v52, 0  ;;  %v3154_v52 = vld [vmem:[%s3895_s12] sm:$0xff]  }
 0x39f   : > { %v1833_v62 = vclz %v2960_v61  ;;  %v2287_v63 = vshll.u32 %v2286_v50, 30  ;;  %v2310_v54 = vsub.s32 4, %v2286_v50  ;;  %vm1864_vm8 = vcmp.eq.s32.totalorder %v1859_v48, 2 }
 0x3a0   : > { %vm1861_vm11 = vcmp.eq.s32.totalorder %v1859_v48, 0  ;;  %vm1860_vm14 = vcmp.lt.s32.totalorder %v1859_v48, 2 }
 0x3a1   : > { %v2961_v5 = vadd.s32 4294967294, %v1833_v62  ;;  %v2288_v9 = vsub.s32 %v2284_v59, %v2287_v63 }
 0x3a3   : > { %vm2962_vm1 = vcmp.lt.s32.totalorder %v2961_v5, 0  ;;  %v2290_v16 = vsub.s32 0, %v2288_v9 }
 0x3a4   : > { %v1836_v10 = vsel %vm2962_vm1, 0, %v2961_v5 }
 0x3a5   : > { %v1837_v38 = vsub.s32 32, %v1836_v10  ;;  %v1841_v20 = vsub.s32 4294967266, %v1836_v10  ;;  %v2980_v26 = vmin.u32 %v2290_v16, %v2288_v9  ;;  %v1838_v1 = vshll.u32 %v1829_v57, %v1836_v10 }
 0x3a6   : > { %v2311_v57 = vsel %vm2226_vm6, %v2310_v54, %v2286_v50  ;;  %v1756_v50 = vcombine.high %v3662_v11, %v3662_v11 }
 0x3a7   : > { %v1839_v3 = vshrl.u32 %v1821_v17, %v1837_v38  ;;  %v1842_v28 = vadd.s32 127, %v1841_v20  ;;  %v2292_v30 = vclz %v2980_v26  ;;  %v2313_v61 = vsel %vm3743_vm7, 0, %v2311_v57 }
 0x3a8   : > { %v2317_v16 = vadd.s32 3, %v2313_v61  ;;  %v1759_v26 = vpack.c.bf16 %v1756_v50, %v1756_v50 }
 0x3a9   : > { %v1840_v32 = vor.u32 %v1839_v3, %v1838_v1  ;;  %v1843_v33 = vshll.u32 %v1842_v28, 23  ;;  %v2981_v25 = vadd.s32 4294967294, %v2292_v30 }
 0x3aa   : > { %v2318_v30 = vand.u32 3, %v2317_v16 }
 0x3ab   : > { %v1844_v7 = vor.u32 4788187, %v1843_v33  ;;  %vm2982_vm2 = vcmp.lt.s32.totalorder %v2981_v25, 0  ;;  %v1847_v6 = vcvt.s32.f32 %v1840_v32  ;;  %v1758_v32 = vpack.c.bf16 %v3662_v11, %v3662_v11 }
 0x3ac   : > { %v2295_v34 = vsel %vm2982_vm2, 0, %v2981_v25  ;;  %vm2320_vm0 = vcmp.eq.s32.totalorder %v2318_v30, 0  ;;  %vm2323_vm1 = vcmp.eq.s32.totalorder %v2318_v30, 2  ;;  %vm2319_vm2 = vcmp.lt.s32.totalorder %v2318_v30, 2 }
 0x3ad   : > { %v1845_v12 = vand.u32 2147483647, %v1844_v7  ;;  %v2296_v27 = vsub.s32 32, %v2295_v34  ;;  %v2300_v42 = vsub.s32 4294967266, %v2295_v34  ;;  %v2297_v23 = vshll.u32 %v2288_v9, %v2295_v34 }
 0x3ae   : > { %v1969_v7 = vand.u32 %v1759_v26, %v3577_v40  ;;  %v1966_v34 = vand.u32 %v1758_v32, %v3577_v40 }
 0x3af   : > { %v1848_v22 = vmul.f32 %v1847_v6, %v1845_v12  ;;  %v2298_v29 = vshrl.u32 %v2280_v35, %v2296_v27  ;;  %v2301_v39 = vadd.s32 127, %v2300_v42  ;;  %v3148_v12 = vld [vmem:[%s3894_s11] sm:$0xff]  }
 0x3b1   : > { %v1849_v37 = vxor.u32 2147483648, %v1848_v22  ;;  %v2299_v41 = vor.u32 %v2298_v29, %v2297_v23  ;;  %v2302_v14 = vshll.u32 %v2301_v39, 23  ;;  %v2513_v39 = vand.u32 3, %v2313_v61 }
 0x3b3   : > { %v1850_v21 = vsel %vm1767_vm4, %v1849_v37, %v1848_v22  ;;  %v2303_v43 = vor.u32 4788187, %v2302_v14  ;;  %v2306_v2 = vcvt.s32.f32 %v2299_v41  ;;  %vm2316_vm4 = vweird.f32 %v3668_v15  ;;  %v3150_v41 = vld [vmem:[%s3898_s15] sm:$0xff]  }
 0x3b4   : > { %v1853_v8 = vsel %vm1766_vm5, %v3665_v13, %v1850_v21  ;;  %vm2515_vm5 = vcmp.eq.s32.totalorder %v2513_v39, 0 }
 0x3b5   : > { %3168 = vcosq.f32 %v1853_v8  ;;  %v2304_v45 = vand.u32 2147483647, %v2303_v43 }
 0x3b6   : > { %3170 = vsinq.f32 %v1853_v8 }
 0x3b7   : > { %v2307_v47 = vmul.f32 %v2306_v2, %v2304_v45  ;;  %v3151_v45 = vld [vmem:[%s3898_s15 + $0x8] sm:$0xff]  }
 0x3b9   : > { %v2308_v51 = vxor.u32 2147483648, %v2307_v47 }
 0x3bb   : > { %v2309_v18 = vsel %vm2226_vm6, %v2308_v51, %v2307_v47  ;;  %vm2518_vm6 = vcmp.eq.s32.totalorder %v2513_v39, 2  ;;  %v3152_v51 = vld [vmem:[%s3896_s13] sm:$0xff]  }
 0x3bc   : > { %v2312_v55 = vsel %vm3743_vm7, %v3668_v15, %v2309_v18  ;;  %vm2514_vm7 = vcmp.lt.s32.totalorder %v2513_v39, 2  ;;  %v3153_v15 = vld [vmem:[%s3896_s13 + $0x8] sm:$0xff]  }
 0x3bd   : > { %3172 = vcosq.f32 %v2312_v55 }
 0x3be   : > { %3174 = vsinq.f32 %v2312_v55 }
 0x3bf   : > { %v3169_v56 = vpop.eup %3168 }
 0x3c0   : > { %v3171_v36 = vpop.eup %3170  ;;  %v1865_v46 = vxor.u32 2147483648, %v3169_v56 }
 0x3c1   : > { %v1862_v58 = vxor.u32 2147483648, %v3171_v36 }
 0x3c2   : > { %v1866_v19 = vsel %vm1864_vm8, %v1865_v46, %v3171_v36  ;;  %v2128_v59 = vsel %vm2126_vm10, %v1865_v46, %v3171_v36  ;;  %v3156_v36 = vld [vmem:[%s3897_s14] sm:$0xff]   ;;  %v2618_v46 = vpop.permute.xlu1 %2617 }
 0x3c3   : > { %v1863_v60 = vsel %vm1861_vm11, %v3169_v56, %v1862_v58  ;;  %v2125_v4 = vsel %vm2123_vm12, %v3169_v56, %v1862_v58  ;;  %v3155_v56 = vld [vmem:[%s3895_s12 + $0x8] sm:$0xff]  }
 0x3c4   : > { %v1867_v62 = vsel %vm1860_vm14, %v1863_v60, %v1866_v19  ;;  %v2129_v63 = vsel %vm2122_vm9, %v2125_v4, %v2128_v59  ;;  %v2623_v59 = vpop.permute.xlu0 %2622 }
 0x3c5   : > { %v1868_v5 = vsel %vm1857_vm15, nan, %v1867_v62  ;;  %v2130_v9 = vsel %vm1857_vm15, nan, %v2129_v63 }
 0x3c6   : > { %v1870_v10 = vcombine.high %v1868_v5, %v1868_v5  ;;  %v1872_v17 = vpack.c.bf16 %v1868_v5, %v1868_v5  ;;  %v2132_v1 = vcombine.high %v2130_v9, %v2130_v9  ;;  %v2134_v37 = vpack.c.bf16 %v2130_v9, %v2130_v9 }
 0x3c7   : > { %v3173_v38 = vpop.eup %3172 }
 0x3c8   : > { %v1873_v20 = vpack.c.bf16 %v1870_v10, %v1870_v10  ;;  %v3175_v3 = vpop.eup %3174  ;;  %v1891_v13 = vand.u32 %v1872_v17, %v3577_v40  ;;  %v2324_v25 = vxor.u32 2147483648, %v3173_v38  ;;  %v2135_v6 = vpack.c.bf16 %v2132_v1, %v2132_v1 }
 0x3c9   : > { %v2321_v33 = vxor.u32 2147483648, %v3175_v3  ;;  %v2153_v21 = vand.u32 %v2134_v37, %v3577_v40 }
 0x3ca   : > { %v1894_v28 = vand.u32 %v1873_v20, %v3577_v40  ;;  %v2325_v27 = vsel %vm2323_vm1, %v2324_v25, %v3175_v3  ;;  %v2156_v42 = vand.u32 %v2135_v6, %v3577_v40  ;;  %v2520_v8 = vsel %vm2518_vm6, %v2324_v25, %v3175_v3 }
 0x3cb   : > { %v2322_v35 = vsel %vm2320_vm0, %v3173_v38, %v2321_v33  ;;  %v2517_v31 = vsel %vm2515_vm5, %v3173_v38, %v2321_v33  ;;  %v2628_v38 = vpop.permute.xlu1 %2627 }
 0x3cc   : > { %1896 = vmatprep.subr.bf16.mxu1 %v1894_v28  ;;  %v2326_v22 = vsel %vm2319_vm2, %v2322_v35, %v2325_v27  ;;  %v2521_v44 = vsel %vm2514_vm7, %v2517_v31, %v2520_v8 }
 0x3cd   : > { %1897 = vmatpush1.bf16.msra.mxu1 %v1891_v13  ;;  %v2327_v23 = vsel %vm2316_vm4, nan, %v2326_v22  ;;  %v2522_v2 = vsel %vm2316_vm4, nan, %v2521_v44  ;;  %v2633_v13 = vpop.permute.xlu0 %2632 }
 0x3ce   : > { %1971 = vmatprep.subr.bf16.mxu1 %v1969_v7  ;;  %v2329_v29 = vcombine.high %v2327_v23, %v2327_v23  ;;  %v2524_v47 = vcombine.high %v2522_v2, %v2522_v2  ;;  %v2331_v49 = vpack.c.bf16 %v2327_v23, %v2327_v23  ;;  %v2526_v48 = vpack.c.bf16 %v2522_v2, %v2522_v2 }
 0x3d0   : > { %2965 = vmatmul.mubr.msk.bf16.vlgmr.msra.gmra.mrb[12].mxu1 %vm793_vm13, %v3148_v12  ;;  %v2332_v14 = vpack.c.bf16 %v2329_v29, %v2329_v29  ;;  %v2527_v53 = vpack.c.bf16 %v2524_v47, %v2524_v47  ;;  %v2350_v18 = vand.u32 %v2331_v49, %v3577_v40  ;;  %v2545_v55 = vand.u32 %v2526_v48, %v3577_v40 }
 0x3d1   : > { %1972 = vmatpush1.bf16.msra.mxu1 %v1966_v34  ;;  %1938 = vmatprep.mubr.bf16.mxu1 %v3240_v0  ;;  %v2679_v44 = vpop.permute.xlu0 %2678 }
 0x3d2   : > { %2158 = vmatprep.subr.bf16.mxu1 %v2156_v42  ;;  %v2353_v43 = vand.u32 %v2332_v14, %v3577_v40  ;;  %v2548_v54 = vand.u32 %v2527_v53, %v3577_v40  ;;  %v3157_v40 = vld [vmem:[%s3897_s14 + $0x8] sm:$0xff]  }
 0x3d3   : > { %v3159_v14 = vld [vmem:[%s3900_s17 + $0x8] sm:$0xff]  }
 0x3d8   : > { %2966 = vmatmul.mubr.msk.bf16.gmra.mrb[16].mxu1 %vm793_vm13, %v3149_v24 }
 0x3d9   : > { %2003 = vmatprep.mubr.bf16.mxu1 %v3240_v0 }
 0x3e0   : > { %2969 = vmatmul.mubr.msk.bf16.vlgmr.msra.gmra.mrb[12].mxu1 %vm793_vm13, %v3150_v41  ;;  %v3158_v41 = vld [vmem:[%s3900_s17] sm:$0xff]  }
 0x3e1   : > { %2159 = vmatpush1.bf16.msra.mxu1 %v2153_v21  ;;  %2013 = vmatprep.mubr.bf16.mxu1 %v3240_v0  ;;  %v2674_v21 = vpop.permute.xlu1 %2673 }
 0x3e2   : > { %2355 = vmatprep.subr.bf16.mxu1 %v2353_v43 }
 0x3e8   : > { %2970 = vmatmul.mubr.msk.bf16.gmra.mrb[16].mxu1 %vm793_vm13, %v3151_v45 }
 0x3e9   : > { %2190 = vmatprep.mubr.bf16.mxu1 %v3240_v0 }
 0x3f0   : > { %2977 = vmatmul.mubr.msk.bf16.vlgmr.msra.gmra.mrb[12].mxu1 %vm793_vm13, %v3152_v51 }
 0x3f1   : > { %2356 = vmatpush1.bf16.msra.mxu1 %v2350_v18  ;;  %2200 = vmatprep.mubr.bf16.mxu1 %v3240_v0 }
 0x3f2   : > { %2550 = vmatprep.subr.bf16.mxu1 %v2548_v54 }
 0x3f8   : > { %2978 = vmatmul.mubr.msk.bf16.gmra.mrb[16].mxu1 %vm793_vm13, %v3153_v15 }
 0x3f9   : > { %2387 = vmatprep.mubr.bf16.mxu1 %v3240_v0 }
 0x400   : > { %2985 = vmatmul.mubr.msk.bf16.vlgmr.msra.gmra.mrb[12].mxu1 %vm793_vm13, %v3154_v52 }
 0x401   : > { %2551 = vmatpush1.bf16.msra.mxu1 %v2545_v55  ;;  %2397 = vmatprep.mubr.bf16.mxu1 %v3240_v0  ;;  %v2684_v55 = vpop.permute.xlu1 %2683 }
 0x408   : > { %2986 = vmatmul.mubr.msk.bf16.gmra.mrb[16].mxu1 %vm793_vm13, %v3155_v56 }
 0x409   : > { %2582 = vmatprep.mubr.bf16.mxu1 %v3240_v0 }
 0x410   : > { %2993 = vmatmul.mubr.msk.bf16.vlgmr.msra.gmra.mrb[12].mxu1 %vm793_vm13, %v3156_v36 }
 0x411   : > { %2592 = vmatprep.mubr.bf16.mxu1 %v3240_v0 }
 0x418   : > { %2994 = vmatmul.mubr.msk.bf16.gmra.mrb[16].mxu1 %vm793_vm13, %v3157_v40 }
 0x4e3   : > { %v2584_v57 = vpop.f32.mrb[12].mxu1 }
 0x4e4   : > { %v2635_v58 = vadd.f32 %v2618_v46, %v2584_v57  ;;  %v2586_v19 = vpop.f32.mrb[13].mxu1 }
 0x4e5   : > { %v2636_v60 = vadd.f32 %v2618_v46, %v2586_v19  ;;  %v2588_v4 = vpop.f32.mrb[14].mxu1 }
 0x4e6   : > { %v2643_v61 = vmul.f32 0.01, %v2635_v58  ;;  %v2637_v62 = vadd.f32 %v2623_v59, %v2588_v4  ;;  %v2590_v50 = vpop.f32.mrb[15].mxu1 }
 0x4e7   : > { %v2644_v63 = vmul.f32 0.01, %v2636_v60  ;;  %v2638_v5 = vadd.f32 %v2623_v59, %v2590_v50 }
 0x4e8   : > { %v2645_v9 = vmul.f32 0.01, %v2637_v62  ;;  %v2651_v16 = vmax.f32 %v2635_v58, %v2643_v61  ;;  %v2689_v58 = vpop.permute.xlu0 %2688 }
 0x4e9   : > { %v2646_v10 = vmul.f32 0.01, %v2638_v5  ;;  %v2652_v20 = vmax.f32 %v2636_v60, %v2644_v63 }
 0x4ea   : > { %v2653_v17 = vmax.f32 %v2637_v62, %v2645_v9 }
 0x4eb   : > { %v2654_v26 = vmax.f32 %v2638_v5, %v2646_v10  ;;  %v2594_v1 = vpop.f32.mrb[16].mxu1 }
 0x4ec   : > { %v2667_v3 = vpack.c.bf16 %v2653_v17, %v2651_v16  ;;  %v2639_v28 = vadd.f32 %v2628_v38, %v2594_v1  ;;  %v2596_v30 = vpop.f32.mrb[17].mxu1  ;;  %v2777_v1 = vld [vmem:[%s3902_s19] sm:$0x3] }
 0x4ed   : > { %v2640_v32 = vadd.f32 %v2628_v38, %v2596_v30  ;;  %v2598_v33 = vpop.f32.mrb[18].mxu1  ;;  %v2668_v25 = vpack.c.bf16 %v2654_v26, %v2652_v20 }
 0x4ee   : > { %v2647_v7 = vmul.f32 0.01, %v2639_v28  ;;  %v2641_v12 = vadd.f32 %v2633_v13, %v2598_v33  ;;  %v2600_v6 = vpop.f32.mrb[19].mxu1 }
 0x4ef   : > { %v2648_v34 = vmul.f32 0.01, %v2640_v32  ;;  %v2642_v35 = vadd.f32 %v2633_v13, %v2600_v6  ;;  %2707 = vmatprep.subr.bf16.mxu0 %v2668_v25 }
 0x4f0   : > { %v2649_v27 = vmul.f32 0.01, %v2641_v12  ;;  %2708 = vmatpush1.bf16.msra.mxu0 %v2667_v3  ;;  %v2655_v22 = vmax.f32 %v2639_v28, %v2647_v7  ;;  %v2785_v3 = vpop.permute.xlu1 %2784 }
 0x4f1   : > { %v2650_v42 = vmul.f32 0.01, %v2642_v35  ;;  %v2656_v23 = vmax.f32 %v2640_v32, %v2648_v34 }
 0x4f2   : > { %v2657_v24 = vmax.f32 %v2641_v12, %v2649_v27 }
 0x4f3   : > { %v2658_v29 = vmax.f32 %v2642_v35, %v2650_v42 }
 0x4f4   : > { %v2669_v39 = vpack.c.bf16 %v2657_v24, %v2655_v22 }
 0x4f5   : > { %v2670_v37 = vpack.c.bf16 %v2658_v29, %v2656_v23 }
 0x4f7   : > { %2709 = vmatprep.subr.bf16.mxu0 %v2670_v37 }
 0x4f8   : > { %2710 = vmatpush1.bf16.msra.mxu0 %v2669_v39 }
 0x4fb   : > { %2997 = vmatmul.mubr.msk.bf16.vlgmr.msra.gmra.mrb[8].mxu0 %vm1615_vm3, %v3158_v41 }
 0x4fc   : > { %2749 = vmatprep.mubr.bf16.mxu0 %v3240_v0 }
 0x503   : > { %2998 = vmatmul.mubr.msk.bf16.gmra.mrb[12].mxu0 %vm1615_vm3, %v3159_v14 }
 0x504   : > { %2822 = vmatprep.mubr.bf16.mxu0 %v3240_v0 }
 0x5ce   : > { %v2741_v31 = vpop.f32.mrb[8].mxu0 }
 0x5cf   : > { %v2742_v8 = vadd.f32 %v2741_v31, %v2674_v21  ;;  %v2743_v43 = vpop.f32.mrb[9].mxu0 }
 0x5d0   : > { %v2744_v45 = vadd.f32 %v2743_v43, %v2674_v21  ;;  %v2745_v2 = vpop.f32.mrb[10].mxu0 }
 0x5d1   : > { %v2760_v47 = vmul.f32 0.01, %v2742_v8  ;;  %v2746_v49 = vadd.f32 %v2745_v2, %v2679_v44  ;;  %v2747_v51 = vpop.f32.mrb[11].mxu0 }
 0x5d2   : > { %v2761_v53 = vmul.f32 0.01, %v2744_v45  ;;  %v2748_v18 = vadd.f32 %v2747_v51, %v2679_v44 }
 0x5d3   : > { %v2762_v54 = vmul.f32 0.01, %v2746_v49  ;;  %v2768_v48 = vmax.f32 %v2742_v8, %v2760_v47 }
 0x5d4   : > { %v2763_v15 = vmul.f32 0.01, %v2748_v18  ;;  %v2769_v56 = vmax.f32 %v2744_v45, %v2761_v53 }
 0x5d5   : > { %v2770_v52 = vmax.f32 %v2746_v49, %v2762_v54 }
 0x5d6   : > { %v2771_v36 = vmax.f32 %v2748_v18, %v2763_v15  ;;  %v2751_v0 = vpop.f32.mrb[12].mxu0 }
 0x5d7   : > { %v2778_v40 = vpack.c.bf16 %v2770_v52, %v2768_v48  ;;  %v2752_v46 = vadd.f32 %v2751_v0, %v2684_v55  ;;  %v2753_v57 = vpop.f32.mrb[13].mxu0 }
 0x5d8   : > { %v2754_v19 = vadd.f32 %v2753_v57, %v2684_v55  ;;  %v2755_v59 = vpop.f32.mrb[14].mxu0  ;;  %v2779_v60 = vpack.c.bf16 %v2771_v36, %v2769_v56 }
 0x5d9   : > { %v2764_v4 = vmul.f32 0.01, %v2752_v46  ;;  %v2756_v61 = vadd.f32 %v2755_v59, %v2689_v58  ;;  %v2757_v62 = vpop.f32.mrb[15].mxu0 }
 0x5da   : > { %v2765_v50 = vmul.f32 0.01, %v2754_v19  ;;  %v2758_v63 = vadd.f32 %v2757_v62, %v2689_v58  ;;  %2790 = vmatprep.subr.bf16.mxu0 %v2779_v60 }
 0x5db   : > { %v2766_v5 = vmul.f32 0.01, %v2756_v61  ;;  %2791 = vmatpush1.bf16.msra.mxu0 %v2778_v40  ;;  %v2772_v10 = vmax.f32 %v2752_v46, %v2764_v4 }
 0x5dc   : > { %v2767_v9 = vmul.f32 0.01, %v2758_v63  ;;  %v2773_v17 = vmax.f32 %v2754_v19, %v2765_v50 }
 0x5dd   : > { %v2774_v16 = vmax.f32 %v2756_v61, %v2766_v5 }
 0x5de   : > { %v2775_v38 = vmax.f32 %v2758_v63, %v2767_v9 }
 0x5df   : > { %v2780_v20 = vpack.c.bf16 %v2774_v16, %v2772_v10 }
 0x5e0   : > { %v2781_v26 = vpack.c.bf16 %v2775_v38, %v2773_v17 }
 0x5e2   : > { %2792 = vmatprep.subr.bf16.mxu0 %v2781_v26 }
 0x5e3   : > { %2793 = vmatpush1.bf16.msra.mxu0 %v2780_v20 }
 0x5e6   : > { %2999 = vmatmul.mubr.msk.bf16.vlgmr.msra.gmra.mrb[16].mxu0 %vm1615_vm3, %v2777_v1 }
 0x6b9   : > { %v2824_v28 = vpop.f32.mrb[16].mxu0 }
 0x6ba   : > { %v2825_v30 = vadd.f32 %v2824_v28, %v2785_v3  ;;  %v2826_v13 = vpop.f32.mrb[17].mxu0 }
 0x6bb   : > { %v2827_v32 = vadd.f32 %v2826_v13, %v2785_v3  ;;  %v2828_v33 = vpop.f32.mrb[18].mxu0 }
 0x6bc   : > { %v2829_v25 = vpop.f32.mrb[19].mxu0 }
 0x6bd   : > { %v2833_v7 = vcombine.low %v2825_v30, %v2827_v32 }
 0x6bf   : > { %v2835_v12 = vadd.f32 %v2833_v7, %v3662_v11 }
 0x6c1   : > { %2836 = vst [vmem:[%s650_s6] sm:$0x77] %v2835_v12 }
 0x6c2   : > { %3189 = shalt.err (!%p3186_p3)
}
 0x6c3   : > { %s3190_s30 = scalar_lea.hbm %s3841_s1, 128  ;;  %s3194_s26 = scalar_lea.hbm %s3904_s21, 1024 }
 0x6c4   : > { %p3191_p4 = scmp.ne.s32.totalorder %s3841_s1, %s3190_s30  ;;  %p3195_p9 = scmp.lt.u32.totalorder %s3841_s1, %s3904_s21 }
 0x6c5   : > { %p3196_p10 = scmp.lt.u32.totalorder %s3194_s26, %s3190_s30  ;;  %p3198_p12 = scmp.lt.u32.totalorder %s3190_s30, %s3841_s1 }
 0x6c6   : > { %p3192_p7 = pnand %p3191_p4, %p3397_p5 }
 0x6c7   : > { %p3197_p11 = por %p3196_p10, %p3195_p9 }
 0x6c8   : > { %p3193_p8 = pneg %p3192_p7 }
 0x6c9   : > { %p3199_p13 = por %p3198_p12, %p3197_p11 }
 0x6cb   : > { %p3200_p0 = pnand %p3199_p13, %p3193_p8 }
 0x6cd   : > { %3203 = shalt.err (!%p3200_p0)
}
 0x6ce   : > { %3086 = dma.vmem_to_hbm [thread:$0]  (%p3397_p5), %s3843_s8, 128, %s3841_s1, %s2838_s4  }
 0x6cf PF: > { %p3092_p1 = scmp.ge.s32.totalorder %s3238_s27, 2  ;;  %s2864_s7 = sand.u32 1, %s3226_s2  }
 0x6d0   : > { %s2865_s9 = scalar_lea.sflag [#allocation3], %s2864_s7 }
 0x6d1   : > { %p3089_p2 = pnand %p3092_p1, %p3401_p6 }
 0x6d3   : > { %3221 = dma.done.wait (!%p3089_p2), %s2865_s9, 128  }
 0x6d4   : > { %3223 = vsyncadd (!%p3089_p2), %s2865_s9, 4294967168  ;;  %s3942_s0 = sld [smem:[#allocation5_spill]]  ;;  %s3943_s26 = sld [smem:[#allocation6_spill]] }
 0x6d5   : > { %p31_p3 = scmp.ge.s32.totalorder %s3384_s29, 10   ;;  %s3944_s2 = smov %s3230_s25 }
 0x6d6   : > { %s3946_s27 = smov %s3384_s29 }
 0x6d7   :  { %33 = sbr.rel (!%p31_p3) target bundleno = 14 (0xe), region = 139 }
 0x6da   : > { %s3945_s25 = smov %s3942_s0 }
 0x6de   :  { %2870 = vsyncpa [#allocation3], 1 }
 0x6df   :  { %2872 = vsyncpa [#allocation3 + $0x1], 1 }

</bundles_post_ra>
